<compile_context>
chip_gen: v7x
topology: tpu7x:2x2x1
jax: 0.10.0
libtpu: 0.0.40
codegen_flags: <defaults>
</compile_context>

<pallas_src>
import math

import jax
import jax.numpy as jnp
from jax.experimental import pallas as pl
from jax.experimental.pallas import tpu as pltpu


# ---------------------------------------------------------------------------
# Hardware-aware tiling helpers
# ---------------------------------------------------------------------------

def _round_up(x, m):
    return (x + m - 1) // m * m


def _tpu_vmem_bytes():
    try:
        return int(pltpu.get_tpu_info().vmem_capacity_bytes)
    except Exception:
        return 64 * 1024 * 1024          # conservative (v7x-sized) fallback


_PHYS_VMEM = _tpu_vmem_bytes()
# Scoped VMEM limit: generous on 128 MiB parts (v5e/v6e), capped on 64 MiB v7x.
_VMEM_LIMIT = int(min(_PHYS_VMEM * 3 // 4, 96 * 1024 * 1024))
# Row-tile cap derived from VMEM so v5e/v6e take bigger blocks than v7x.
_M_CAP = 1024 if _PHYS_VMEM >= (96 << 20) else 512


def _mosaic_params(sem=None):
    if sem is None:
        return pltpu.CompilerParams(vmem_limit_bytes=_VMEM_LIMIT)
    return pltpu.CompilerParams(dimension_semantics=sem,
                                vmem_limit_bytes=_VMEM_LIMIT)


def _choose_m_tile(m):
    """Row (sublane) tile: multiple of 8, <= _M_CAP, and when possible giving
    >= 2 blocks along this parallel axis so both v7x TensorCores get work."""
    mp = _round_up(m, 8)
    for t in (1024, 512, 384, 256, 128, 64, 32, 16, 8):
        if t <= _M_CAP and mp % t == 0 and mp // t >= 2:
            return t, mp
    if mp <= _M_CAP:
        return mp, mp
    return _M_CAP, _round_up(mp, _M_CAP)


def _choose_n_tile(n):
    """Output-channel (lane) tile: full extent if small, else 128-multiples."""
    if n <= 512:
        return n, n
    np_ = _round_up(n, 128)
    for t in (512, 256, 128):
        if np_ % t == 0:
            return t, np_
    return 128, np_


# ---------------------------------------------------------------------------
# Fused segmented matmul:
#   sum_s [per-channel BN+ReLU prologue_s](A_s) @ B_s  ->  [BN/bias(+ReLU)]
# Used for the stem conv (1 segment, epilogue) and for the dense layers'
# 1x1 bottleneck conv (one segment per previously produced feature tensor).
# ---------------------------------------------------------------------------

def _make_seg_mm_kernel(has_pro, has_epi, epi_relu):
    nseg = len(has_pro)

    def kernel(*refs):
        idx = 0
        acc = None
        for s in range(nseg):
            a_ref, b_ref = refs[idx], refs[idx + 1]
            idx += 2
            a = a_ref[...]
            if has_pro[s]:
                ps_ref, pb_ref = refs[idx], refs[idx + 1]
                idx += 2
                a = jnp.maximum(a.astype(jnp.float32) * ps_ref[...]
                                + pb_ref[...], 0.0)
            a = a.astype(jnp.bfloat16)
            d = jnp.dot(a, b_ref[...].astype(jnp.bfloat16),
                        preferred_element_type=jnp.float32)
            acc = d if acc is None else acc + d
        if has_epi:
            es_ref, eb_ref = refs[idx], refs[idx + 1]
            idx += 2
            acc = acc * es_ref[...] + eb_ref[...]
            if epi_relu:
                acc = jnp.maximum(acc, 0.0)
        o_ref = refs[idx]
        o_ref[...] = acc.astype(o_ref.dtype)

    return kernel


def matmul_segments(segments, *, epi=None, epi_relu=False,
                    out_dtype=jnp.bfloat16):
    """segments: list of (a (M,Ks), b (Ks,N), pro) with pro None or
    (scale (1,Ks), bias (1,Ks)) applied with ReLU before the dot."""
    m = segments[0][0].shape[0]
    n_out = segments[0][1].shape[1]
    tm, mp = _choose_m_tile(m)
    tn, np_ = _choose_n_tile(n_out)

    a_map = lambda i, j: (i, 0)
    b_map = lambda i, j: (0, j)
    v_map = lambda i, j: (0, 0)
    e_map = lambda i, j: (0, j)

    inputs, in_specs, has_pro = [], [], []
    for a, b, pro in segments:
        assert a.shape[0] == m and a.shape[1] == b.shape[0]
        ks = a.shape[1]
        if mp > m:
            a = jnp.pad(a, ((0, mp - m), (0, 0)))
        if np_ > n_out:
            b = jnp.pad(b, ((0, 0), (0, np_ - n_out)))
        inputs += [a, b]
        in_specs += [pl.BlockSpec((tm, ks), a_map),
                     pl.BlockSpec((ks, tn), b_map)]
        has_pro.append(pro is not None)
        if pro is not None:
            ps, pb = pro
            inputs += [ps.astype(jnp.float32), pb.astype(jnp.float32)]
            in_specs += [pl.BlockSpec((1, ks), v_map),
                         pl.BlockSpec((1, ks), v_map)]

    if epi is not None:
        es, eb = epi
        if np_ > n_out:
            es = jnp.pad(es, ((0, 0), (0, np_ - n_out)))
            eb = jnp.pad(eb, ((0, 0), (0, np_ - n_out)))
        inputs += [es.astype(jnp.float32), eb.astype(jnp.float32)]
        in_specs += [pl.BlockSpec((1, tn), e_map),
                     pl.BlockSpec((1, tn), e_map)]

    out = pl.pallas_call(
        _make_seg_mm_kernel(tuple(has_pro), epi is not None, epi_relu),
        out_shape=jax.ShapeDtypeStruct((mp, np_), out_dtype),
        grid_spec=pltpu.PrefetchScalarGridSpec(
            num_scalar_prefetch=0,
            grid=(mp // tm, np_ // tn),
            in_specs=in_specs,
            out_specs=pl.BlockSpec((tm, tn), lambda i, j: (i, j))),
        compiler_params=_mosaic_params(("parallel", "parallel")),
    )(*inputs)

    if (mp, np_) != (m, n_out):
        out = out[:m, :n_out]
    return out


# ---------------------------------------------------------------------------
# Direct 3x3 / stride-1 / pad-1 convolution (no materialized im2col)
# ---------------------------------------------------------------------------

def _make_conv3x3_kernel(h, w):
    def kernel(x_ref, w_ref, o_ref):
        # x_ref: (1, h+2, w+2, C); w_ref: (9, C, G); o_ref: (1, h, w, G)
        for ho in range(h):
            acc = None
            for kh in range(3):
                row = x_ref[0, ho + kh]                     # (w+2, C)
                for kw in range(3):
                    a = row[kw:kw + w, :]
                    d = jnp.dot(a, w_ref[kh * 3 + kw],
                                preferred_element_type=jnp.float32)
                    acc = d if acc is None else acc + d
            o_ref[0, ho] = acc.astype(o_ref.dtype)

    return kernel


def conv3x3_pallas(x, w9):
    """NHWC 3x3 conv; w9 is (9, Cin, Cout) bf16; output channels unnormalized
    (later layers apply their norm1 as a matmul prologue)."""
    n, h, w, c = x.shape
    g = w9.shape[-1]
    xp = jnp.pad(x, ((0, 0), (1, 1), (1, 1), (0, 0)))       # small halo pad
    return pl.pallas_call(
        _make_conv3x3_kernel(h, w),
        out_shape=jax.ShapeDtypeStruct((n, h, w, g), x.dtype),
        grid_spec=pltpu.PrefetchScalarGridSpec(
            num_scalar_prefetch=0,
            grid=(n,),
            in_specs=[pl.BlockSpec((1, h + 2, w + 2, c),
                                   lambda i: (i, 0, 0, 0)),
                      pl.BlockSpec((9, c, g), lambda i: (0, 0, 0))],
            out_specs=pl.BlockSpec((1, h, w, g), lambda i: (i, 0, 0, 0))),
        compiler_params=_mosaic_params(("parallel",)),
    )(xp, w9)


# ---------------------------------------------------------------------------
# Stem max pool 3x3 / stride-2 / pad-1 (single pass, no k^2 HBM views).
# Uses a free column-pairing reshape (w -> w/2, 2C) so no strided loads.
# ---------------------------------------------------------------------------

def _make_maxpool_kernel(ho_n, wo_n, c):
    def kernel(x_ref, o_ref):
        for ho in range(ho_n):
            best = None
            for kh in range(3):
                v = x_ref[0, 2 * ho + kh]                   # (wp//2, 2C)
                even, odd = v[:, :c], v[:, c:]
                row = jnp.maximum(jnp.maximum(even[:wo_n], odd[:wo_n]),
                                  even[1:wo_n + 1])
                best = row if best is None else jnp.maximum(best, row)
            o_ref[0, ho] = best.astype(o_ref.dtype)

    return kernel


def maxpool3x3s2_pallas(x):
    """Zero padding is exact here because the input is post-ReLU (>= 0)."""
    n, h, w, c = x.shape
    ho = (h + 2 - 3) // 2 + 1
    wo = (w + 2 - 3) // 2 + 1
    wp = w + 2 + ((w + 2) % 2)                              # even padded width
    xp = jnp.pad(x, ((0, 0), (1, 1), (1, wp - w - 1), (0, 0)))
    xr = xp.reshape(n, h + 2, wp // 2, 2 * c)               # free reshape
    return pl.pallas_call(
        _make_maxpool_kernel(ho, wo, c),
        out_shape=jax.ShapeDtypeStruct((n, ho, wo, c), x.dtype),
        grid_spec=pltpu.PrefetchScalarGridSpec(
            num_scalar_prefetch=0,
            grid=(n,),
            in_specs=[pl.BlockSpec((1, h + 2, wp // 2, 2 * c),
                                   lambda i: (i, 0, 0, 0))],
            out_specs=pl.BlockSpec((1, ho, wo, c), lambda i: (i, 0, 0, 0))),
        compiler_params=_mosaic_params(("parallel",)),
    )(xr)


# ---------------------------------------------------------------------------
# Transition: per-segment norm+relu fused into a 2x2/stride-2 average pool,
# followed (in the same kernel) by the segmented 1x1 conv.  The conv/avg-pool
# commutation is exact (both linear, conv has no bias).
# ---------------------------------------------------------------------------

def _make_transition_kernel(ho_n, wo_n, seg_cs, c_out):
    nseg = len(seg_cs)

    def kernel(*refs):
        o_ref = refs[-1]
        for ho in range(ho_n):
            acc = None
            for s in range(nseg):
                cs = seg_cs[s]
                x_ref, s_ref, b_ref, w_ref = refs[4 * s: 4 * s + 4]
                pooled = None
                for kh in range(2):
                    v = x_ref[0, 2 * ho + kh].astype(jnp.float32)   # (wo, 2cs)
                    for half in range(2):
                        hv = v[:, half * cs:(half + 1) * cs]
                        hv = jnp.maximum(hv * s_ref[...] + b_ref[...], 0.0)
                        pooled = hv if pooled is None else pooled + hv
                pooled = pooled * 0.25
                d = jnp.dot(pooled.astype(jnp.bfloat16), w_ref[...],
                            preferred_element_type=jnp.float32)
                acc = d if acc is None else acc + d
            o_ref[0, ho] = acc.astype(o_ref.dtype)

    return kernel


def transition_pallas(segs, tsegs, c_out):
    n, h, w, _ = segs[0].shape
    assert h % 2 == 0 and w % 2 == 0
    ho, wo = h // 2, w // 2
    seg_cs = [int(s.shape[-1]) for s in segs]

    inputs, in_specs = [], []
    for x, tp in zip(segs, tsegs):
        cs = int(x.shape[-1])
        xr = x.reshape(n, h, wo, 2 * cs)                    # free reshape
        inputs += [xr, tp["scale"], tp["bias"], tp["w"]]
        in_specs += [pl.BlockSpec((1, h, wo, 2 * cs), lambda i: (i, 0, 0, 0)),
                     pl.BlockSpec((1, cs), lambda i: (0, 0)),
                     pl.BlockSpec((1, cs), lambda i: (0, 0)),
                     pl.BlockSpec((cs, c_out), lambda i: (0, 0))]

    return pl.pallas_call(
        _make_transition_kernel(ho, wo, seg_cs, c_out),
        out_shape=jax.ShapeDtypeStruct((n, ho, wo, c_out), jnp.bfloat16),
        grid_spec=pltpu.PrefetchScalarGridSpec(
            num_scalar_prefetch=0,
            grid=(n,),
            in_specs=in_specs,
            out_specs=pl.BlockSpec((1, ho, wo, c_out),
                                   lambda i: (i, 0, 0, 0))),
        compiler_params=_mosaic_params(("parallel",)),
    )(*inputs)


# ---------------------------------------------------------------------------
# Head: norm5 + ReLU + global average pool + classifier, all in one kernel
# (classifier output lane-padded to a 128 multiple, bias folded in).
# ---------------------------------------------------------------------------

def _make_head_kernel(seg_cs, nbatch, ncp):
    nseg = len(seg_cs)

    def kernel(*refs):
        o_ref = refs[-1]
        fcb_ref = refs[-2]
        acc = jnp.zeros((nbatch, ncp), jnp.float32) + fcb_ref[...]
        for s in range(nseg):
            x_ref, s_ref, b_ref, w_ref = refs[4 * s: 4 * s + 4]
            y = jnp.maximum(
                x_ref[...].astype(jnp.float32) * s_ref[...] + b_ref[...], 0.0)
            pooled = jnp.mean(y, axis=1)                    # (N, cs)
            acc = acc + jnp.dot(pooled.astype(jnp.bfloat16), w_ref[...],
                                preferred_element_type=jnp.float32)
        o_ref[...] = acc

    return kernel


def head_pallas(segs, norm_sbs, fc_ws, fc_b, ncp):
    n, h, w, _ = segs[0].shape
    seg_cs = [int(s.shape[-1]) for s in segs]
    inputs = []
    for x, (sc, bs), wseg in zip(segs, norm_sbs, fc_ws):
        cs = int(x.shape[-1])
        inputs += [x.reshape(n, h * w, cs),
                   sc.reshape(1, 1, cs), bs.reshape(1, 1, cs), wseg]
    inputs.append(fc_b)
    return pl.pallas_call(
        _make_head_kernel(seg_cs, n, ncp),
        out_shape=jax.ShapeDtypeStruct((n, ncp), jnp.float32),
        compiler_params=_mosaic_params(),
    )(*inputs)


# ---------------------------------------------------------------------------
# Glue: im2col for the 7x7 stem only (K zero-padded to a 128 multiple)
# ---------------------------------------------------------------------------

def _im2col(x, kh, kw, stride, pad):
    n, h, w, c = x.shape
    ho = (h + 2 * pad - kh) // stride + 1
    wo = (w + 2 * pad - kw) // stride + 1
    if pad:
        x = jnp.pad(x, ((0, 0), (pad, pad), (pad, pad), (0, 0)))
    cols = [
        x[:, i:i + stride * ho:stride, j:j + stride * wo:stride, :]
        for i in range(kh) for j in range(kw)
    ]
    patches = jnp.concatenate(cols, axis=-1).reshape(n * ho * wo, kh * kw * c)
    return patches, ho, wo


# ---------------------------------------------------------------------------
# Parameter init (mirrors PyTorch __init__) and one-time kernel layout prep
# ---------------------------------------------------------------------------

def _conv_w(key, cout, cin, kh, kw):
    fan_in = cin * kh * kw
    std = math.sqrt(2.0 / fan_in)                  # kaiming_normal_, fan_in
    return jax.random.normal(key, (cout, cin, kh, kw), dtype=jnp.float32) * std


def _bn(c):
    return dict(gamma=jnp.ones((c,), jnp.float32),
                beta=jnp.zeros((c,), jnp.float32),
                mean=jnp.zeros((c,), jnp.float32),
                var=jnp.ones((c,), jnp.float32))


def init_params(key, growth_rate, block_config, num_init_features, bn_size,
                num_classes):
    keys = iter(jax.random.split(key, 1024))
    params = {}
    params["conv0"] = _conv_w(next(keys), num_init_features, 3, 7, 7)
    params["norm0"] = _bn(num_init_features)

    num_features = num_init_features
    blocks, transitions = [], []
    for i, num_layers in enumerate(block_config):
        layers = []
        for j in range(num_layers):
            in_ch = num_features + j * growth_rate
            mid = bn_size * growth_rate
            layers.append(dict(
                norm1=_bn(in_ch),
                conv1=_conv_w(next(keys), mid, in_ch, 1, 1),
                norm2=_bn(mid),
                conv2=_conv_w(next(keys), growth_rate, mid, 3, 3)))
        blocks.append(dict(layers=layers))
        num_features = num_features + num_layers * growth_rate
        if i != len(block_config) - 1:
            transitions.append(dict(
                norm=_bn(num_features),
                conv=_conv_w(next(keys), num_features // 2, num_features, 1, 1)))
            num_features = num_features // 2
    params["blocks"] = blocks
    params["transitions"] = transitions
    params["norm5"] = _bn(num_features)

    bound = 1.0 / math.sqrt(num_features)          # PyTorch Linear default
    params["fc_w"] = jax.random.uniform(next(keys), (num_classes, num_features),
                                        minval=-bound, maxval=bound,
                                        dtype=jnp.float32)
    params["fc_b"] = jnp.zeros((num_classes,), jnp.float32)   # constant_(0)
    return params


def _fold_bn(bn, eps=1e-5):
    scale = bn["gamma"] / jnp.sqrt(bn["var"] + eps)
    bias = bn["beta"] - bn["mean"] * scale
    return scale.astype(jnp.float32), bias.astype(jnp.float32)


def _split_sb(scale, bias, seg_cs):
    out, off = [], 0
    for cs in seg_cs:
        out.append((scale[off:off + cs].reshape(1, cs),
                    bias[off:off + cs].reshape(1, cs)))
        off += cs
    return out


def _split_rows(wm, seg_cs):
    out, off = [], 0
    for cs in seg_cs:
        out.append(wm[off:off + cs])
        off += cs
    return out


def prepare_params(raw, growth_rate):
    """One-time layout: fold eval BN, transpose/split/pad/cast weights."""
    p = {}

    # Stem conv0: (Cout, 3, 7, 7) -> (7*7*3 rows padded to 128-multiple, Cout).
    w0 = raw["conv0"]
    cout0 = w0.shape[0]
    wm = jnp.transpose(w0, (2, 3, 1, 0)).reshape(-1, cout0)
    k0p = _round_up(wm.shape[0], 128)
    p["conv0_w"] = jnp.pad(wm, ((0, k0p - wm.shape[0]), (0, 0))).astype(jnp.bfloat16)
    s0, b0 = _fold_bn(raw["norm0"])
    p["norm0_sb"] = (s0.reshape(1, -1), b0.reshape(1, -1))

    blocks = []
    for blk in raw["blocks"]:
        nf0 = int(blk["layers"][0]["norm1"]["gamma"].shape[0])
        seg_cs = [nf0]
        layers = []
        for lyr in blk["layers"]:
            mid = int(lyr["conv2"].shape[1])
            g = int(lyr["conv2"].shape[0])
            s1, b1 = _fold_bn(lyr["norm1"])
            w1 = jnp.transpose(lyr["conv1"][:, :, 0, 0]).astype(jnp.bfloat16)
            s2, b2 = _fold_bn(lyr["norm2"])
            w2 = jnp.transpose(lyr["conv2"], (2, 3, 1, 0)).reshape(9, mid, g)
            layers.append(dict(
                seg_sb=_split_sb(s1, b1, seg_cs),
                seg_w=_split_rows(w1, seg_cs),
                norm2_sb=(s2.reshape(1, -1), b2.reshape(1, -1)),
                w2=w2.astype(jnp.bfloat16)))
            seg_cs = seg_cs + [g]
        blocks.append(dict(layers=layers, seg_cs=seg_cs))
    p["blocks"] = blocks

    transitions = []
    for ti, t in enumerate(raw["transitions"]):
        seg_cs = blocks[ti]["seg_cs"]
        st, bt = _fold_bn(t["norm"])
        wt = jnp.transpose(t["conv"][:, :, 0, 0]).astype(jnp.bfloat16)
        tsegs = [dict(scale=sc, bias=bs, w=wseg)
                 for (sc, bs), wseg in zip(_split_sb(st, bt, seg_cs),
                                           _split_rows(wt, seg_cs))]
        transitions.append(dict(segs=tsegs, c_out=int(wt.shape[1])))
    p["transitions"] = transitions

    seg_cs = blocks[-1]["seg_cs"]
    s5, b5 = _fold_bn(raw["norm5"])
    p["norm5_segs"] = _split_sb(s5, b5, seg_cs)

    num_classes, num_features = raw["fc_w"].shape
    ncp = _round_up(num_classes, 128)              # lane-dense classifier
    fw = jnp.pad(jnp.transpose(raw["fc_w"]),
                 ((0, 0), (0, ncp - num_classes))).astype(jnp.bfloat16)
    p["fc_w_segs"] = _split_rows(fw, seg_cs)
    p["fc_b"] = jnp.pad(raw["fc_b"], (0, ncp - num_classes)
                        ).reshape(1, ncp).astype(jnp.float32)
    p["num_classes"] = int(num_classes)
    p["ncp"] = int(ncp)
    return p


# ---------------------------------------------------------------------------
# DenseNet forward
# ---------------------------------------------------------------------------

def densenet_forward(params, x_nchw):
    x = jnp.transpose(x_nchw, (0, 2, 3, 1)).astype(jnp.bfloat16)   # NHWC bf16
    n = x.shape[0]

    # Stem: conv0 (7x7/s2/p3) with norm0+relu fused into the matmul epilogue,
    # then a single-pass 3x3/s2 max pool.
    patches, ho, wo = _im2col(x, 7, 7, stride=2, pad=3)
    kp = params["conv0_w"].shape[0]
    if kp > patches.shape[1]:
        patches = jnp.pad(patches, ((0, 0), (0, kp - patches.shape[1])))
    y = matmul_segments([(patches, params["conv0_w"], None)],
                        epi=params["norm0_sb"], epi_relu=True)
    x = y.reshape(n, ho, wo, -1)
    x = maxpool3x3s2_pallas(x)

    nblocks = len(params["blocks"])
    segs = [x]                                    # dense block feature segments
    for bi, block in enumerate(params["blocks"]):
        for layer in block["layers"]:
            h, w = segs[0].shape[1], segs[0].shape[2]
            m = n * h * w
            # 1x1 bottleneck: segmented matmul with per-segment norm1+relu
            # prologue and norm2+relu epilogue (no concat, no zero-K work).
            mm_segs = [(s.reshape(m, s.shape[-1]), wseg, sb)
                       for s, wseg, sb in zip(segs, layer["seg_w"],
                                              layer["seg_sb"])]
            btl = matmul_segments(mm_segs, epi=layer["norm2_sb"],
                                  epi_relu=True)
            btl = btl.reshape(n, h, w, -1)
            # Direct 3x3 conv (no im2col); new features become a new segment.
            new = conv3x3_pallas(btl, layer["w2"])
            segs.append(new)

        if bi != nblocks - 1:
            t = params["transitions"][bi]
            # norm+relu+avgpool2x2 and the transition 1x1 conv in one kernel.
            x = transition_pallas(segs, t["segs"], t["c_out"])
            segs = [x]

    # norm5 + relu + global average pool + classifier, fused; slice the
    # lane-padded logits back to num_classes.
    logits = head_pallas(segs, params["norm5_segs"], params["fc_w_segs"],
                         params["fc_b"], params["ncp"])
    return logits[:, :params["num_classes"]]


# ---------------------------------------------------------------------------
# Main
# ---------------------------------------------------------------------------

if __name__ == "__main__":
    growth_rate = 8
    block_config = (2, 2)
    num_init_features = 16
    bn_size = 2
    num_classes = 10

    key = jax.random.PRNGKey(0)
    pkey, xkey = jax.random.split(key)
    raw = init_params(pkey, growth_rate, block_config, num_init_features,
                      bn_size, num_classes)
    params = prepare_params(raw, growth_rate)

    # Small input consistent with the module: NCHW, 3 input channels.
    x = jax.random.normal(xkey, (2, 3, 16, 16), dtype=jnp.float32)

    forward = jax.jit(lambda inp: densenet_forward(params, inp))
    out = jax.block_until_ready(forward(x))
    assert out.shape == (2, num_classes), out.shape
    assert bool(jnp.all(jnp.isfinite(out)))
    print("KERNEL_OK")
</pallas_src>

<mosaic_0001>
module attributes {stable_mosaic.version = 11 : i64} {
  func.func @kernel(%arg0: i32, %arg1: i32, %arg2: memref<64x256xbf16, #tpu.memory_space<vmem>>, %arg3: memref<256x16xbf16, #tpu.memory_space<vmem>>, %arg4: memref<1x16xf32, #tpu.memory_space<vmem>>, %arg5: memref<1x16xf32, #tpu.memory_space<vmem>>, %arg6: memref<64x16xbf16, #tpu.memory_space<vmem>>) attributes {dimension_semantics = [#tpu.dimension_semantics<parallel>, #tpu.dimension_semantics<parallel>], iteration_bounds = array<i64: 2, 1>, scalar_prefetch = 0 : i64, scratch_operands = 0 : i64, tpu.core_type = #tpu.core_type<tc>, window_params = [{transform_indices = @transform_0, window_bounds = array<i64: 64, 256>}, {transform_indices = @transform_1, window_bounds = array<i64: 256, 16>}, {transform_indices = @transform_2, window_bounds = array<i64: 1, 16>}, {transform_indices = @transform_3, window_bounds = array<i64: 1, 16>}, {transform_indices = @transform_4, window_bounds = array<i64: 64, 16>}]} {
    %c0 = arith.constant 0 : index
    %c0_0 = arith.constant 0 : index
    %0 = vector.load %arg2[%c0, %c0_0] : memref<64x256xbf16, #tpu.memory_space<vmem>>, vector<64x256xbf16>
    %c0_1 = arith.constant 0 : index
    %c0_2 = arith.constant 0 : index
    %1 = vector.load %arg3[%c0_1, %c0_2] : memref<256x16xbf16, #tpu.memory_space<vmem>>, vector<256x16xbf16>
    %cst = arith.constant dense<0.000000e+00> : vector<64x16xf32>
    %2 = tpu.matmul %0, %1, %cst {dimension_numbers = #tpu.dot_dimension_numbers<[1], [0], [0], [1], [0, 0, 1, 1], [], []>} : vector<64x256xbf16>, vector<256x16xbf16>, vector<64x16xf32> -> vector<64x16xf32>
    %c0_3 = arith.constant 0 : index
    %c0_4 = arith.constant 0 : index
    %3 = vector.load %arg4[%c0_3, %c0_4] : memref<1x16xf32, #tpu.memory_space<vmem>>, vector<1x16xf32>
    %4 = vector.broadcast %3 : vector<1x16xf32> to vector<64x16xf32>
    %5 = arith.mulf %2, %4 : vector<64x16xf32>
    %c0_5 = arith.constant 0 : index
    %c0_6 = arith.constant 0 : index
    %6 = vector.load %arg5[%c0_5, %c0_6] : memref<1x16xf32, #tpu.memory_space<vmem>>, vector<1x16xf32>
    %7 = vector.broadcast %6 : vector<1x16xf32> to vector<64x16xf32>
    %8 = arith.addf %5, %7 : vector<64x16xf32>
    %cst_7 = arith.constant 0.000000e+00 : f32
    %9 = vector.broadcast %cst_7 : f32 to vector<64x16xf32>
    %10 = arith.maximumf %8, %9 : vector<64x16xf32>
    %11 = arith.truncf %10 : vector<64x16xf32> to vector<64x16xbf16>
    %c0_8 = arith.constant 0 : index
    %c0_9 = arith.constant 0 : index
    %12 = vector.load %arg6[%c0_8, %c0_9] : memref<64x16xbf16, #tpu.memory_space<vmem>>, vector<64x16xbf16>
    tpu.vector_store %arg6[%c0_8, %c0_9], %11 {strides = array<i32>} : memref<64x16xbf16, #tpu.memory_space<vmem>>, vector<64x16xbf16>,
    return
  }
  func.func @transform_0(%arg0: i32, %arg1: i32) -> (i32, i32) {
    %c0_i32 = arith.constant 0 : i32
    %c0_i32_0 = arith.constant 0 : i32
    return %arg0, %c0_i32 : i32, i32
  }
  func.func @transform_1(%arg0: i32, %arg1: i32) -> (i32, i32) {
    %c0_i32 = arith.constant 0 : i32
    %c0_i32_0 = arith.constant 0 : i32
    return %c0_i32, %arg1 : i32, i32
  }
  func.func @transform_2(%arg0: i32, %arg1: i32) -> (i32, i32) {
    %c0_i32 = arith.constant 0 : i32
    %c0_i32_0 = arith.constant 0 : i32
    return %c0_i32, %arg1 : i32, i32
  }
  func.func @transform_3(%arg0: i32, %arg1: i32) -> (i32, i32) {
    %c0_i32 = arith.constant 0 : i32
    %c0_i32_0 = arith.constant 0 : i32
    return %c0_i32, %arg1 : i32, i32
  }
  func.func @transform_4(%arg0: i32, %arg1: i32) -> (i32, i32) {
    %c0_i32 = arith.constant 0 : i32
    return %arg0, %arg1 : i32, i32
  }
}

module attributes {stable_mosaic.version = 11 : i64} {
  func.func @kernel(%arg0: i32, %arg1: memref<1x10x5x32xbf16, #tpu.memory_space<vmem>>, %arg2: memref<1x4x4x16xbf16, #tpu.memory_space<vmem>>) attributes {dimension_semantics = [#tpu.dimension_semantics<parallel>], iteration_bounds = array<i64: 2>, scalar_prefetch = 0 : i64, scratch_operands = 0 : i64, tpu.core_type = #tpu.core_type<tc>, window_params = [{transform_indices = @transform_0, window_bounds = array<i64: 1, 10, 5, 32>}, {transform_indices = @transform_1, window_bounds = array<i64: 1, 4, 4, 16>}]} {
    %c0 = arith.constant 0 : index
    %c0_0 = arith.constant 0 : index
    %c0_1 = arith.constant 0 : index
    %c0_2 = arith.constant 0 : index
    %0 = vector.load %arg1[%c0, %c0_0, %c0_1, %c0_2] : memref<1x10x5x32xbf16, #tpu.memory_space<vmem>>, vector<1x1x5x32xbf16>
    %1 = vector.shape_cast %0 : vector<1x1x5x32xbf16> to vector<5x32xbf16>
    %2 = vector.extract_strided_slice %1 {offsets = [0, 0], sizes = [5, 16], strides = [1, 1]} : vector<5x32xbf16> to vector<5x16xbf16>
    %3 = vector.extract_strided_slice %1 {offsets = [0, 16], sizes = [5, 16], strides = [1, 1]} : vector<5x32xbf16> to vector<5x16xbf16>
    %4 = vector.extract_strided_slice %2 {offsets = [0, 0], sizes = [4, 16], strides = [1, 1]} : vector<5x16xbf16> to vector<4x16xbf16>
    %5 = vector.extract_strided_slice %3 {offsets = [0, 0], sizes = [4, 16], strides = [1, 1]} : vector<5x16xbf16> to vector<4x16xbf16>
    %6 = arith.maximumf %4, %5 : vector<4x16xbf16>
    %7 = vector.extract_strided_slice %2 {offsets = [1, 0], sizes = [4, 16], strides = [1, 1]} : vector<5x16xbf16> to vector<4x16xbf16>
    %8 = arith.maximumf %6, %7 : vector<4x16xbf16>
    %c0_3 = arith.constant 0 : index
    %c1 = arith.constant 1 : index
    %c0_4 = arith.constant 0 : index
    %c0_5 = arith.constant 0 : index
    %9 = vector.load %arg1[%c0_3, %c1, %c0_4, %c0_5] : memref<1x10x5x32xbf16, #tpu.memory_space<vmem>>, vector<1x1x5x32xbf16>
    %10 = vector.shape_cast %9 : vector<1x1x5x32xbf16> to vector<5x32xbf16>
    %11 = vector.extract_strided_slice %10 {offsets = [0, 0], sizes = [5, 16], strides = [1, 1]} : vector<5x32xbf16> to vector<5x16xbf16>
    %12 = vector.extract_strided_slice %10 {offsets = [0, 16], sizes = [5, 16], strides = [1, 1]} : vector<5x32xbf16> to vector<5x16xbf16>
    %13 = vector.extract_strided_slice %11 {offsets = [0, 0], sizes = [4, 16], strides = [1, 1]} : vector<5x16xbf16> to vector<4x16xbf16>
    %14 = vector.extract_strided_slice %12 {offsets = [0, 0], sizes = [4, 16], strides = [1, 1]} : vector<5x16xbf16> to vector<4x16xbf16>
    %15 = arith.maximumf %13, %14 : vector<4x16xbf16>
    %16 = vector.extract_strided_slice %11 {offsets = [1, 0], sizes = [4, 16], strides = [1, 1]} : vector<5x16xbf16> to vector<4x16xbf16>
    %17 = arith.maximumf %15, %16 : vector<4x16xbf16>
    %18 = arith.maximumf %8, %17 : vector<4x16xbf16>
    %c0_6 = arith.constant 0 : index
    %c2 = arith.constant 2 : index
    %c0_7 = arith.constant 0 : index
    %c0_8 = arith.constant 0 : index
    %19 = vector.load %arg1[%c0_6, %c2, %c0_7, %c0_8] : memref<1x10x5x32xbf16, #tpu.memory_space<vmem>>, vector<1x1x5x32xbf16>
    %20 = vector.shape_cast %19 : vector<1x1x5x32xbf16> to vector<5x32xbf16>
    %21 = vector.extract_strided_slice %20 {offsets = [0, 0], sizes = [5, 16], strides = [1, 1]} : vector<5x32xbf16> to vector<5x16xbf16>
    %22 = vector.extract_strided_slice %20 {offsets = [0, 16], sizes = [5, 16], strides = [1, 1]} : vector<5x32xbf16> to vector<5x16xbf16>
    %23 = vector.extract_strided_slice %21 {offsets = [0, 0], sizes = [4, 16], strides = [1, 1]} : vector<5x16xbf16> to vector<4x16xbf16>
    %24 = vector.extract_strided_slice %22 {offsets = [0, 0], sizes = [4, 16], strides = [1, 1]} : vector<5x16xbf16> to vector<4x16xbf16>
    %25 = arith.maximumf %23, %24 : vector<4x16xbf16>
    %26 = vector.extract_strided_slice %21 {offsets = [1, 0], sizes = [4, 16], strides = [1, 1]} : vector<5x16xbf16> to vector<4x16xbf16>
    %27 = arith.maximumf %25, %26 : vector<4x16xbf16>
    %28 = arith.maximumf %18, %27 : vector<4x16xbf16>
    %c0_9 = arith.constant 0 : index
    %c0_10 = arith.constant 0 : index
    %c0_11 = arith.constant 0 : index
    %c0_12 = arith.constant 0 : index
    %29 = vector.load %arg2[%c0_9, %c0_10, %c0_11, %c0_12] : memref<1x4x4x16xbf16, #tpu.memory_space<vmem>>, vector<1x1x4x16xbf16>
    %30 = vector.shape_cast %29 : vector<1x1x4x16xbf16> to vector<4x16xbf16>
    %31 = vector.shape_cast %28 : vector<4x16xbf16> to vector<1x1x4x16xbf16>
    tpu.vector_store %arg2[%c0_9, %c0_10, %c0_11, %c0_12], %31 {strides = array<i32>} : memref<1x4x4x16xbf16, #tpu.memory_space<vmem>>, vector<1x1x4x16xbf16>,
    %c0_13 = arith.constant 0 : index
    %c2_14 = arith.constant 2 : index
    %c0_15 = arith.constant 0 : index
    %c0_16 = arith.constant 0 : index
    %32 = vector.load %arg1[%c0_13, %c2_14, %c0_15, %c0_16] : memref<1x10x5x32xbf16, #tpu.memory_space<vmem>>, vector<1x1x5x32xbf16>
    %33 = vector.shape_cast %32 : vector<1x1x5x32xbf16> to vector<5x32xbf16>
    %34 = vector.extract_strided_slice %33 {offsets = [0, 0], sizes = [5, 16], strides = [1, 1]} : vector<5x32xbf16> to vector<5x16xbf16>
    %35 = vector.extract_strided_slice %33 {offsets = [0, 16], sizes = [5, 16], strides = [1, 1]} : vector<5x32xbf16> to vector<5x16xbf16>
    %36 = vector.extract_strided_slice %34 {offsets = [0, 0], sizes = [4, 16], strides = [1, 1]} : vector<5x16xbf16> to vector<4x16xbf16>
    %37 = vector.extract_strided_slice %35 {offsets = [0, 0], sizes = [4, 16], strides = [1, 1]} : vector<5x16xbf16> to vector<4x16xbf16>
    %38 = arith.maximumf %36, %37 : vector<4x16xbf16>
    %39 = vector.extract_strided_slice %34 {offsets = [1, 0], sizes = [4, 16], strides = [1, 1]} : vector<5x16xbf16> to vector<4x16xbf16>
    %40 = arith.maximumf %38, %39 : vector<4x16xbf16>
    %c0_17 = arith.constant 0 : index
    %c3 = arith.constant 3 : index
    %c0_18 = arith.constant 0 : index
    %c0_19 = arith.constant 0 : index
    %41 = vector.load %arg1[%c0_17, %c3, %c0_18, %c0_19] : memref<1x10x5x32xbf16, #tpu.memory_space<vmem>>, vector<1x1x5x32xbf16>
    %42 = vector.shape_cast %41 : vector<1x1x5x32xbf16> to vector<5x32xbf16>
    %43 = vector.extract_strided_slice %42 {offsets = [0, 0], sizes = [5, 16], strides = [1, 1]} : vector<5x32xbf16> to vector<5x16xbf16>
    %44 = vector.extract_strided_slice %42 {offsets = [0, 16], sizes = [5, 16], strides = [1, 1]} : vector<5x32xbf16> to vector<5x16xbf16>
    %45 = vector.extract_strided_slice %43 {offsets = [0, 0], sizes = [4, 16], strides = [1, 1]} : vector<5x16xbf16> to vector<4x16xbf16>
    %46 = vector.extract_strided_slice %44 {offsets = [0, 0], sizes = [4, 16], strides = [1, 1]} : vector<5x16xbf16> to vector<4x16xbf16>
    %47 = arith.maximumf %45, %46 : vector<4x16xbf16>
    %48 = vector.extract_strided_slice %43 {offsets = [1, 0], sizes = [4, 16], strides = [1, 1]} : vector<5x16xbf16> to vector<4x16xbf16>
    %49 = arith.maximumf %47, %48 : vector<4x16xbf16>
    %50 = arith.maximumf %40, %49 : vector<4x16xbf16>
    %c0_20 = arith.constant 0 : index
    %c4 = arith.constant 4 : index
    %c0_21 = arith.constant 0 : index
    %c0_22 = arith.constant 0 : index
    %51 = vector.load %arg1[%c0_20, %c4, %c0_21, %c0_22] : memref<1x10x5x32xbf16, #tpu.memory_space<vmem>>, vector<1x1x5x32xbf16>
    %52 = vector.shape_cast %51 : vector<1x1x5x32xbf16> to vector<5x32xbf16>
    %53 = vector.extract_strided_slice %52 {offsets = [0, 0], sizes = [5, 16], strides = [1, 1]} : vector<5x32xbf16> to vector<5x16xbf16>
    %54 = vector.extract_strided_slice %52 {offsets = [0, 16], sizes = [5, 16], strides = [1, 1]} : vector<5x32xbf16> to vector<5x16xbf16>
    %55 = vector.extract_strided_slice %53 {offsets = [0, 0], sizes = [4, 16], strides = [1, 1]} : vector<5x16xbf16> to vector<4x16xbf16>
    %56 = vector.extract_strided_slice %54 {offsets = [0, 0], sizes = [4, 16], strides = [1, 1]} : vector<5x16xbf16> to vector<4x16xbf16>
    %57 = arith.maximumf %55, %56 : vector<4x16xbf16>
    %58 = vector.extract_strided_slice %53 {offsets = [1, 0], sizes = [4, 16], strides = [1, 1]} : vector<5x16xbf16> to vector<4x16xbf16>
    %59 = arith.maximumf %57, %58 : vector<4x16xbf16>
    %60 = arith.maximumf %50, %59 : vector<4x16xbf16>
    %c0_23 = arith.constant 0 : index
    %c1_24 = arith.constant 1 : index
    %c0_25 = arith.constant 0 : index
    %c0_26 = arith.constant 0 : index
    %61 = vector.load %arg2[%c0_23, %c1_24, %c0_25, %c0_26] : memref<1x4x4x16xbf16, #tpu.memory_space<vmem>>, vector<1x1x4x16xbf16>
    %62 = vector.shape_cast %61 : vector<1x1x4x16xbf16> to vector<4x16xbf16>
    %63 = vector.shape_cast %60 : vector<4x16xbf16> to vector<1x1x4x16xbf16>
    tpu.vector_store %arg2[%c0_23, %c1_24, %c0_25, %c0_26], %63 {strides = array<i32>} : memref<1x4x4x16xbf16, #tpu.memory_space<vmem>>, vector<1x1x4x16xbf16>,
    %c0_27 = arith.constant 0 : index
    %c4_28 = arith.constant 4 : index
    %c0_29 = arith.constant 0 : index
    %c0_30 = arith.constant 0 : index
    %64 = vector.load %arg1[%c0_27, %c4_28, %c0_29, %c0_30] : memref<1x10x5x32xbf16, #tpu.memory_space<vmem>>, vector<1x1x5x32xbf16>
    %65 = vector.shape_cast %64 : vector<1x1x5x32xbf16> to vector<5x32xbf16>
    %66 = vector.extract_strided_slice %65 {offsets = [0, 0], sizes = [5, 16], strides = [1, 1]} : vector<5x32xbf16> to vector<5x16xbf16>
    %67 = vector.extract_strided_slice %65 {offsets = [0, 16], sizes = [5, 16], strides = [1, 1]} : vector<5x32xbf16> to vector<5x16xbf16>
    %68 = vector.extract_strided_slice %66 {offsets = [0, 0], sizes = [4, 16], strides = [1, 1]} : vector<5x16xbf16> to vector<4x16xbf16>
    %69 = vector.extract_strided_slice %67 {offsets = [0, 0], sizes = [4, 16], strides = [1, 1]} : vector<5x16xbf16> to vector<4x16xbf16>
    %70 = arith.maximumf %68, %69 : vector<4x16xbf16>
    %71 = vector.extract_strided_slice %66 {offsets = [1, 0], sizes = [4, 16], strides = [1, 1]} : vector<5x16xbf16> to vector<4x16xbf16>
    %72 = arith.maximumf %70, %71 : vector<4x16xbf16>
    %c0_31 = arith.constant 0 : index
    %c5 = arith.constant 5 : index
    %c0_32 = arith.constant 0 : index
    %c0_33 = arith.constant 0 : index
    %73 = vector.load %arg1[%c0_31, %c5, %c0_32, %c0_33] : memref<1x10x5x32xbf16, #tpu.memory_space<vmem>>, vector<1x1x5x32xbf16>
    %74 = vector.shape_cast %73 : vector<1x1x5x32xbf16> to vector<5x32xbf16>
    %75 = vector.extract_strided_slice %74 {offsets = [0, 0], sizes = [5, 16], strides = [1, 1]} : vector<5x32xbf16> to vector<5x16xbf16>
    %76 = vector.extract_strided_slice %74 {offsets = [0, 16], sizes = [5, 16], strides = [1, 1]} : vector<5x32xbf16> to vector<5x16xbf16>
    %77 = vector.extract_strided_slice %75 {offsets = [0, 0], sizes = [4, 16], strides = [1, 1]} : vector<5x16xbf16> to vector<4x16xbf16>
    %78 = vector.extract_strided_slice %76 {offsets = [0, 0], sizes = [4, 16], strides = [1, 1]} : vector<5x16xbf16> to vector<4x16xbf16>
    %79 = arith.maximumf %77, %78 : vector<4x16xbf16>
    %80 = vector.extract_strided_slice %75 {offsets = [1, 0], sizes = [4, 16], strides = [1, 1]} : vector<5x16xbf16> to vector<4x16xbf16>
    %81 = arith.maximumf %79, %80 : vector<4x16xbf16>
    %82 = arith.maximumf %72, %81 : vector<4x16xbf16>
    %c0_34 = arith.constant 0 : index
    %c6 = arith.constant 6 : index
    %c0_35 = arith.constant 0 : index
    %c0_36 = arith.constant 0 : index
    %83 = vector.load %arg1[%c0_34, %c6, %c0_35, %c0_36] : memref<1x10x5x32xbf16, #tpu.memory_space<vmem>>, vector<1x1x5x32xbf16>
    %84 = vector.shape_cast %83 : vector<1x1x5x32xbf16> to vector<5x32xbf16>
    %85 = vector.extract_strided_slice %84 {offsets = [0, 0], sizes = [5, 16], strides = [1, 1]} : vector<5x32xbf16> to vector<5x16xbf16>
    %86 = vector.extract_strided_slice %84 {offsets = [0, 16], sizes = [5, 16], strides = [1, 1]} : vector<5x32xbf16> to vector<5x16xbf16>
    %87 = vector.extract_strided_slice %85 {offsets = [0, 0], sizes = [4, 16], strides = [1, 1]} : vector<5x16xbf16> to vector<4x16xbf16>
    %88 = vector.extract_strided_slice %86 {offsets = [0, 0], sizes = [4, 16], strides = [1, 1]} : vector<5x16xbf16> to vector<4x16xbf16>
    %89 = arith.maximumf %87, %88 : vector<4x16xbf16>
    %90 = vector.extract_strided_slice %85 {offsets = [1, 0], sizes = [4, 16], strides = [1, 1]} : vector<5x16xbf16> to vector<4x16xbf16>
    %91 = arith.maximumf %89, %90 : vector<4x16xbf16>
    %92 = arith.maximumf %82, %91 : vector<4x16xbf16>
    %c0_37 = arith.constant 0 : index
    %c2_38 = arith.constant 2 : index
    %c0_39 = arith.constant 0 : index
    %c0_40 = arith.constant 0 : index
    %93 = vector.load %arg2[%c0_37, %c2_38, %c0_39, %c0_40] : memref<1x4x4x16xbf16, #tpu.memory_space<vmem>>, vector<1x1x4x16xbf16>
    %94 = vector.shape_cast %93 : vector<1x1x4x16xbf16> to vector<4x16xbf16>
    %95 = vector.shape_cast %92 : vector<4x16xbf16> to vector<1x1x4x16xbf16>
    tpu.vector_store %arg2[%c0_37, %c2_38, %c0_39, %c0_40], %95 {strides = array<i32>} : memref<1x4x4x16xbf16, #tpu.memory_space<vmem>>, vector<1x1x4x16xbf16>,
    %c0_41 = arith.constant 0 : index
    %c6_42 = arith.constant 6 : index
    %c0_43 = arith.constant 0 : index
    %c0_44 = arith.constant 0 : index
    %96 = vector.load %arg1[%c0_41, %c6_42, %c0_43, %c0_44] : memref<1x10x5x32xbf16, #tpu.memory_space<vmem>>, vector<1x1x5x32xbf16>
    %97 = vector.shape_cast %96 : vector<1x1x5x32xbf16> to vector<5x32xbf16>
    %98 = vector.extract_strided_slice %97 {offsets = [0, 0], sizes = [5, 16], strides = [1, 1]} : vector<5x32xbf16> to vector<5x16xbf16>
    %99 = vector.extract_strided_slice %97 {offsets = [0, 16], sizes = [5, 16], strides = [1, 1]} : vector<5x32xbf16> to vector<5x16xbf16>
    %100 = vector.extract_strided_slice %98 {offsets = [0, 0], sizes = [4, 16], strides = [1, 1]} : vector<5x16xbf16> to vector<4x16xbf16>
    %101 = vector.extract_strided_slice %99 {offsets = [0, 0], sizes = [4, 16], strides = [1, 1]} : vector<5x16xbf16> to vector<4x16xbf16>
    %102 = arith.maximumf %100, %101 : vector<4x16xbf16>
    %103 = vector.extract_strided_slice %98 {offsets = [1, 0], sizes = [4, 16], strides = [1, 1]} : vector<5x16xbf16> to vector<4x16xbf16>
    %104 = arith.maximumf %102, %103 : vector<4x16xbf16>
    %c0_45 = arith.constant 0 : index
    %c7 = arith.constant 7 : index
    %c0_46 = arith.constant 0 : index
    %c0_47 = arith.constant 0 : index
    %105 = vector.load %arg1[%c0_45, %c7, %c0_46, %c0_47] : memref<1x10x5x32xbf16, #tpu.memory_space<vmem>>, vector<1x1x5x32xbf16>
    %106 = vector.shape_cast %105 : vector<1x1x5x32xbf16> to vector<5x32xbf16>
    %107 = vector.extract_strided_slice %106 {offsets = [0, 0], sizes = [5, 16], strides = [1, 1]} : vector<5x32xbf16> to vector<5x16xbf16>
    %108 = vector.extract_strided_slice %106 {offsets = [0, 16], sizes = [5, 16], strides = [1, 1]} : vector<5x32xbf16> to vector<5x16xbf16>
    %109 = vector.extract_strided_slice %107 {offsets = [0, 0], sizes = [4, 16], strides = [1, 1]} : vector<5x16xbf16> to vector<4x16xbf16>
    %110 = vector.extract_strided_slice %108 {offsets = [0, 0], sizes = [4, 16], strides = [1, 1]} : vector<5x16xbf16> to vector<4x16xbf16>
    %111 = arith.maximumf %109, %110 : vector<4x16xbf16>
    %112 = vector.extract_strided_slice %107 {offsets = [1, 0], sizes = [4, 16], strides = [1, 1]} : vector<5x16xbf16> to vector<4x16xbf16>
    %113 = arith.maximumf %111, %112 : vector<4x16xbf16>
    %114 = arith.maximumf %104, %113 : vector<4x16xbf16>
    %c0_48 = arith.constant 0 : index
    %c8 = arith.constant 8 : index
    %c0_49 = arith.constant 0 : index
    %c0_50 = arith.constant 0 : index
    %115 = vector.load %arg1[%c0_48, %c8, %c0_49, %c0_50] : memref<1x10x5x32xbf16, #tpu.memory_space<vmem>>, vector<1x1x5x32xbf16>
    %116 = vector.shape_cast %115 : vector<1x1x5x32xbf16> to vector<5x32xbf16>
    %117 = vector.extract_strided_slice %116 {offsets = [0, 0], sizes = [5, 16], strides = [1, 1]} : vector<5x32xbf16> to vector<5x16xbf16>
    %118 = vector.extract_strided_slice %116 {offsets = [0, 16], sizes = [5, 16], strides = [1, 1]} : vector<5x32xbf16> to vector<5x16xbf16>
    %119 = vector.extract_strided_slice %117 {offsets = [0, 0], sizes = [4, 16], strides = [1, 1]} : vector<5x16xbf16> to vector<4x16xbf16>
    %120 = vector.extract_strided_slice %118 {offsets = [0, 0], sizes = [4, 16], strides = [1, 1]} : vector<5x16xbf16> to vector<4x16xbf16>
    %121 = arith.maximumf %119, %120 : vector<4x16xbf16>
    %122 = vector.extract_strided_slice %117 {offsets = [1, 0], sizes = [4, 16], strides = [1, 1]} : vector<5x16xbf16> to vector<4x16xbf16>
    %123 = arith.maximumf %121, %122 : vector<4x16xbf16>
    %124 = arith.maximumf %114, %123 : vector<4x16xbf16>
    %c0_51 = arith.constant 0 : index
    %c3_52 = arith.constant 3 : index
    %c0_53 = arith.constant 0 : index
    %c0_54 = arith.constant 0 : index
    %125 = vector.load %arg2[%c0_51, %c3_52, %c0_53, %c0_54] : memref<1x4x4x16xbf16, #tpu.memory_space<vmem>>, vector<1x1x4x16xbf16>
    %126 = vector.shape_cast %125 : vector<1x1x4x16xbf16> to vector<4x16xbf16>
    %127 = vector.shape_cast %124 : vector<4x16xbf16> to vector<1x1x4x16xbf16>
    tpu.vector_store %arg2[%c0_51, %c3_52, %c0_53, %c0_54], %127 {strides = array<i32>} : memref<1x4x4x16xbf16, #tpu.memory_space<vmem>>, vector<1x1x4x16xbf16>,
    return
  }
  func.func @transform_0(%arg0: i32) -> (i32, i32, i32, i32) {
    %c0_i32 = arith.constant 0 : i32
    %c0_i32_0 = arith.constant 0 : i32
    %c0_i32_1 = arith.constant 0 : i32
    %c0_i32_2 = arith.constant 0 : i32
    return %arg0, %c0_i32, %c0_i32_0, %c0_i32_1 : i32, i32, i32, i32
  }
  func.func @transform_1(%arg0: i32) -> (i32, i32, i32, i32) {
    %c0_i32 = arith.constant 0 : i32
    %c0_i32_0 = arith.constant 0 : i32
    %c0_i32_1 = arith.constant 0 : i32
    %c0_i32_2 = arith.constant 0 : i32
    return %arg0, %c0_i32, %c0_i32_0, %c0_i32_1 : i32, i32, i32, i32
  }
}

module attributes {stable_mosaic.version = 11 : i64} {
  func.func @kernel(%arg0: i32, %arg1: i32, %arg2: memref<16x16xbf16, #tpu.memory_space<vmem>>, %arg3: memref<16x16xbf16, #tpu.memory_space<vmem>>, %arg4: memref<1x16xf32, #tpu.memory_space<vmem>>, %arg5: memref<1x16xf32, #tpu.memory_space<vmem>>, %arg6: memref<1x16xf32, #tpu.memory_space<vmem>>, %arg7: memref<1x16xf32, #tpu.memory_space<vmem>>, %arg8: memref<16x16xbf16, #tpu.memory_space<vmem>>) attributes {dimension_semantics = [#tpu.dimension_semantics<parallel>, #tpu.dimension_semantics<parallel>], iteration_bounds = array<i64: 2, 1>, scalar_prefetch = 0 : i64, scratch_operands = 0 : i64, tpu.core_type = #tpu.core_type<tc>, window_params = [{transform_indices = @transform_0, window_bounds = array<i64: 16, 16>}, {transform_indices = @transform_1, window_bounds = array<i64: 16, 16>}, {pipeline_mode = #tpu.pipeline_mode<synchronous>, transform_indices = @transform_2, window_bounds = array<i64: 1, 16>}, {pipeline_mode = #tpu.pipeline_mode<synchronous>, transform_indices = @transform_3, window_bounds = array<i64: 1, 16>}, {transform_indices = @transform_4, window_bounds = array<i64: 1, 16>}, {transform_indices = @transform_5, window_bounds = array<i64: 1, 16>}, {transform_indices = @transform_6, window_bounds = array<i64: 16, 16>}]} {
    %c0 = arith.constant 0 : index
    %c0_0 = arith.constant 0 : index
    %0 = vector.load %arg2[%c0, %c0_0] : memref<16x16xbf16, #tpu.memory_space<vmem>>, vector<16x16xbf16>
    %1 = arith.extf %0 : vector<16x16xbf16> to vector<16x16xf32>
    %c0_1 = arith.constant 0 : index
    %c0_2 = arith.constant 0 : index
    %2 = vector.load %arg4[%c0_1, %c0_2] : memref<1x16xf32, #tpu.memory_space<vmem>>, vector<1x16xf32>
    %3 = vector.broadcast %2 : vector<1x16xf32> to vector<16x16xf32>
    %4 = arith.mulf %1, %3 : vector<16x16xf32>
    %c0_3 = arith.constant 0 : index
    %c0_4 = arith.constant 0 : index
    %5 = vector.load %arg5[%c0_3, %c0_4] : memref<1x16xf32, #tpu.memory_space<vmem>>, vector<1x16xf32>
    %6 = vector.broadcast %5 : vector<1x16xf32> to vector<16x16xf32>
    %7 = arith.addf %4, %6 : vector<16x16xf32>
    %cst = arith.constant 0.000000e+00 : f32
    %8 = vector.broadcast %cst : f32 to vector<16x16xf32>
    %9 = arith.maximumf %7, %8 : vector<16x16xf32>
    %10 = arith.truncf %9 : vector<16x16xf32> to vector<16x16xbf16>
    %c0_5 = arith.constant 0 : index
    %c0_6 = arith.constant 0 : index
    %11 = vector.load %arg3[%c0_5, %c0_6] : memref<16x16xbf16, #tpu.memory_space<vmem>>, vector<16x16xbf16>
    %cst_7 = arith.constant dense<0.000000e+00> : vector<16x16xf32>
    %12 = tpu.matmul %10, %11, %cst_7 {dimension_numbers = #tpu.dot_dimension_numbers<[1], [0], [0], [1], [0, 0, 1, 1], [], []>} : vector<16x16xbf16>, vector<16x16xbf16>, vector<16x16xf32> -> vector<16x16xf32>
    %c0_8 = arith.constant 0 : index
    %c0_9 = arith.constant 0 : index
    %13 = vector.load %arg6[%c0_8, %c0_9] : memref<1x16xf32, #tpu.memory_space<vmem>>, vector<1x16xf32>
    %14 = vector.broadcast %13 : vector<1x16xf32> to vector<16x16xf32>
    %15 = arith.mulf %12, %14 : vector<16x16xf32>
    %c0_10 = arith.constant 0 : index
    %c0_11 = arith.constant 0 : index
    %16 = vector.load %arg7[%c0_10, %c0_11] : memref<1x16xf32, #tpu.memory_space<vmem>>, vector<1x16xf32>
    %17 = vector.broadcast %16 : vector<1x16xf32> to vector<16x16xf32>
    %18 = arith.addf %15, %17 : vector<16x16xf32>
    %cst_12 = arith.constant 0.000000e+00 : f32
    %19 = vector.broadcast %cst_12 : f32 to vector<16x16xf32>
    %20 = arith.maximumf %18, %19 : vector<16x16xf32>
    %21 = arith.truncf %20 : vector<16x16xf32> to vector<16x16xbf16>
    %c0_13 = arith.constant 0 : index
    %c0_14 = arith.constant 0 : index
    %22 = vector.load %arg8[%c0_13, %c0_14] : memref<16x16xbf16, #tpu.memory_space<vmem>>, vector<16x16xbf16>
    tpu.vector_store %arg8[%c0_13, %c0_14], %21 {strides = array<i32>} : memref<16x16xbf16, #tpu.memory_space<vmem>>, vector<16x16xbf16>,
    return
  }
  func.func @transform_0(%arg0: i32, %arg1: i32) -> (i32, i32) {
    %c0_i32 = arith.constant 0 : i32
    %c0_i32_0 = arith.constant 0 : i32
    return %arg0, %c0_i32 : i32, i32
  }
  func.func @transform_1(%arg0: i32, %arg1: i32) -> (i32, i32) {
    %c0_i32 = arith.constant 0 : i32
    %c0_i32_0 = arith.constant 0 : i32
    return %c0_i32, %arg1 : i32, i32
  }
  func.func @transform_2(%arg0: i32, %arg1: i32) -> (i32, i32) {
    %c0_i32 = arith.constant 0 : i32
    %c0_i32_0 = arith.constant 0 : i32
    %c0_i32_1 = arith.constant 0 : i32
    return %c0_i32, %c0_i32_0 : i32, i32
  }
  func.func @transform_3(%arg0: i32, %arg1: i32) -> (i32, i32) {
    %c0_i32 = arith.constant 0 : i32
    %c0_i32_0 = arith.constant 0 : i32
    %c0_i32_1 = arith.constant 0 : i32
    return %c0_i32, %c0_i32_0 : i32, i32
  }
  func.func @transform_4(%arg0: i32, %arg1: i32) -> (i32, i32) {
    %c0_i32 = arith.constant 0 : i32
    %c0_i32_0 = arith.constant 0 : i32
    return %c0_i32, %arg1 : i32, i32
  }
  func.func @transform_5(%arg0: i32, %arg1: i32) -> (i32, i32) {
    %c0_i32 = arith.constant 0 : i32
    %c0_i32_0 = arith.constant 0 : i32
    return %c0_i32, %arg1 : i32, i32
  }
  func.func @transform_6(%arg0: i32, %arg1: i32) -> (i32, i32) {
    %c0_i32 = arith.constant 0 : i32
    return %arg0, %arg1 : i32, i32
  }
}

module attributes {stable_mosaic.version = 11 : i64} {
  func.func @kernel(%arg0: i32, %arg1: memref<1x6x6x16xbf16, #tpu.memory_space<vmem>>, %arg2: memref<9x16x8xbf16, #tpu.memory_space<vmem>>, %arg3: memref<1x4x4x8xbf16, #tpu.memory_space<vmem>>) attributes {dimension_semantics = [#tpu.dimension_semantics<parallel>], iteration_bounds = array<i64: 2>, scalar_prefetch = 0 : i64, scratch_operands = 0 : i64, tpu.core_type = #tpu.core_type<tc>, window_params = [{transform_indices = @transform_0, window_bounds = array<i64: 1, 6, 6, 16>}, {pipeline_mode = #tpu.pipeline_mode<synchronous>, transform_indices = @transform_1, window_bounds = array<i64: 9, 16, 8>}, {transform_indices = @transform_2, window_bounds = array<i64: 1, 4, 4, 8>}]} {
    %c0 = arith.constant 0 : index
    %c0_0 = arith.constant 0 : index
    %c0_1 = arith.constant 0 : index
    %c0_2 = arith.constant 0 : index
    %0 = vector.load %arg1[%c0, %c0_0, %c0_1, %c0_2] : memref<1x6x6x16xbf16, #tpu.memory_space<vmem>>, vector<1x1x6x16xbf16>
    %1 = vector.shape_cast %0 : vector<1x1x6x16xbf16> to vector<6x16xbf16>
    %2 = vector.extract_strided_slice %1 {offsets = [0, 0], sizes = [4, 16], strides = [1, 1]} : vector<6x16xbf16> to vector<4x16xbf16>
    %c0_3 = arith.constant 0 : index
    %c0_4 = arith.constant 0 : index
    %c0_5 = arith.constant 0 : index
    %3 = vector.load %arg2[%c0_3, %c0_4, %c0_5] : memref<9x16x8xbf16, #tpu.memory_space<vmem>>, vector<1x16x8xbf16>
    %4 = vector.shape_cast %3 : vector<1x16x8xbf16> to vector<16x8xbf16>
    %cst = arith.constant dense<0.000000e+00> : vector<4x8xf32>
    %5 = tpu.matmul %2, %4, %cst {dimension_numbers = #tpu.dot_dimension_numbers<[1], [0], [0], [1], [0, 0, 1, 1], [], []>} : vector<4x16xbf16>, vector<16x8xbf16>, vector<4x8xf32> -> vector<4x8xf32>
    %6 = vector.extract_strided_slice %1 {offsets = [1, 0], sizes = [4, 16], strides = [1, 1]} : vector<6x16xbf16> to vector<4x16xbf16>
    %c1 = arith.constant 1 : index
    %c0_6 = arith.constant 0 : index
    %c0_7 = arith.constant 0 : index
    %7 = vector.load %arg2[%c1, %c0_6, %c0_7] : memref<9x16x8xbf16, #tpu.memory_space<vmem>>, vector<1x16x8xbf16>
    %8 = vector.shape_cast %7 : vector<1x16x8xbf16> to vector<16x8xbf16>
    %cst_8 = arith.constant dense<0.000000e+00> : vector<4x8xf32>
    %9 = tpu.matmul %6, %8, %cst_8 {dimension_numbers = #tpu.dot_dimension_numbers<[1], [0], [0], [1], [0, 0, 1, 1], [], []>} : vector<4x16xbf16>, vector<16x8xbf16>, vector<4x8xf32> -> vector<4x8xf32>
    %10 = arith.addf %5, %9 : vector<4x8xf32>
    %11 = vector.extract_strided_slice %1 {offsets = [2, 0], sizes = [4, 16], strides = [1, 1]} : vector<6x16xbf16> to vector<4x16xbf16>
    %c2 = arith.constant 2 : index
    %c0_9 = arith.constant 0 : index
    %c0_10 = arith.constant 0 : index
    %12 = vector.load %arg2[%c2, %c0_9, %c0_10] : memref<9x16x8xbf16, #tpu.memory_space<vmem>>, vector<1x16x8xbf16>
    %13 = vector.shape_cast %12 : vector<1x16x8xbf16> to vector<16x8xbf16>
    %cst_11 = arith.constant dense<0.000000e+00> : vector<4x8xf32>
    %14 = tpu.matmul %11, %13, %cst_11 {dimension_numbers = #tpu.dot_dimension_numbers<[1], [0], [0], [1], [0, 0, 1, 1], [], []>} : vector<4x16xbf16>, vector<16x8xbf16>, vector<4x8xf32> -> vector<4x8xf32>
    %15 = arith.addf %10, %14 : vector<4x8xf32>
    %c0_12 = arith.constant 0 : index
    %c1_13 = arith.constant 1 : index
    %c0_14 = arith.constant 0 : index
    %c0_15 = arith.constant 0 : index
    %16 = vector.load %arg1[%c0_12, %c1_13, %c0_14, %c0_15] : memref<1x6x6x16xbf16, #tpu.memory_space<vmem>>, vector<1x1x6x16xbf16>
    %17 = vector.shape_cast %16 : vector<1x1x6x16xbf16> to vector<6x16xbf16>
    %18 = vector.extract_strided_slice %17 {offsets = [0, 0], sizes = [4, 16], strides = [1, 1]} : vector<6x16xbf16> to vector<4x16xbf16>
    %c3 = arith.constant 3 : index
    %c0_16 = arith.constant 0 : index
    %c0_17 = arith.constant 0 : index
    %19 = vector.load %arg2[%c3, %c0_16, %c0_17] : memref<9x16x8xbf16, #tpu.memory_space<vmem>>, vector<1x16x8xbf16>
    %20 = vector.shape_cast %19 : vector<1x16x8xbf16> to vector<16x8xbf16>
    %cst_18 = arith.constant dense<0.000000e+00> : vector<4x8xf32>
    %21 = tpu.matmul %18, %20, %cst_18 {dimension_numbers = #tpu.dot_dimension_numbers<[1], [0], [0], [1], [0, 0, 1, 1], [], []>} : vector<4x16xbf16>, vector<16x8xbf16>, vector<4x8xf32> -> vector<4x8xf32>
    %22 = arith.addf %15, %21 : vector<4x8xf32>
    %23 = vector.extract_strided_slice %17 {offsets = [1, 0], sizes = [4, 16], strides = [1, 1]} : vector<6x16xbf16> to vector<4x16xbf16>
    %c4 = arith.constant 4 : index
    %c0_19 = arith.constant 0 : index
    %c0_20 = arith.constant 0 : index
    %24 = vector.load %arg2[%c4, %c0_19, %c0_20] : memref<9x16x8xbf16, #tpu.memory_space<vmem>>, vector<1x16x8xbf16>
    %25 = vector.shape_cast %24 : vector<1x16x8xbf16> to vector<16x8xbf16>
    %cst_21 = arith.constant dense<0.000000e+00> : vector<4x8xf32>
    %26 = tpu.matmul %23, %25, %cst_21 {dimension_numbers = #tpu.dot_dimension_numbers<[1], [0], [0], [1], [0, 0, 1, 1], [], []>} : vector<4x16xbf16>, vector<16x8xbf16>, vector<4x8xf32> -> vector<4x8xf32>
    %27 = arith.addf %22, %26 : vector<4x8xf32>
    %28 = vector.extract_strided_slice %17 {offsets = [2, 0], sizes = [4, 16], strides = [1, 1]} : vector<6x16xbf16> to vector<4x16xbf16>
    %c5 = arith.constant 5 : index
    %c0_22 = arith.constant 0 : index
    %c0_23 = arith.constant 0 : index
    %29 = vector.load %arg2[%c5, %c0_22, %c0_23] : memref<9x16x8xbf16, #tpu.memory_space<vmem>>, vector<1x16x8xbf16>
    %30 = vector.shape_cast %29 : vector<1x16x8xbf16> to vector<16x8xbf16>
    %cst_24 = arith.constant dense<0.000000e+00> : vector<4x8xf32>
    %31 = tpu.matmul %28, %30, %cst_24 {dimension_numbers = #tpu.dot_dimension_numbers<[1], [0], [0], [1], [0, 0, 1, 1], [], []>} : vector<4x16xbf16>, vector<16x8xbf16>, vector<4x8xf32> -> vector<4x8xf32>
    %32 = arith.addf %27, %31 : vector<4x8xf32>
    %c0_25 = arith.constant 0 : index
    %c2_26 = arith.constant 2 : index
    %c0_27 = arith.constant 0 : index
    %c0_28 = arith.constant 0 : index
    %33 = vector.load %arg1[%c0_25, %c2_26, %c0_27, %c0_28] : memref<1x6x6x16xbf16, #tpu.memory_space<vmem>>, vector<1x1x6x16xbf16>
    %34 = vector.shape_cast %33 : vector<1x1x6x16xbf16> to vector<6x16xbf16>
    %35 = vector.extract_strided_slice %34 {offsets = [0, 0], sizes = [4, 16], strides = [1, 1]} : vector<6x16xbf16> to vector<4x16xbf16>
    %c6 = arith.constant 6 : index
    %c0_29 = arith.constant 0 : index
    %c0_30 = arith.constant 0 : index
    %36 = vector.load %arg2[%c6, %c0_29, %c0_30] : memref<9x16x8xbf16, #tpu.memory_space<vmem>>, vector<1x16x8xbf16>
    %37 = vector.shape_cast %36 : vector<1x16x8xbf16> to vector<16x8xbf16>
    %cst_31 = arith.constant dense<0.000000e+00> : vector<4x8xf32>
    %38 = tpu.matmul %35, %37, %cst_31 {dimension_numbers = #tpu.dot_dimension_numbers<[1], [0], [0], [1], [0, 0, 1, 1], [], []>} : vector<4x16xbf16>, vector<16x8xbf16>, vector<4x8xf32> -> vector<4x8xf32>
    %39 = arith.addf %32, %38 : vector<4x8xf32>
    %40 = vector.extract_strided_slice %34 {offsets = [1, 0], sizes = [4, 16], strides = [1, 1]} : vector<6x16xbf16> to vector<4x16xbf16>
    %c7 = arith.constant 7 : index
    %c0_32 = arith.constant 0 : index
    %c0_33 = arith.constant 0 : index
    %41 = vector.load %arg2[%c7, %c0_32, %c0_33] : memref<9x16x8xbf16, #tpu.memory_space<vmem>>, vector<1x16x8xbf16>
    %42 = vector.shape_cast %41 : vector<1x16x8xbf16> to vector<16x8xbf16>
    %cst_34 = arith.constant dense<0.000000e+00> : vector<4x8xf32>
    %43 = tpu.matmul %40, %42, %cst_34 {dimension_numbers = #tpu.dot_dimension_numbers<[1], [0], [0], [1], [0, 0, 1, 1], [], []>} : vector<4x16xbf16>, vector<16x8xbf16>, vector<4x8xf32> -> vector<4x8xf32>
    %44 = arith.addf %39, %43 : vector<4x8xf32>
    %45 = vector.extract_strided_slice %34 {offsets = [2, 0], sizes = [4, 16], strides = [1, 1]} : vector<6x16xbf16> to vector<4x16xbf16>
    %c8 = arith.constant 8 : index
    %c0_35 = arith.constant 0 : index
    %c0_36 = arith.constant 0 : index
    %46 = vector.load %arg2[%c8, %c0_35, %c0_36] : memref<9x16x8xbf16, #tpu.memory_space<vmem>>, vector<1x16x8xbf16>
    %47 = vector.shape_cast %46 : vector<1x16x8xbf16> to vector<16x8xbf16>
    %cst_37 = arith.constant dense<0.000000e+00> : vector<4x8xf32>
    %48 = tpu.matmul %45, %47, %cst_37 {dimension_numbers = #tpu.dot_dimension_numbers<[1], [0], [0], [1], [0, 0, 1, 1], [], []>} : vector<4x16xbf16>, vector<16x8xbf16>, vector<4x8xf32> -> vector<4x8xf32>
    %49 = arith.addf %44, %48 : vector<4x8xf32>
    %50 = arith.truncf %49 : vector<4x8xf32> to vector<4x8xbf16>
    %c0_38 = arith.constant 0 : index
    %c0_39 = arith.constant 0 : index
    %c0_40 = arith.constant 0 : index
    %c0_41 = arith.constant 0 : index
    %51 = vector.load %arg3[%c0_38, %c0_39, %c0_40, %c0_41] : memref<1x4x4x8xbf16, #tpu.memory_space<vmem>>, vector<1x1x4x8xbf16>
    %52 = vector.shape_cast %51 : vector<1x1x4x8xbf16> to vector<4x8xbf16>
    %53 = vector.shape_cast %50 : vector<4x8xbf16> to vector<1x1x4x8xbf16>
    tpu.vector_store %arg3[%c0_38, %c0_39, %c0_40, %c0_41], %53 {strides = array<i32>} : memref<1x4x4x8xbf16, #tpu.memory_space<vmem>>, vector<1x1x4x8xbf16>,
    %c0_42 = arith.constant 0 : index
    %c1_43 = arith.constant 1 : index
    %c0_44 = arith.constant 0 : index
    %c0_45 = arith.constant 0 : index
    %54 = vector.load %arg1[%c0_42, %c1_43, %c0_44, %c0_45] : memref<1x6x6x16xbf16, #tpu.memory_space<vmem>>, vector<1x1x6x16xbf16>
    %55 = vector.shape_cast %54 : vector<1x1x6x16xbf16> to vector<6x16xbf16>
    %56 = vector.extract_strided_slice %55 {offsets = [0, 0], sizes = [4, 16], strides = [1, 1]} : vector<6x16xbf16> to vector<4x16xbf16>
    %c0_46 = arith.constant 0 : index
    %c0_47 = arith.constant 0 : index
    %c0_48 = arith.constant 0 : index
    %57 = vector.load %arg2[%c0_46, %c0_47, %c0_48] : memref<9x16x8xbf16, #tpu.memory_space<vmem>>, vector<1x16x8xbf16>
    %58 = vector.shape_cast %57 : vector<1x16x8xbf16> to vector<16x8xbf16>
    %cst_49 = arith.constant dense<0.000000e+00> : vector<4x8xf32>
    %59 = tpu.matmul %56, %58, %cst_49 {dimension_numbers = #tpu.dot_dimension_numbers<[1], [0], [0], [1], [0, 0, 1, 1], [], []>} : vector<4x16xbf16>, vector<16x8xbf16>, vector<4x8xf32> -> vector<4x8xf32>
    %60 = vector.extract_strided_slice %55 {offsets = [1, 0], sizes = [4, 16], strides = [1, 1]} : vector<6x16xbf16> to vector<4x16xbf16>
    %c1_50 = arith.constant 1 : index
    %c0_51 = arith.constant 0 : index
    %c0_52 = arith.constant 0 : index
    %61 = vector.load %arg2[%c1_50, %c0_51, %c0_52] : memref<9x16x8xbf16, #tpu.memory_space<vmem>>, vector<1x16x8xbf16>
    %62 = vector.shape_cast %61 : vector<1x16x8xbf16> to vector<16x8xbf16>
    %cst_53 = arith.constant dense<0.000000e+00> : vector<4x8xf32>
    %63 = tpu.matmul %60, %62, %cst_53 {dimension_numbers = #tpu.dot_dimension_numbers<[1], [0], [0], [1], [0, 0, 1, 1], [], []>} : vector<4x16xbf16>, vector<16x8xbf16>, vector<4x8xf32> -> vector<4x8xf32>
    %64 = arith.addf %59, %63 : vector<4x8xf32>
    %65 = vector.extract_strided_slice %55 {offsets = [2, 0], sizes = [4, 16], strides = [1, 1]} : vector<6x16xbf16> to vector<4x16xbf16>
    %c2_54 = arith.constant 2 : index
    %c0_55 = arith.constant 0 : index
    %c0_56 = arith.constant 0 : index
    %66 = vector.load %arg2[%c2_54, %c0_55, %c0_56] : memref<9x16x8xbf16, #tpu.memory_space<vmem>>, vector<1x16x8xbf16>
    %67 = vector.shape_cast %66 : vector<1x16x8xbf16> to vector<16x8xbf16>
    %cst_57 = arith.constant dense<0.000000e+00> : vector<4x8xf32>
    %68 = tpu.matmul %65, %67, %cst_57 {dimension_numbers = #tpu.dot_dimension_numbers<[1], [0], [0], [1], [0, 0, 1, 1], [], []>} : vector<4x16xbf16>, vector<16x8xbf16>, vector<4x8xf32> -> vector<4x8xf32>
    %69 = arith.addf %64, %68 : vector<4x8xf32>
    %c0_58 = arith.constant 0 : index
    %c2_59 = arith.constant 2 : index
    %c0_60 = arith.constant 0 : index
    %c0_61 = arith.constant 0 : index
    %70 = vector.load %arg1[%c0_58, %c2_59, %c0_60, %c0_61] : memref<1x6x6x16xbf16, #tpu.memory_space<vmem>>, vector<1x1x6x16xbf16>
    %71 = vector.shape_cast %70 : vector<1x1x6x16xbf16> to vector<6x16xbf16>
    %72 = vector.extract_strided_slice %71 {offsets = [0, 0], sizes = [4, 16], strides = [1, 1]} : vector<6x16xbf16> to vector<4x16xbf16>
    %c3_62 = arith.constant 3 : index
    %c0_63 = arith.constant 0 : index
    %c0_64 = arith.constant 0 : index
    %73 = vector.load %arg2[%c3_62, %c0_63, %c0_64] : memref<9x16x8xbf16, #tpu.memory_space<vmem>>, vector<1x16x8xbf16>
    %74 = vector.shape_cast %73 : vector<1x16x8xbf16> to vector<16x8xbf16>
    %cst_65 = arith.constant dense<0.000000e+00> : vector<4x8xf32>
    %75 = tpu.matmul %72, %74, %cst_65 {dimension_numbers = #tpu.dot_dimension_numbers<[1], [0], [0], [1], [0, 0, 1, 1], [], []>} : vector<4x16xbf16>, vector<16x8xbf16>, vector<4x8xf32> -> vector<4x8xf32>
    %76 = arith.addf %69, %75 : vector<4x8xf32>
    %77 = vector.extract_strided_slice %71 {offsets = [1, 0], sizes = [4, 16], strides = [1, 1]} : vector<6x16xbf16> to vector<4x16xbf16>
    %c4_66 = arith.constant 4 : index
    %c0_67 = arith.constant 0 : index
    %c0_68 = arith.constant 0 : index
    %78 = vector.load %arg2[%c4_66, %c0_67, %c0_68] : memref<9x16x8xbf16, #tpu.memory_space<vmem>>, vector<1x16x8xbf16>
    %79 = vector.shape_cast %78 : vector<1x16x8xbf16> to vector<16x8xbf16>
    %cst_69 = arith.constant dense<0.000000e+00> : vector<4x8xf32>
    %80 = tpu.matmul %77, %79, %cst_69 {dimension_numbers = #tpu.dot_dimension_numbers<[1], [0], [0], [1], [0, 0, 1, 1], [], []>} : vector<4x16xbf16>, vector<16x8xbf16>, vector<4x8xf32> -> vector<4x8xf32>
    %81 = arith.addf %76, %80 : vector<4x8xf32>
    %82 = vector.extract_strided_slice %71 {offsets = [2, 0], sizes = [4, 16], strides = [1, 1]} : vector<6x16xbf16> to vector<4x16xbf16>
    %c5_70 = arith.constant 5 : index
    %c0_71 = arith.constant 0 : index
    %c0_72 = arith.constant 0 : index
    %83 = vector.load %arg2[%c5_70, %c0_71, %c0_72] : memref<9x16x8xbf16, #tpu.memory_space<vmem>>, vector<1x16x8xbf16>
    %84 = vector.shape_cast %83 : vector<1x16x8xbf16> to vector<16x8xbf16>
    %cst_73 = arith.constant dense<0.000000e+00> : vector<4x8xf32>
    %85 = tpu.matmul %82, %84, %cst_73 {dimension_numbers = #tpu.dot_dimension_numbers<[1], [0], [0], [1], [0, 0, 1, 1], [], []>} : vector<4x16xbf16>, vector<16x8xbf16>, vector<4x8xf32> -> vector<4x8xf32>
    %86 = arith.addf %81, %85 : vector<4x8xf32>
    %c0_74 = arith.constant 0 : index
    %c3_75 = arith.constant 3 : index
    %c0_76 = arith.constant 0 : index
    %c0_77 = arith.constant 0 : index
    %87 = vector.load %arg1[%c0_74, %c3_75, %c0_76, %c0_77] : memref<1x6x6x16xbf16, #tpu.memory_space<vmem>>, vector<1x1x6x16xbf16>
    %88 = vector.shape_cast %87 : vector<1x1x6x16xbf16> to vector<6x16xbf16>
    %89 = vector.extract_strided_slice %88 {offsets = [0, 0], sizes = [4, 16], strides = [1, 1]} : vector<6x16xbf16> to vector<4x16xbf16>
    %c6_78 = arith.constant 6 : index
    %c0_79 = arith.constant 0 : index
    %c0_80 = arith.constant 0 : index
    %90 = vector.load %arg2[%c6_78, %c0_79, %c0_80] : memref<9x16x8xbf16, #tpu.memory_space<vmem>>, vector<1x16x8xbf16>
    %91 = vector.shape_cast %90 : vector<1x16x8xbf16> to vector<16x8xbf16>
    %cst_81 = arith.constant dense<0.000000e+00> : vector<4x8xf32>
    %92 = tpu.matmul %89, %91, %cst_81 {dimension_numbers = #tpu.dot_dimension_numbers<[1], [0], [0], [1], [0, 0, 1, 1], [], []>} : vector<4x16xbf16>, vector<16x8xbf16>, vector<4x8xf32> -> vector<4x8xf32>
    %93 = arith.addf %86, %92 : vector<4x8xf32>
    %94 = vector.extract_strided_slice %88 {offsets = [1, 0], sizes = [4, 16], strides = [1, 1]} : vector<6x16xbf16> to vector<4x16xbf16>
    %c7_82 = arith.constant 7 : index
    %c0_83 = arith.constant 0 : index
    %c0_84 = arith.constant 0 : index
    %95 = vector.load %arg2[%c7_82, %c0_83, %c0_84] : memref<9x16x8xbf16, #tpu.memory_space<vmem>>, vector<1x16x8xbf16>
    %96 = vector.shape_cast %95 : vector<1x16x8xbf16> to vector<16x8xbf16>
    %cst_85 = arith.constant dense<0.000000e+00> : vector<4x8xf32>
    %97 = tpu.matmul %94, %96, %cst_85 {dimension_numbers = #tpu.dot_dimension_numbers<[1], [0], [0], [1], [0, 0, 1, 1], [], []>} : vector<4x16xbf16>, vector<16x8xbf16>, vector<4x8xf32> -> vector<4x8xf32>
    %98 = arith.addf %93, %97 : vector<4x8xf32>
    %99 = vector.extract_strided_slice %88 {offsets = [2, 0], sizes = [4, 16], strides = [1, 1]} : vector<6x16xbf16> to vector<4x16xbf16>
    %c8_86 = arith.constant 8 : index
    %c0_87 = arith.constant 0 : index
    %c0_88 = arith.constant 0 : index
    %100 = vector.load %arg2[%c8_86, %c0_87, %c0_88] : memref<9x16x8xbf16, #tpu.memory_space<vmem>>, vector<1x16x8xbf16>
    %101 = vector.shape_cast %100 : vector<1x16x8xbf16> to vector<16x8xbf16>
    %cst_89 = arith.constant dense<0.000000e+00> : vector<4x8xf32>
    %102 = tpu.matmul %99, %101, %cst_89 {dimension_numbers = #tpu.dot_dimension_numbers<[1], [0], [0], [1], [0, 0, 1, 1], [], []>} : vector<4x16xbf16>, vector<16x8xbf16>, vector<4x8xf32> -> vector<4x8xf32>
    %103 = arith.addf %98, %102 : vector<4x8xf32>
    %104 = arith.truncf %103 : vector<4x8xf32> to vector<4x8xbf16>
    %c0_90 = arith.constant 0 : index
    %c1_91 = arith.constant 1 : index
    %c0_92 = arith.constant 0 : index
    %c0_93 = arith.constant 0 : index
    %105 = vector.load %arg3[%c0_90, %c1_91, %c0_92, %c0_93] : memref<1x4x4x8xbf16, #tpu.memory_space<vmem>>, vector<1x1x4x8xbf16>
    %106 = vector.shape_cast %105 : vector<1x1x4x8xbf16> to vector<4x8xbf16>
    %107 = vector.shape_cast %104 : vector<4x8xbf16> to vector<1x1x4x8xbf16>
    tpu.vector_store %arg3[%c0_90, %c1_91, %c0_92, %c0_93], %107 {strides = array<i32>} : memref<1x4x4x8xbf16, #tpu.memory_space<vmem>>, vector<1x1x4x8xbf16>,
    %c0_94 = arith.constant 0 : index
    %c2_95 = arith.constant 2 : index
    %c0_96 = arith.constant 0 : index
    %c0_97 = arith.constant 0 : index
    %108 = vector.load %arg1[%c0_94, %c2_95, %c0_96, %c0_97] : memref<1x6x6x16xbf16, #tpu.memory_space<vmem>>, vector<1x1x6x16xbf16>
    %109 = vector.shape_cast %108 : vector<1x1x6x16xbf16> to vector<6x16xbf16>
    %110 = vector.extract_strided_slice %109 {offsets = [0, 0], sizes = [4, 16], strides = [1, 1]} : vector<6x16xbf16> to vector<4x16xbf16>
    %c0_98 = arith.constant 0 : index
    %c0_99 = arith.constant 0 : index
    %c0_100 = arith.constant 0 : index
    %111 = vector.load %arg2[%c0_98, %c0_99, %c0_100] : memref<9x16x8xbf16, #tpu.memory_space<vmem>>, vector<1x16x8xbf16>
    %112 = vector.shape_cast %111 : vector<1x16x8xbf16> to vector<16x8xbf16>
    %cst_101 = arith.constant dense<0.000000e+00> : vector<4x8xf32>
    %113 = tpu.matmul %110, %112, %cst_101 {dimension_numbers = #tpu.dot_dimension_numbers<[1], [0], [0], [1], [0, 0, 1, 1], [], []>} : vector<4x16xbf16>, vector<16x8xbf16>, vector<4x8xf32> -> vector<4x8xf32>
    %114 = vector.extract_strided_slice %109 {offsets = [1, 0], sizes = [4, 16], strides = [1, 1]} : vector<6x16xbf16> to vector<4x16xbf16>
    %c1_102 = arith.constant 1 : index
    %c0_103 = arith.constant 0 : index
    %c0_104 = arith.constant 0 : index
    %115 = vector.load %arg2[%c1_102, %c0_103, %c0_104] : memref<9x16x8xbf16, #tpu.memory_space<vmem>>, vector<1x16x8xbf16>
    %116 = vector.shape_cast %115 : vector<1x16x8xbf16> to vector<16x8xbf16>
    %cst_105 = arith.constant dense<0.000000e+00> : vector<4x8xf32>
    %117 = tpu.matmul %114, %116, %cst_105 {dimension_numbers = #tpu.dot_dimension_numbers<[1], [0], [0], [1], [0, 0, 1, 1], [], []>} : vector<4x16xbf16>, vector<16x8xbf16>, vector<4x8xf32> -> vector<4x8xf32>
    %118 = arith.addf %113, %117 : vector<4x8xf32>
    %119 = vector.extract_strided_slice %109 {offsets = [2, 0], sizes = [4, 16], strides = [1, 1]} : vector<6x16xbf16> to vector<4x16xbf16>
    %c2_106 = arith.constant 2 : index
    %c0_107 = arith.constant 0 : index
    %c0_108 = arith.constant 0 : index
    %120 = vector.load %arg2[%c2_106, %c0_107, %c0_108] : memref<9x16x8xbf16, #tpu.memory_space<vmem>>, vector<1x16x8xbf16>
    %121 = vector.shape_cast %120 : vector<1x16x8xbf16> to vector<16x8xbf16>
    %cst_109 = arith.constant dense<0.000000e+00> : vector<4x8xf32>
    %122 = tpu.matmul %119, %121, %cst_109 {dimension_numbers = #tpu.dot_dimension_numbers<[1], [0], [0], [1], [0, 0, 1, 1], [], []>} : vector<4x16xbf16>, vector<16x8xbf16>, vector<4x8xf32> -> vector<4x8xf32>
    %123 = arith.addf %118, %122 : vector<4x8xf32>
    %c0_110 = arith.constant 0 : index
    %c3_111 = arith.constant 3 : index
    %c0_112 = arith.constant 0 : index
    %c0_113 = arith.constant 0 : index
    %124 = vector.load %arg1[%c0_110, %c3_111, %c0_112, %c0_113] : memref<1x6x6x16xbf16, #tpu.memory_space<vmem>>, vector<1x1x6x16xbf16>
    %125 = vector.shape_cast %124 : vector<1x1x6x16xbf16> to vector<6x16xbf16>
    %126 = vector.extract_strided_slice %125 {offsets = [0, 0], sizes = [4, 16], strides = [1, 1]} : vector<6x16xbf16> to vector<4x16xbf16>
    %c3_114 = arith.constant 3 : index
    %c0_115 = arith.constant 0 : index
    %c0_116 = arith.constant 0 : index
    %127 = vector.load %arg2[%c3_114, %c0_115, %c0_116] : memref<9x16x8xbf16, #tpu.memory_space<vmem>>, vector<1x16x8xbf16>
    %128 = vector.shape_cast %127 : vector<1x16x8xbf16> to vector<16x8xbf16>
    %cst_117 = arith.constant dense<0.000000e+00> : vector<4x8xf32>
    %129 = tpu.matmul %126, %128, %cst_117 {dimension_numbers = #tpu.dot_dimension_numbers<[1], [0], [0], [1], [0, 0, 1, 1], [], []>} : vector<4x16xbf16>, vector<16x8xbf16>, vector<4x8xf32> -> vector<4x8xf32>
    %130 = arith.addf %123, %129 : vector<4x8xf32>
    %131 = vector.extract_strided_slice %125 {offsets = [1, 0], sizes = [4, 16], strides = [1, 1]} : vector<6x16xbf16> to vector<4x16xbf16>
    %c4_118 = arith.constant 4 : index
    %c0_119 = arith.constant 0 : index
    %c0_120 = arith.constant 0 : index
    %132 = vector.load %arg2[%c4_118, %c0_119, %c0_120] : memref<9x16x8xbf16, #tpu.memory_space<vmem>>, vector<1x16x8xbf16>
    %133 = vector.shape_cast %132 : vector<1x16x8xbf16> to vector<16x8xbf16>
    %cst_121 = arith.constant dense<0.000000e+00> : vector<4x8xf32>
    %134 = tpu.matmul %131, %133, %cst_121 {dimension_numbers = #tpu.dot_dimension_numbers<[1], [0], [0], [1], [0, 0, 1, 1], [], []>} : vector<4x16xbf16>, vector<16x8xbf16>, vector<4x8xf32> -> vector<4x8xf32>
    %135 = arith.addf %130, %134 : vector<4x8xf32>
    %136 = vector.extract_strided_slice %125 {offsets = [2, 0], sizes = [4, 16], strides = [1, 1]} : vector<6x16xbf16> to vector<4x16xbf16>
    %c5_122 = arith.constant 5 : index
    %c0_123 = arith.constant 0 : index
    %c0_124 = arith.constant 0 : index
    %137 = vector.load %arg2[%c5_122, %c0_123, %c0_124] : memref<9x16x8xbf16, #tpu.memory_space<vmem>>, vector<1x16x8xbf16>
    %138 = vector.shape_cast %137 : vector<1x16x8xbf16> to vector<16x8xbf16>
    %cst_125 = arith.constant dense<0.000000e+00> : vector<4x8xf32>
    %139 = tpu.matmul %136, %138, %cst_125 {dimension_numbers = #tpu.dot_dimension_numbers<[1], [0], [0], [1], [0, 0, 1, 1], [], []>} : vector<4x16xbf16>, vector<16x8xbf16>, vector<4x8xf32> -> vector<4x8xf32>
    %140 = arith.addf %135, %139 : vector<4x8xf32>
    %c0_126 = arith.constant 0 : index
    %c4_127 = arith.constant 4 : index
    %c0_128 = arith.constant 0 : index
    %c0_129 = arith.constant 0 : index
    %141 = vector.load %arg1[%c0_126, %c4_127, %c0_128, %c0_129] : memref<1x6x6x16xbf16, #tpu.memory_space<vmem>>, vector<1x1x6x16xbf16>
    %142 = vector.shape_cast %141 : vector<1x1x6x16xbf16> to vector<6x16xbf16>
    %143 = vector.extract_strided_slice %142 {offsets = [0, 0], sizes = [4, 16], strides = [1, 1]} : vector<6x16xbf16> to vector<4x16xbf16>
    %c6_130 = arith.constant 6 : index
    %c0_131 = arith.constant 0 : index
    %c0_132 = arith.constant 0 : index
    %144 = vector.load %arg2[%c6_130, %c0_131, %c0_132] : memref<9x16x8xbf16, #tpu.memory_space<vmem>>, vector<1x16x8xbf16>
    %145 = vector.shape_cast %144 : vector<1x16x8xbf16> to vector<16x8xbf16>
    %cst_133 = arith.constant dense<0.000000e+00> : vector<4x8xf32>
    %146 = tpu.matmul %143, %145, %cst_133 {dimension_numbers = #tpu.dot_dimension_numbers<[1], [0], [0], [1], [0, 0, 1, 1], [], []>} : vector<4x16xbf16>, vector<16x8xbf16>, vector<4x8xf32> -> vector<4x8xf32>
    %147 = arith.addf %140, %146 : vector<4x8xf32>
    %148 = vector.extract_strided_slice %142 {offsets = [1, 0], sizes = [4, 16], strides = [1, 1]} : vector<6x16xbf16> to vector<4x16xbf16>
    %c7_134 = arith.constant 7 : index
    %c0_135 = arith.constant 0 : index
    %c0_136 = arith.constant 0 : index
    %149 = vector.load %arg2[%c7_134, %c0_135, %c0_136] : memref<9x16x8xbf16, #tpu.memory_space<vmem>>, vector<1x16x8xbf16>
    %150 = vector.shape_cast %149 : vector<1x16x8xbf16> to vector<16x8xbf16>
    %cst_137 = arith.constant dense<0.000000e+00> : vector<4x8xf32>
    %151 = tpu.matmul %148, %150, %cst_137 {dimension_numbers = #tpu.dot_dimension_numbers<[1], [0], [0], [1], [0, 0, 1, 1], [], []>} : vector<4x16xbf16>, vector<16x8xbf16>, vector<4x8xf32> -> vector<4x8xf32>
    %152 = arith.addf %147, %151 : vector<4x8xf32>
    %153 = vector.extract_strided_slice %142 {offsets = [2, 0], sizes = [4, 16], strides = [1, 1]} : vector<6x16xbf16> to vector<4x16xbf16>
    %c8_138 = arith.constant 8 : index
    %c0_139 = arith.constant 0 : index
    %c0_140 = arith.constant 0 : index
    %154 = vector.load %arg2[%c8_138, %c0_139, %c0_140] : memref<9x16x8xbf16, #tpu.memory_space<vmem>>, vector<1x16x8xbf16>
    %155 = vector.shape_cast %154 : vector<1x16x8xbf16> to vector<16x8xbf16>
    %cst_141 = arith.constant dense<0.000000e+00> : vector<4x8xf32>
    %156 = tpu.matmul %153, %155, %cst_141 {dimension_numbers = #tpu.dot_dimension_numbers<[1], [0], [0], [1], [0, 0, 1, 1], [], []>} : vector<4x16xbf16>, vector<16x8xbf16>, vector<4x8xf32> -> vector<4x8xf32>
    %157 = arith.addf %152, %156 : vector<4x8xf32>
    %158 = arith.truncf %157 : vector<4x8xf32> to vector<4x8xbf16>
    %c0_142 = arith.constant 0 : index
    %c2_143 = arith.constant 2 : index
    %c0_144 = arith.constant 0 : index
    %c0_145 = arith.constant 0 : index
    %159 = vector.load %arg3[%c0_142, %c2_143, %c0_144, %c0_145] : memref<1x4x4x8xbf16, #tpu.memory_space<vmem>>, vector<1x1x4x8xbf16>
    %160 = vector.shape_cast %159 : vector<1x1x4x8xbf16> to vector<4x8xbf16>
    %161 = vector.shape_cast %158 : vector<4x8xbf16> to vector<1x1x4x8xbf16>
    tpu.vector_store %arg3[%c0_142, %c2_143, %c0_144, %c0_145], %161 {strides = array<i32>} : memref<1x4x4x8xbf16, #tpu.memory_space<vmem>>, vector<1x1x4x8xbf16>,
    %c0_146 = arith.constant 0 : index
    %c3_147 = arith.constant 3 : index
    %c0_148 = arith.constant 0 : index
    %c0_149 = arith.constant 0 : index
    %162 = vector.load %arg1[%c0_146, %c3_147, %c0_148, %c0_149] : memref<1x6x6x16xbf16, #tpu.memory_space<vmem>>, vector<1x1x6x16xbf16>
    %163 = vector.shape_cast %162 : vector<1x1x6x16xbf16> to vector<6x16xbf16>
    %164 = vector.extract_strided_slice %163 {offsets = [0, 0], sizes = [4, 16], strides = [1, 1]} : vector<6x16xbf16> to vector<4x16xbf16>
    %c0_150 = arith.constant 0 : index
    %c0_151 = arith.constant 0 : index
    %c0_152 = arith.constant 0 : index
    %165 = vector.load %arg2[%c0_150, %c0_151, %c0_152] : memref<9x16x8xbf16, #tpu.memory_space<vmem>>, vector<1x16x8xbf16>
    %166 = vector.shape_cast %165 : vector<1x16x8xbf16> to vector<16x8xbf16>
    %cst_153 = arith.constant dense<0.000000e+00> : vector<4x8xf32>
    %167 = tpu.matmul %164, %166, %cst_153 {dimension_numbers = #tpu.dot_dimension_numbers<[1], [0], [0], [1], [0, 0, 1, 1], [], []>} : vector<4x16xbf16>, vector<16x8xbf16>, vector<4x8xf32> -> vector<4x8xf32>
    %168 = vector.extract_strided_slice %163 {offsets = [1, 0], sizes = [4, 16], strides = [1, 1]} : vector<6x16xbf16> to vector<4x16xbf16>
    %c1_154 = arith.constant 1 : index
    %c0_155 = arith.constant 0 : index
    %c0_156 = arith.constant 0 : index
    %169 = vector.load %arg2[%c1_154, %c0_155, %c0_156] : memref<9x16x8xbf16, #tpu.memory_space<vmem>>, vector<1x16x8xbf16>
    %170 = vector.shape_cast %169 : vector<1x16x8xbf16> to vector<16x8xbf16>
    %cst_157 = arith.constant dense<0.000000e+00> : vector<4x8xf32>
    %171 = tpu.matmul %168, %170, %cst_157 {dimension_numbers = #tpu.dot_dimension_numbers<[1], [0], [0], [1], [0, 0, 1, 1], [], []>} : vector<4x16xbf16>, vector<16x8xbf16>, vector<4x8xf32> -> vector<4x8xf32>
    %172 = arith.addf %167, %171 : vector<4x8xf32>
    %173 = vector.extract_strided_slice %163 {offsets = [2, 0], sizes = [4, 16], strides = [1, 1]} : vector<6x16xbf16> to vector<4x16xbf16>
    %c2_158 = arith.constant 2 : index
    %c0_159 = arith.constant 0 : index
    %c0_160 = arith.constant 0 : index
    %174 = vector.load %arg2[%c2_158, %c0_159, %c0_160] : memref<9x16x8xbf16, #tpu.memory_space<vmem>>, vector<1x16x8xbf16>
    %175 = vector.shape_cast %174 : vector<1x16x8xbf16> to vector<16x8xbf16>
    %cst_161 = arith.constant dense<0.000000e+00> : vector<4x8xf32>
    %176 = tpu.matmul %173, %175, %cst_161 {dimension_numbers = #tpu.dot_dimension_numbers<[1], [0], [0], [1], [0, 0, 1, 1], [], []>} : vector<4x16xbf16>, vector<16x8xbf16>, vector<4x8xf32> -> vector<4x8xf32>
    %177 = arith.addf %172, %176 : vector<4x8xf32>
    %c0_162 = arith.constant 0 : index
    %c4_163 = arith.constant 4 : index
    %c0_164 = arith.constant 0 : index
    %c0_165 = arith.constant 0 : index
    %178 = vector.load %arg1[%c0_162, %c4_163, %c0_164, %c0_165] : memref<1x6x6x16xbf16, #tpu.memory_space<vmem>>, vector<1x1x6x16xbf16>
    %179 = vector.shape_cast %178 : vector<1x1x6x16xbf16> to vector<6x16xbf16>
    %180 = vector.extract_strided_slice %179 {offsets = [0, 0], sizes = [4, 16], strides = [1, 1]} : vector<6x16xbf16> to vector<4x16xbf16>
    %c3_166 = arith.constant 3 : index
    %c0_167 = arith.constant 0 : index
    %c0_168 = arith.constant 0 : index
    %181 = vector.load %arg2[%c3_166, %c0_167, %c0_168] : memref<9x16x8xbf16, #tpu.memory_space<vmem>>, vector<1x16x8xbf16>
    %182 = vector.shape_cast %181 : vector<1x16x8xbf16> to vector<16x8xbf16>
    %cst_169 = arith.constant dense<0.000000e+00> : vector<4x8xf32>
    %183 = tpu.matmul %180, %182, %cst_169 {dimension_numbers = #tpu.dot_dimension_numbers<[1], [0], [0], [1], [0, 0, 1, 1], [], []>} : vector<4x16xbf16>, vector<16x8xbf16>, vector<4x8xf32> -> vector<4x8xf32>
    %184 = arith.addf %177, %183 : vector<4x8xf32>
    %185 = vector.extract_strided_slice %179 {offsets = [1, 0], sizes = [4, 16], strides = [1, 1]} : vector<6x16xbf16> to vector<4x16xbf16>
    %c4_170 = arith.constant 4 : index
    %c0_171 = arith.constant 0 : index
    %c0_172 = arith.constant 0 : index
    %186 = vector.load %arg2[%c4_170, %c0_171, %c0_172] : memref<9x16x8xbf16, #tpu.memory_space<vmem>>, vector<1x16x8xbf16>
    %187 = vector.shape_cast %186 : vector<1x16x8xbf16> to vector<16x8xbf16>
    %cst_173 = arith.constant dense<0.000000e+00> : vector<4x8xf32>
    %188 = tpu.matmul %185, %187, %cst_173 {dimension_numbers = #tpu.dot_dimension_numbers<[1], [0], [0], [1], [0, 0, 1, 1], [], []>} : vector<4x16xbf16>, vector<16x8xbf16>, vector<4x8xf32> -> vector<4x8xf32>
    %189 = arith.addf %184, %188 : vector<4x8xf32>
    %190 = vector.extract_strided_slice %179 {offsets = [2, 0], sizes = [4, 16], strides = [1, 1]} : vector<6x16xbf16> to vector<4x16xbf16>
    %c5_174 = arith.constant 5 : index
    %c0_175 = arith.constant 0 : index
    %c0_176 = arith.constant 0 : index
    %191 = vector.load %arg2[%c5_174, %c0_175, %c0_176] : memref<9x16x8xbf16, #tpu.memory_space<vmem>>, vector<1x16x8xbf16>
    %192 = vector.shape_cast %191 : vector<1x16x8xbf16> to vector<16x8xbf16>
    %cst_177 = arith.constant dense<0.000000e+00> : vector<4x8xf32>
    %193 = tpu.matmul %190, %192, %cst_177 {dimension_numbers = #tpu.dot_dimension_numbers<[1], [0], [0], [1], [0, 0, 1, 1], [], []>} : vector<4x16xbf16>, vector<16x8xbf16>, vector<4x8xf32> -> vector<4x8xf32>
    %194 = arith.addf %189, %193 : vector<4x8xf32>
    %c0_178 = arith.constant 0 : index
    %c5_179 = arith.constant 5 : index
    %c0_180 = arith.constant 0 : index
    %c0_181 = arith.constant 0 : index
    %195 = vector.load %arg1[%c0_178, %c5_179, %c0_180, %c0_181] : memref<1x6x6x16xbf16, #tpu.memory_space<vmem>>, vector<1x1x6x16xbf16>
    %196 = vector.shape_cast %195 : vector<1x1x6x16xbf16> to vector<6x16xbf16>
    %197 = vector.extract_strided_slice %196 {offsets = [0, 0], sizes = [4, 16], strides = [1, 1]} : vector<6x16xbf16> to vector<4x16xbf16>
    %c6_182 = arith.constant 6 : index
    %c0_183 = arith.constant 0 : index
    %c0_184 = arith.constant 0 : index
    %198 = vector.load %arg2[%c6_182, %c0_183, %c0_184] : memref<9x16x8xbf16, #tpu.memory_space<vmem>>, vector<1x16x8xbf16>
    %199 = vector.shape_cast %198 : vector<1x16x8xbf16> to vector<16x8xbf16>
    %cst_185 = arith.constant dense<0.000000e+00> : vector<4x8xf32>
    %200 = tpu.matmul %197, %199, %cst_185 {dimension_numbers = #tpu.dot_dimension_numbers<[1], [0], [0], [1], [0, 0, 1, 1], [], []>} : vector<4x16xbf16>, vector<16x8xbf16>, vector<4x8xf32> -> vector<4x8xf32>
    %201 = arith.addf %194, %200 : vector<4x8xf32>
    %202 = vector.extract_strided_slice %196 {offsets = [1, 0], sizes = [4, 16], strides = [1, 1]} : vector<6x16xbf16> to vector<4x16xbf16>
    %c7_186 = arith.constant 7 : index
    %c0_187 = arith.constant 0 : index
    %c0_188 = arith.constant 0 : index
    %203 = vector.load %arg2[%c7_186, %c0_187, %c0_188] : memref<9x16x8xbf16, #tpu.memory_space<vmem>>, vector<1x16x8xbf16>
    %204 = vector.shape_cast %203 : vector<1x16x8xbf16> to vector<16x8xbf16>
    %cst_189 = arith.constant dense<0.000000e+00> : vector<4x8xf32>
    %205 = tpu.matmul %202, %204, %cst_189 {dimension_numbers = #tpu.dot_dimension_numbers<[1], [0], [0], [1], [0, 0, 1, 1], [], []>} : vector<4x16xbf16>, vector<16x8xbf16>, vector<4x8xf32> -> vector<4x8xf32>
    %206 = arith.addf %201, %205 : vector<4x8xf32>
    %207 = vector.extract_strided_slice %196 {offsets = [2, 0], sizes = [4, 16], strides = [1, 1]} : vector<6x16xbf16> to vector<4x16xbf16>
    %c8_190 = arith.constant 8 : index
    %c0_191 = arith.constant 0 : index
    %c0_192 = arith.constant 0 : index
    %208 = vector.load %arg2[%c8_190, %c0_191, %c0_192] : memref<9x16x8xbf16, #tpu.memory_space<vmem>>, vector<1x16x8xbf16>
    %209 = vector.shape_cast %208 : vector<1x16x8xbf16> to vector<16x8xbf16>
    %cst_193 = arith.constant dense<0.000000e+00> : vector<4x8xf32>
    %210 = tpu.matmul %207, %209, %cst_193 {dimension_numbers = #tpu.dot_dimension_numbers<[1], [0], [0], [1], [0, 0, 1, 1], [], []>} : vector<4x16xbf16>, vector<16x8xbf16>, vector<4x8xf32> -> vector<4x8xf32>
    %211 = arith.addf %206, %210 : vector<4x8xf32>
    %212 = arith.truncf %211 : vector<4x8xf32> to vector<4x8xbf16>
    %c0_194 = arith.constant 0 : index
    %c3_195 = arith.constant 3 : index
    %c0_196 = arith.constant 0 : index
    %c0_197 = arith.constant 0 : index
    %213 = vector.load %arg3[%c0_194, %c3_195, %c0_196, %c0_197] : memref<1x4x4x8xbf16, #tpu.memory_space<vmem>>, vector<1x1x4x8xbf16>
    %214 = vector.shape_cast %213 : vector<1x1x4x8xbf16> to vector<4x8xbf16>
    %215 = vector.shape_cast %212 : vector<4x8xbf16> to vector<1x1x4x8xbf16>
    tpu.vector_store %arg3[%c0_194, %c3_195, %c0_196, %c0_197], %215 {strides = array<i32>} : memref<1x4x4x8xbf16, #tpu.memory_space<vmem>>, vector<1x1x4x8xbf16>,
    return
  }
  func.func @transform_0(%arg0: i32) -> (i32, i32, i32, i32) {
    %c0_i32 = arith.constant 0 : i32
    %c0_i32_0 = arith.constant 0 : i32
    %c0_i32_1 = arith.constant 0 : i32
    %c0_i32_2 = arith.constant 0 : i32
    return %arg0, %c0_i32, %c0_i32_0, %c0_i32_1 : i32, i32, i32, i32
  }
  func.func @transform_1(%arg0: i32) -> (i32, i32, i32) {
    %c0_i32 = arith.constant 0 : i32
    %c0_i32_0 = arith.constant 0 : i32
    %c0_i32_1 = arith.constant 0 : i32
    %c0_i32_2 = arith.constant 0 : i32
    return %c0_i32, %c0_i32_0, %c0_i32_1 : i32, i32, i32
  }
  func.func @transform_2(%arg0: i32) -> (i32, i32, i32, i32) {
    %c0_i32 = arith.constant 0 : i32
    %c0_i32_0 = arith.constant 0 : i32
    %c0_i32_1 = arith.constant 0 : i32
    %c0_i32_2 = arith.constant 0 : i32
    return %arg0, %c0_i32, %c0_i32_0, %c0_i32_1 : i32, i32, i32, i32
  }
}

module attributes {stable_mosaic.version = 11 : i64} {
  func.func @kernel(%arg0: i32, %arg1: i32, %arg2: memref<16x16xbf16, #tpu.memory_space<vmem>>, %arg3: memref<16x16xbf16, #tpu.memory_space<vmem>>, %arg4: memref<1x16xf32, #tpu.memory_space<vmem>>, %arg5: memref<1x16xf32, #tpu.memory_space<vmem>>, %arg6: memref<16x8xbf16, #tpu.memory_space<vmem>>, %arg7: memref<8x16xbf16, #tpu.memory_space<vmem>>, %arg8: memref<1x8xf32, #tpu.memory_space<vmem>>, %arg9: memref<1x8xf32, #tpu.memory_space<vmem>>, %arg10: memref<1x16xf32, #tpu.memory_space<vmem>>, %arg11: memref<1x16xf32, #tpu.memory_space<vmem>>, %arg12: memref<16x16xbf16, #tpu.memory_space<vmem>>) attributes {dimension_semantics = [#tpu.dimension_semantics<parallel>, #tpu.dimension_semantics<parallel>], iteration_bounds = array<i64: 2, 1>, scalar_prefetch = 0 : i64, scratch_operands = 0 : i64, tpu.core_type = #tpu.core_type<tc>, window_params = [{transform_indices = @transform_0, window_bounds = array<i64: 16, 16>}, {transform_indices = @transform_1, window_bounds = array<i64: 16, 16>}, {pipeline_mode = #tpu.pipeline_mode<synchronous>, transform_indices = @transform_2, window_bounds = array<i64: 1, 16>}, {pipeline_mode = #tpu.pipeline_mode<synchronous>, transform_indices = @transform_3, window_bounds = array<i64: 1, 16>}, {transform_indices = @transform_4, window_bounds = array<i64: 16, 8>}, {transform_indices = @transform_5, window_bounds = array<i64: 8, 16>}, {pipeline_mode = #tpu.pipeline_mode<synchronous>, transform_indices = @transform_6, window_bounds = array<i64: 1, 8>}, {pipeline_mode = #tpu.pipeline_mode<synchronous>, transform_indices = @transform_7, window_bounds = array<i64: 1, 8>}, {transform_indices = @transform_8, window_bounds = array<i64: 1, 16>}, {transform_indices = @transform_9, window_bounds = array<i64: 1, 16>}, {transform_indices = @transform_10, window_bounds = array<i64: 16, 16>}]} {
    %c0 = arith.constant 0 : index
    %c0_0 = arith.constant 0 : index
    %0 = vector.load %arg2[%c0, %c0_0] : memref<16x16xbf16, #tpu.memory_space<vmem>>, vector<16x16xbf16>
    %1 = arith.extf %0 : vector<16x16xbf16> to vector<16x16xf32>
    %c0_1 = arith.constant 0 : index
    %c0_2 = arith.constant 0 : index
    %2 = vector.load %arg4[%c0_1, %c0_2] : memref<1x16xf32, #tpu.memory_space<vmem>>, vector<1x16xf32>
    %3 = vector.broadcast %2 : vector<1x16xf32> to vector<16x16xf32>
    %4 = arith.mulf %1, %3 : vector<16x16xf32>
    %c0_3 = arith.constant 0 : index
    %c0_4 = arith.constant 0 : index
    %5 = vector.load %arg5[%c0_3, %c0_4] : memref<1x16xf32, #tpu.memory_space<vmem>>, vector<1x16xf32>
    %6 = vector.broadcast %5 : vector<1x16xf32> to vector<16x16xf32>
    %7 = arith.addf %4, %6 : vector<16x16xf32>
    %cst = arith.constant 0.000000e+00 : f32
    %8 = vector.broadcast %cst : f32 to vector<16x16xf32>
    %9 = arith.maximumf %7, %8 : vector<16x16xf32>
    %10 = arith.truncf %9 : vector<16x16xf32> to vector<16x16xbf16>
    %c0_5 = arith.constant 0 : index
    %c0_6 = arith.constant 0 : index
    %11 = vector.load %arg3[%c0_5, %c0_6] : memref<16x16xbf16, #tpu.memory_space<vmem>>, vector<16x16xbf16>
    %cst_7 = arith.constant dense<0.000000e+00> : vector<16x16xf32>
    %12 = tpu.matmul %10, %11, %cst_7 {dimension_numbers = #tpu.dot_dimension_numbers<[1], [0], [0], [1], [0, 0, 1, 1], [], []>} : vector<16x16xbf16>, vector<16x16xbf16>, vector<16x16xf32> -> vector<16x16xf32>
    %c0_8 = arith.constant 0 : index
    %c0_9 = arith.constant 0 : index
    %13 = vector.load %arg6[%c0_8, %c0_9] : memref<16x8xbf16, #tpu.memory_space<vmem>>, vector<16x8xbf16>
    %14 = arith.extf %13 : vector<16x8xbf16> to vector<16x8xf32>
    %c0_10 = arith.constant 0 : index
    %c0_11 = arith.constant 0 : index
    %15 = vector.load %arg8[%c0_10, %c0_11] : memref<1x8xf32, #tpu.memory_space<vmem>>, vector<1x8xf32>
    %16 = vector.broadcast %15 : vector<1x8xf32> to vector<16x8xf32>
    %17 = arith.mulf %14, %16 : vector<16x8xf32>
    %c0_12 = arith.constant 0 : index
    %c0_13 = arith.constant 0 : index
    %18 = vector.load %arg9[%c0_12, %c0_13] : memref<1x8xf32, #tpu.memory_space<vmem>>, vector<1x8xf32>
    %19 = vector.broadcast %18 : vector<1x8xf32> to vector<16x8xf32>
    %20 = arith.addf %17, %19 : vector<16x8xf32>
    %cst_14 = arith.constant 0.000000e+00 : f32
    %21 = vector.broadcast %cst_14 : f32 to vector<16x8xf32>
    %22 = arith.maximumf %20, %21 : vector<16x8xf32>
    %23 = arith.truncf %22 : vector<16x8xf32> to vector<16x8xbf16>
    %c0_15 = arith.constant 0 : index
    %c0_16 = arith.constant 0 : index
    %24 = vector.load %arg7[%c0_15, %c0_16] : memref<8x16xbf16, #tpu.memory_space<vmem>>, vector<8x16xbf16>
    %cst_17 = arith.constant dense<0.000000e+00> : vector<16x16xf32>
    %25 = tpu.matmul %23, %24, %cst_17 {dimension_numbers = #tpu.dot_dimension_numbers<[1], [0], [0], [1], [0, 0, 1, 1], [], []>} : vector<16x8xbf16>, vector<8x16xbf16>, vector<16x16xf32> -> vector<16x16xf32>
    %26 = arith.addf %12, %25 : vector<16x16xf32>
    %c0_18 = arith.constant 0 : index
    %c0_19 = arith.constant 0 : index
    %27 = vector.load %arg10[%c0_18, %c0_19] : memref<1x16xf32, #tpu.memory_space<vmem>>, vector<1x16xf32>
    %28 = vector.broadcast %27 : vector<1x16xf32> to vector<16x16xf32>
    %29 = arith.mulf %26, %28 : vector<16x16xf32>
    %c0_20 = arith.constant 0 : index
    %c0_21 = arith.constant 0 : index
    %30 = vector.load %arg11[%c0_20, %c0_21] : memref<1x16xf32, #tpu.memory_space<vmem>>, vector<1x16xf32>
    %31 = vector.broadcast %30 : vector<1x16xf32> to vector<16x16xf32>
    %32 = arith.addf %29, %31 : vector<16x16xf32>
    %cst_22 = arith.constant 0.000000e+00 : f32
    %33 = vector.broadcast %cst_22 : f32 to vector<16x16xf32>
    %34 = arith.maximumf %32, %33 : vector<16x16xf32>
    %35 = arith.truncf %34 : vector<16x16xf32> to vector<16x16xbf16>
    %c0_23 = arith.constant 0 : index
    %c0_24 = arith.constant 0 : index
    %36 = vector.load %arg12[%c0_23, %c0_24] : memref<16x16xbf16, #tpu.memory_space<vmem>>, vector<16x16xbf16>
    tpu.vector_store %arg12[%c0_23, %c0_24], %35 {strides = array<i32>} : memref<16x16xbf16, #tpu.memory_space<vmem>>, vector<16x16xbf16>,
    return
  }
  func.func @transform_0(%arg0: i32, %arg1: i32) -> (i32, i32) {
    %c0_i32 = arith.constant 0 : i32
    %c0_i32_0 = arith.constant 0 : i32
    return %arg0, %c0_i32 : i32, i32
  }
  func.func @transform_1(%arg0: i32, %arg1: i32) -> (i32, i32) {
    %c0_i32 = arith.constant 0 : i32
    %c0_i32_0 = arith.constant 0 : i32
    return %c0_i32, %arg1 : i32, i32
  }
  func.func @transform_2(%arg0: i32, %arg1: i32) -> (i32, i32) {
    %c0_i32 = arith.constant 0 : i32
    %c0_i32_0 = arith.constant 0 : i32
    %c0_i32_1 = arith.constant 0 : i32
    return %c0_i32, %c0_i32_0 : i32, i32
  }
  func.func @transform_3(%arg0: i32, %arg1: i32) -> (i32, i32) {
    %c0_i32 = arith.constant 0 : i32
    %c0_i32_0 = arith.constant 0 : i32
    %c0_i32_1 = arith.constant 0 : i32
    return %c0_i32, %c0_i32_0 : i32, i32
  }
  func.func @transform_4(%arg0: i32, %arg1: i32) -> (i32, i32) {
    %c0_i32 = arith.constant 0 : i32
    %c0_i32_0 = arith.constant 0 : i32
    return %arg0, %c0_i32 : i32, i32
  }
  func.func @transform_5(%arg0: i32, %arg1: i32) -> (i32, i32) {
    %c0_i32 = arith.constant 0 : i32
    %c0_i32_0 = arith.constant 0 : i32
    return %c0_i32, %arg1 : i32, i32
  }
  func.func @transform_6(%arg0: i32, %arg1: i32) -> (i32, i32) {
    %c0_i32 = arith.constant 0 : i32
    %c0_i32_0 = arith.constant 0 : i32
    %c0_i32_1 = arith.constant 0 : i32
    return %c0_i32, %c0_i32_0 : i32, i32
  }
  func.func @transform_7(%arg0: i32, %arg1: i32) -> (i32, i32) {
    %c0_i32 = arith.constant 0 : i32
    %c0_i32_0 = arith.constant 0 : i32
    %c0_i32_1 = arith.constant 0 : i32
    return %c0_i32, %c0_i32_0 : i32, i32
  }
  func.func @transform_8(%arg0: i32, %arg1: i32) -> (i32, i32) {
    %c0_i32 = arith.constant 0 : i32
    %c0_i32_0 = arith.constant 0 : i32
    return %c0_i32, %arg1 : i32, i32
  }
  func.func @transform_9(%arg0: i32, %arg1: i32) -> (i32, i32) {
    %c0_i32 = arith.constant 0 : i32
    %c0_i32_0 = arith.constant 0 : i32
    return %c0_i32, %arg1 : i32, i32
  }
  func.func @transform_10(%arg0: i32, %arg1: i32) -> (i32, i32) {
    %c0_i32 = arith.constant 0 : i32
    return %arg0, %arg1 : i32, i32
  }
}

module attributes {stable_mosaic.version = 11 : i64} {
  func.func @kernel(%arg0: i32, %arg1: i32, %arg2: memref<8x16xbf16, #tpu.memory_space<vmem>>, %arg3: memref<16x16xbf16, #tpu.memory_space<vmem>>, %arg4: memref<1x16xf32, #tpu.memory_space<vmem>>, %arg5: memref<1x16xf32, #tpu.memory_space<vmem>>, %arg6: memref<1x16xf32, #tpu.memory_space<vmem>>, %arg7: memref<1x16xf32, #tpu.memory_space<vmem>>, %arg8: memref<8x16xbf16, #tpu.memory_space<vmem>>) attributes {dimension_semantics = [#tpu.dimension_semantics<parallel>, #tpu.dimension_semantics<parallel>], iteration_bounds = array<i64: 1, 1>, scalar_prefetch = 0 : i64, scratch_operands = 0 : i64, tpu.core_type = #tpu.core_type<tc>, window_params = [{transform_indices = @transform_0, window_bounds = array<i64: 8, 16>}, {transform_indices = @transform_1, window_bounds = array<i64: 16, 16>}, {pipeline_mode = #tpu.pipeline_mode<synchronous>, transform_indices = @transform_2, window_bounds = array<i64: 1, 16>}, {pipeline_mode = #tpu.pipeline_mode<synchronous>, transform_indices = @transform_3, window_bounds = array<i64: 1, 16>}, {transform_indices = @transform_4, window_bounds = array<i64: 1, 16>}, {transform_indices = @transform_5, window_bounds = array<i64: 1, 16>}, {transform_indices = @transform_6, window_bounds = array<i64: 8, 16>}]} {
    %c0 = arith.constant 0 : index
    %c0_0 = arith.constant 0 : index
    %0 = vector.load %arg2[%c0, %c0_0] : memref<8x16xbf16, #tpu.memory_space<vmem>>, vector<8x16xbf16>
    %1 = arith.extf %0 : vector<8x16xbf16> to vector<8x16xf32>
    %c0_1 = arith.constant 0 : index
    %c0_2 = arith.constant 0 : index
    %2 = vector.load %arg4[%c0_1, %c0_2] : memref<1x16xf32, #tpu.memory_space<vmem>>, vector<1x16xf32>
    %3 = vector.broadcast %2 : vector<1x16xf32> to vector<8x16xf32>
    %4 = arith.mulf %1, %3 : vector<8x16xf32>
    %c0_3 = arith.constant 0 : index
    %c0_4 = arith.constant 0 : index
    %5 = vector.load %arg5[%c0_3, %c0_4] : memref<1x16xf32, #tpu.memory_space<vmem>>, vector<1x16xf32>
    %6 = vector.broadcast %5 : vector<1x16xf32> to vector<8x16xf32>
    %7 = arith.addf %4, %6 : vector<8x16xf32>
    %cst = arith.constant 0.000000e+00 : f32
    %8 = vector.broadcast %cst : f32 to vector<8x16xf32>
    %9 = arith.maximumf %7, %8 : vector<8x16xf32>
    %10 = arith.truncf %9 : vector<8x16xf32> to vector<8x16xbf16>
    %c0_5 = arith.constant 0 : index
    %c0_6 = arith.constant 0 : index
    %11 = vector.load %arg3[%c0_5, %c0_6] : memref<16x16xbf16, #tpu.memory_space<vmem>>, vector<16x16xbf16>
    %cst_7 = arith.constant dense<0.000000e+00> : vector<8x16xf32>
    %12 = tpu.matmul %10, %11, %cst_7 {dimension_numbers = #tpu.dot_dimension_numbers<[1], [0], [0], [1], [0, 0, 1, 1], [], []>} : vector<8x16xbf16>, vector<16x16xbf16>, vector<8x16xf32> -> vector<8x16xf32>
    %c0_8 = arith.constant 0 : index
    %c0_9 = arith.constant 0 : index
    %13 = vector.load %arg6[%c0_8, %c0_9] : memref<1x16xf32, #tpu.memory_space<vmem>>, vector<1x16xf32>
    %14 = vector.broadcast %13 : vector<1x16xf32> to vector<8x16xf32>
    %15 = arith.mulf %12, %14 : vector<8x16xf32>
    %c0_10 = arith.constant 0 : index
    %c0_11 = arith.constant 0 : index
    %16 = vector.load %arg7[%c0_10, %c0_11] : memref<1x16xf32, #tpu.memory_space<vmem>>, vector<1x16xf32>
    %17 = vector.broadcast %16 : vector<1x16xf32> to vector<8x16xf32>
    %18 = arith.addf %15, %17 : vector<8x16xf32>
    %cst_12 = arith.constant 0.000000e+00 : f32
    %19 = vector.broadcast %cst_12 : f32 to vector<8x16xf32>
    %20 = arith.maximumf %18, %19 : vector<8x16xf32>
    %21 = arith.truncf %20 : vector<8x16xf32> to vector<8x16xbf16>
    %c0_13 = arith.constant 0 : index
    %c0_14 = arith.constant 0 : index
    %22 = vector.load %arg8[%c0_13, %c0_14] : memref<8x16xbf16, #tpu.memory_space<vmem>>, vector<8x16xbf16>
    tpu.vector_store %arg8[%c0_13, %c0_14], %21 {strides = array<i32>} : memref<8x16xbf16, #tpu.memory_space<vmem>>, vector<8x16xbf16>,
    return
  }
  func.func @transform_0(%arg0: i32, %arg1: i32) -> (i32, i32) {
    %c0_i32 = arith.constant 0 : i32
    %c0_i32_0 = arith.constant 0 : i32
    return %arg0, %c0_i32 : i32, i32
  }
  func.func @transform_1(%arg0: i32, %arg1: i32) -> (i32, i32) {
    %c0_i32 = arith.constant 0 : i32
    %c0_i32_0 = arith.constant 0 : i32
    return %c0_i32, %arg1 : i32, i32
  }
  func.func @transform_2(%arg0: i32, %arg1: i32) -> (i32, i32) {
    %c0_i32 = arith.constant 0 : i32
    %c0_i32_0 = arith.constant 0 : i32
    %c0_i32_1 = arith.constant 0 : i32
    return %c0_i32, %c0_i32_0 : i32, i32
  }
  func.func @transform_3(%arg0: i32, %arg1: i32) -> (i32, i32) {
    %c0_i32 = arith.constant 0 : i32
    %c0_i32_0 = arith.constant 0 : i32
    %c0_i32_1 = arith.constant 0 : i32
    return %c0_i32, %c0_i32_0 : i32, i32
  }
  func.func @transform_4(%arg0: i32, %arg1: i32) -> (i32, i32) {
    %c0_i32 = arith.constant 0 : i32
    %c0_i32_0 = arith.constant 0 : i32
    return %c0_i32, %arg1 : i32, i32
  }
  func.func @transform_5(%arg0: i32, %arg1: i32) -> (i32, i32) {
    %c0_i32 = arith.constant 0 : i32
    %c0_i32_0 = arith.constant 0 : i32
    return %c0_i32, %arg1 : i32, i32
  }
  func.func @transform_6(%arg0: i32, %arg1: i32) -> (i32, i32) {
    %c0_i32 = arith.constant 0 : i32
    return %arg0, %arg1 : i32, i32
  }
}

module attributes {stable_mosaic.version = 11 : i64} {
  func.func @kernel(%arg0: i32, %arg1: memref<1x4x2x32xbf16, #tpu.memory_space<vmem>>, %arg2: memref<1x16xf32, #tpu.memory_space<vmem>>, %arg3: memref<1x16xf32, #tpu.memory_space<vmem>>, %arg4: memref<16x16xbf16, #tpu.memory_space<vmem>>, %arg5: memref<1x4x2x16xbf16, #tpu.memory_space<vmem>>, %arg6: memref<1x8xf32, #tpu.memory_space<vmem>>, %arg7: memref<1x8xf32, #tpu.memory_space<vmem>>, %arg8: memref<8x16xbf16, #tpu.memory_space<vmem>>, %arg9: memref<1x4x2x16xbf16, #tpu.memory_space<vmem>>, %arg10: memref<1x8xf32, #tpu.memory_space<vmem>>, %arg11: memref<1x8xf32, #tpu.memory_space<vmem>>, %arg12: memref<8x16xbf16, #tpu.memory_space<vmem>>, %arg13: memref<1x2x2x16xbf16, #tpu.memory_space<vmem>>) attributes {dimension_semantics = [#tpu.dimension_semantics<parallel>], iteration_bounds = array<i64: 2>, scalar_prefetch = 0 : i64, scratch_operands = 0 : i64, tpu.core_type = #tpu.core_type<tc>, window_params = [{transform_indices = @transform_0, window_bounds = array<i64: 1, 4, 2, 32>}, {pipeline_mode = #tpu.pipeline_mode<synchronous>, transform_indices = @transform_1, window_bounds = array<i64: 1, 16>}, {pipeline_mode = #tpu.pipeline_mode<synchronous>, transform_indices = @transform_2, window_bounds = array<i64: 1, 16>}, {pipeline_mode = #tpu.pipeline_mode<synchronous>, transform_indices = @transform_3, window_bounds = array<i64: 16, 16>}, {transform_indices = @transform_4, window_bounds = array<i64: 1, 4, 2, 16>}, {pipeline_mode = #tpu.pipeline_mode<synchronous>, transform_indices = @transform_5, window_bounds = array<i64: 1, 8>}, {pipeline_mode = #tpu.pipeline_mode<synchronous>, transform_indices = @transform_6, window_bounds = array<i64: 1, 8>}, {pipeline_mode = #tpu.pipeline_mode<synchronous>, transform_indices = @transform_7, window_bounds = array<i64: 8, 16>}, {transform_indices = @transform_8, window_bounds = array<i64: 1, 4, 2, 16>}, {pipeline_mode = #tpu.pipeline_mode<synchronous>, transform_indices = @transform_9, window_bounds = array<i64: 1, 8>}, {pipeline_mode = #tpu.pipeline_mode<synchronous>, transform_indices = @transform_10, window_bounds = array<i64: 1, 8>}, {pipeline_mode = #tpu.pipeline_mode<synchronous>, transform_indices = @transform_11, window_bounds = array<i64: 8, 16>}, {transform_indices = @transform_12, window_bounds = array<i64: 1, 2, 2, 16>}]} {
    %c0 = arith.constant 0 : index
    %c0_0 = arith.constant 0 : index
    %c0_1 = arith.constant 0 : index
    %c0_2 = arith.constant 0 : index
    %0 = vector.load %arg1[%c0, %c0_0, %c0_1, %c0_2] : memref<1x4x2x32xbf16, #tpu.memory_space<vmem>>, vector<1x1x2x32xbf16>
    %1 = vector.shape_cast %0 : vector<1x1x2x32xbf16> to vector<2x32xbf16>
    %2 = arith.extf %1 : vector<2x32xbf16> to vector<2x32xf32>
    %3 = vector.extract_strided_slice %2 {offsets = [0, 0], sizes = [2, 16], strides = [1, 1]} : vector<2x32xf32> to vector<2x16xf32>
    %c0_3 = arith.constant 0 : index
    %c0_4 = arith.constant 0 : index
    %4 = vector.load %arg2[%c0_3, %c0_4] : memref<1x16xf32, #tpu.memory_space<vmem>>, vector<1x16xf32>
    %5 = vector.broadcast %4 : vector<1x16xf32> to vector<2x16xf32>
    %6 = arith.mulf %3, %5 : vector<2x16xf32>
    %c0_5 = arith.constant 0 : index
    %c0_6 = arith.constant 0 : index
    %7 = vector.load %arg3[%c0_5, %c0_6] : memref<1x16xf32, #tpu.memory_space<vmem>>, vector<1x16xf32>
    %8 = vector.broadcast %7 : vector<1x16xf32> to vector<2x16xf32>
    %9 = arith.addf %6, %8 : vector<2x16xf32>
    %cst = arith.constant 0.000000e+00 : f32
    %10 = vector.broadcast %cst : f32 to vector<2x16xf32>
    %11 = arith.maximumf %9, %10 : vector<2x16xf32>
    %12 = vector.extract_strided_slice %2 {offsets = [0, 16], sizes = [2, 16], strides = [1, 1]} : vector<2x32xf32> to vector<2x16xf32>
    %c0_7 = arith.constant 0 : index
    %c0_8 = arith.constant 0 : index
    %13 = vector.load %arg2[%c0_7, %c0_8] : memref<1x16xf32, #tpu.memory_space<vmem>>, vector<1x16xf32>
    %14 = vector.broadcast %13 : vector<1x16xf32> to vector<2x16xf32>
    %15 = arith.mulf %12, %14 : vector<2x16xf32>
    %c0_9 = arith.constant 0 : index
    %c0_10 = arith.constant 0 : index
    %16 = vector.load %arg3[%c0_9, %c0_10] : memref<1x16xf32, #tpu.memory_space<vmem>>, vector<1x16xf32>
    %17 = vector.broadcast %16 : vector<1x16xf32> to vector<2x16xf32>
    %18 = arith.addf %15, %17 : vector<2x16xf32>
    %cst_11 = arith.constant 0.000000e+00 : f32
    %19 = vector.broadcast %cst_11 : f32 to vector<2x16xf32>
    %20 = arith.maximumf %18, %19 : vector<2x16xf32>
    %21 = arith.addf %11, %20 : vector<2x16xf32>
    %c0_12 = arith.constant 0 : index
    %c1 = arith.constant 1 : index
    %c0_13 = arith.constant 0 : index
    %c0_14 = arith.constant 0 : index
    %22 = vector.load %arg1[%c0_12, %c1, %c0_13, %c0_14] : memref<1x4x2x32xbf16, #tpu.memory_space<vmem>>, vector<1x1x2x32xbf16>
    %23 = vector.shape_cast %22 : vector<1x1x2x32xbf16> to vector<2x32xbf16>
    %24 = arith.extf %23 : vector<2x32xbf16> to vector<2x32xf32>
    %25 = vector.extract_strided_slice %24 {offsets = [0, 0], sizes = [2, 16], strides = [1, 1]} : vector<2x32xf32> to vector<2x16xf32>
    %c0_15 = arith.constant 0 : index
    %c0_16 = arith.constant 0 : index
    %26 = vector.load %arg2[%c0_15, %c0_16] : memref<1x16xf32, #tpu.memory_space<vmem>>, vector<1x16xf32>
    %27 = vector.broadcast %26 : vector<1x16xf32> to vector<2x16xf32>
    %28 = arith.mulf %25, %27 : vector<2x16xf32>
    %c0_17 = arith.constant 0 : index
    %c0_18 = arith.constant 0 : index
    %29 = vector.load %arg3[%c0_17, %c0_18] : memref<1x16xf32, #tpu.memory_space<vmem>>, vector<1x16xf32>
    %30 = vector.broadcast %29 : vector<1x16xf32> to vector<2x16xf32>
    %31 = arith.addf %28, %30 : vector<2x16xf32>
    %cst_19 = arith.constant 0.000000e+00 : f32
    %32 = vector.broadcast %cst_19 : f32 to vector<2x16xf32>
    %33 = arith.maximumf %31, %32 : vector<2x16xf32>
    %34 = arith.addf %21, %33 : vector<2x16xf32>
    %35 = vector.extract_strided_slice %24 {offsets = [0, 16], sizes = [2, 16], strides = [1, 1]} : vector<2x32xf32> to vector<2x16xf32>
    %c0_20 = arith.constant 0 : index
    %c0_21 = arith.constant 0 : index
    %36 = vector.load %arg2[%c0_20, %c0_21] : memref<1x16xf32, #tpu.memory_space<vmem>>, vector<1x16xf32>
    %37 = vector.broadcast %36 : vector<1x16xf32> to vector<2x16xf32>
    %38 = arith.mulf %35, %37 : vector<2x16xf32>
    %c0_22 = arith.constant 0 : index
    %c0_23 = arith.constant 0 : index
    %39 = vector.load %arg3[%c0_22, %c0_23] : memref<1x16xf32, #tpu.memory_space<vmem>>, vector<1x16xf32>
    %40 = vector.broadcast %39 : vector<1x16xf32> to vector<2x16xf32>
    %41 = arith.addf %38, %40 : vector<2x16xf32>
    %cst_24 = arith.constant 0.000000e+00 : f32
    %42 = vector.broadcast %cst_24 : f32 to vector<2x16xf32>
    %43 = arith.maximumf %41, %42 : vector<2x16xf32>
    %44 = arith.addf %34, %43 : vector<2x16xf32>
    %cst_25 = arith.constant 2.500000e-01 : f32
    %45 = vector.broadcast %cst_25 : f32 to vector<2x16xf32>
    %46 = arith.mulf %44, %45 : vector<2x16xf32>
    %47 = arith.truncf %46 : vector<2x16xf32> to vector<2x16xbf16>
    %c0_26 = arith.constant 0 : index
    %c0_27 = arith.constant 0 : index
    %48 = vector.load %arg4[%c0_26, %c0_27] : memref<16x16xbf16, #tpu.memory_space<vmem>>, vector<16x16xbf16>
    %cst_28 = arith.constant dense<0.000000e+00> : vector<2x16xf32>
    %49 = tpu.matmul %47, %48, %cst_28 {dimension_numbers = #tpu.dot_dimension_numbers<[1], [0], [0], [1], [0, 0, 1, 1], [], []>} : vector<2x16xbf16>, vector<16x16xbf16>, vector<2x16xf32> -> vector<2x16xf32>
    %c0_29 = arith.constant 0 : index
    %c0_30 = arith.constant 0 : index
    %c0_31 = arith.constant 0 : index
    %c0_32 = arith.constant 0 : index
    %50 = vector.load %arg5[%c0_29, %c0_30, %c0_31, %c0_32] : memref<1x4x2x16xbf16, #tpu.memory_space<vmem>>, vector<1x1x2x16xbf16>
    %51 = vector.shape_cast %50 : vector<1x1x2x16xbf16> to vector<2x16xbf16>
    %52 = arith.extf %51 : vector<2x16xbf16> to vector<2x16xf32>
    %53 = vector.extract_strided_slice %52 {offsets = [0, 0], sizes = [2, 8], strides = [1, 1]} : vector<2x16xf32> to vector<2x8xf32>
    %c0_33 = arith.constant 0 : index
    %c0_34 = arith.constant 0 : index
    %54 = vector.load %arg6[%c0_33, %c0_34] : memref<1x8xf32, #tpu.memory_space<vmem>>, vector<1x8xf32>
    %55 = vector.broadcast %54 : vector<1x8xf32> to vector<2x8xf32>
    %56 = arith.mulf %53, %55 : vector<2x8xf32>
    %c0_35 = arith.constant 0 : index
    %c0_36 = arith.constant 0 : index
    %57 = vector.load %arg7[%c0_35, %c0_36] : memref<1x8xf32, #tpu.memory_space<vmem>>, vector<1x8xf32>
    %58 = vector.broadcast %57 : vector<1x8xf32> to vector<2x8xf32>
    %59 = arith.addf %56, %58 : vector<2x8xf32>
    %cst_37 = arith.constant 0.000000e+00 : f32
    %60 = vector.broadcast %cst_37 : f32 to vector<2x8xf32>
    %61 = arith.maximumf %59, %60 : vector<2x8xf32>
    %62 = vector.extract_strided_slice %52 {offsets = [0, 8], sizes = [2, 8], strides = [1, 1]} : vector<2x16xf32> to vector<2x8xf32>
    %c0_38 = arith.constant 0 : index
    %c0_39 = arith.constant 0 : index
    %63 = vector.load %arg6[%c0_38, %c0_39] : memref<1x8xf32, #tpu.memory_space<vmem>>, vector<1x8xf32>
    %64 = vector.broadcast %63 : vector<1x8xf32> to vector<2x8xf32>
    %65 = arith.mulf %62, %64 : vector<2x8xf32>
    %c0_40 = arith.constant 0 : index
    %c0_41 = arith.constant 0 : index
    %66 = vector.load %arg7[%c0_40, %c0_41] : memref<1x8xf32, #tpu.memory_space<vmem>>, vector<1x8xf32>
    %67 = vector.broadcast %66 : vector<1x8xf32> to vector<2x8xf32>
    %68 = arith.addf %65, %67 : vector<2x8xf32>
    %cst_42 = arith.constant 0.000000e+00 : f32
    %69 = vector.broadcast %cst_42 : f32 to vector<2x8xf32>
    %70 = arith.maximumf %68, %69 : vector<2x8xf32>
    %71 = arith.addf %61, %70 : vector<2x8xf32>
    %c0_43 = arith.constant 0 : index
    %c1_44 = arith.constant 1 : index
    %c0_45 = arith.constant 0 : index
    %c0_46 = arith.constant 0 : index
    %72 = vector.load %arg5[%c0_43, %c1_44, %c0_45, %c0_46] : memref<1x4x2x16xbf16, #tpu.memory_space<vmem>>, vector<1x1x2x16xbf16>
    %73 = vector.shape_cast %72 : vector<1x1x2x16xbf16> to vector<2x16xbf16>
    %74 = arith.extf %73 : vector<2x16xbf16> to vector<2x16xf32>
    %75 = vector.extract_strided_slice %74 {offsets = [0, 0], sizes = [2, 8], strides = [1, 1]} : vector<2x16xf32> to vector<2x8xf32>
    %c0_47 = arith.constant 0 : index
    %c0_48 = arith.constant 0 : index
    %76 = vector.load %arg6[%c0_47, %c0_48] : memref<1x8xf32, #tpu.memory_space<vmem>>, vector<1x8xf32>
    %77 = vector.broadcast %76 : vector<1x8xf32> to vector<2x8xf32>
    %78 = arith.mulf %75, %77 : vector<2x8xf32>
    %c0_49 = arith.constant 0 : index
    %c0_50 = arith.constant 0 : index
    %79 = vector.load %arg7[%c0_49, %c0_50] : memref<1x8xf32, #tpu.memory_space<vmem>>, vector<1x8xf32>
    %80 = vector.broadcast %79 : vector<1x8xf32> to vector<2x8xf32>
    %81 = arith.addf %78, %80 : vector<2x8xf32>
    %cst_51 = arith.constant 0.000000e+00 : f32
    %82 = vector.broadcast %cst_51 : f32 to vector<2x8xf32>
    %83 = arith.maximumf %81, %82 : vector<2x8xf32>
    %84 = arith.addf %71, %83 : vector<2x8xf32>
    %85 = vector.extract_strided_slice %74 {offsets = [0, 8], sizes = [2, 8], strides = [1, 1]} : vector<2x16xf32> to vector<2x8xf32>
    %c0_52 = arith.constant 0 : index
    %c0_53 = arith.constant 0 : index
    %86 = vector.load %arg6[%c0_52, %c0_53] : memref<1x8xf32, #tpu.memory_space<vmem>>, vector<1x8xf32>
    %87 = vector.broadcast %86 : vector<1x8xf32> to vector<2x8xf32>
    %88 = arith.mulf %85, %87 : vector<2x8xf32>
    %c0_54 = arith.constant 0 : index
    %c0_55 = arith.constant 0 : index
    %89 = vector.load %arg7[%c0_54, %c0_55] : memref<1x8xf32, #tpu.memory_space<vmem>>, vector<1x8xf32>
    %90 = vector.broadcast %89 : vector<1x8xf32> to vector<2x8xf32>
    %91 = arith.addf %88, %90 : vector<2x8xf32>
    %cst_56 = arith.constant 0.000000e+00 : f32
    %92 = vector.broadcast %cst_56 : f32 to vector<2x8xf32>
    %93 = arith.maximumf %91, %92 : vector<2x8xf32>
    %94 = arith.addf %84, %93 : vector<2x8xf32>
    %cst_57 = arith.constant 2.500000e-01 : f32
    %95 = vector.broadcast %cst_57 : f32 to vector<2x8xf32>
    %96 = arith.mulf %94, %95 : vector<2x8xf32>
    %97 = arith.truncf %96 : vector<2x8xf32> to vector<2x8xbf16>
    %c0_58 = arith.constant 0 : index
    %c0_59 = arith.constant 0 : index
    %98 = vector.load %arg8[%c0_58, %c0_59] : memref<8x16xbf16, #tpu.memory_space<vmem>>, vector<8x16xbf16>
    %cst_60 = arith.constant dense<0.000000e+00> : vector<2x16xf32>
    %99 = tpu.matmul %97, %98, %cst_60 {dimension_numbers = #tpu.dot_dimension_numbers<[1], [0], [0], [1], [0, 0, 1, 1], [], []>} : vector<2x8xbf16>, vector<8x16xbf16>, vector<2x16xf32> -> vector<2x16xf32>
    %100 = arith.addf %49, %99 : vector<2x16xf32>
    %c0_61 = arith.constant 0 : index
    %c0_62 = arith.constant 0 : index
    %c0_63 = arith.constant 0 : index
    %c0_64 = arith.constant 0 : index
    %101 = vector.load %arg9[%c0_61, %c0_62, %c0_63, %c0_64] : memref<1x4x2x16xbf16, #tpu.memory_space<vmem>>, vector<1x1x2x16xbf16>
    %102 = vector.shape_cast %101 : vector<1x1x2x16xbf16> to vector<2x16xbf16>
    %103 = arith.extf %102 : vector<2x16xbf16> to vector<2x16xf32>
    %104 = vector.extract_strided_slice %103 {offsets = [0, 0], sizes = [2, 8], strides = [1, 1]} : vector<2x16xf32> to vector<2x8xf32>
    %c0_65 = arith.constant 0 : index
    %c0_66 = arith.constant 0 : index
    %105 = vector.load %arg10[%c0_65, %c0_66] : memref<1x8xf32, #tpu.memory_space<vmem>>, vector<1x8xf32>
    %106 = vector.broadcast %105 : vector<1x8xf32> to vector<2x8xf32>
    %107 = arith.mulf %104, %106 : vector<2x8xf32>
    %c0_67 = arith.constant 0 : index
    %c0_68 = arith.constant 0 : index
    %108 = vector.load %arg11[%c0_67, %c0_68] : memref<1x8xf32, #tpu.memory_space<vmem>>, vector<1x8xf32>
    %109 = vector.broadcast %108 : vector<1x8xf32> to vector<2x8xf32>
    %110 = arith.addf %107, %109 : vector<2x8xf32>
    %cst_69 = arith.constant 0.000000e+00 : f32
    %111 = vector.broadcast %cst_69 : f32 to vector<2x8xf32>
    %112 = arith.maximumf %110, %111 : vector<2x8xf32>
    %113 = vector.extract_strided_slice %103 {offsets = [0, 8], sizes = [2, 8], strides = [1, 1]} : vector<2x16xf32> to vector<2x8xf32>
    %c0_70 = arith.constant 0 : index
    %c0_71 = arith.constant 0 : index
    %114 = vector.load %arg10[%c0_70, %c0_71] : memref<1x8xf32, #tpu.memory_space<vmem>>, vector<1x8xf32>
    %115 = vector.broadcast %114 : vector<1x8xf32> to vector<2x8xf32>
    %116 = arith.mulf %113, %115 : vector<2x8xf32>
    %c0_72 = arith.constant 0 : index
    %c0_73 = arith.constant 0 : index
    %117 = vector.load %arg11[%c0_72, %c0_73] : memref<1x8xf32, #tpu.memory_space<vmem>>, vector<1x8xf32>
    %118 = vector.broadcast %117 : vector<1x8xf32> to vector<2x8xf32>
    %119 = arith.addf %116, %118 : vector<2x8xf32>
    %cst_74 = arith.constant 0.000000e+00 : f32
    %120 = vector.broadcast %cst_74 : f32 to vector<2x8xf32>
    %121 = arith.maximumf %119, %120 : vector<2x8xf32>
    %122 = arith.addf %112, %121 : vector<2x8xf32>
    %c0_75 = arith.constant 0 : index
    %c1_76 = arith.constant 1 : index
    %c0_77 = arith.constant 0 : index
    %c0_78 = arith.constant 0 : index
    %123 = vector.load %arg9[%c0_75, %c1_76, %c0_77, %c0_78] : memref<1x4x2x16xbf16, #tpu.memory_space<vmem>>, vector<1x1x2x16xbf16>
    %124 = vector.shape_cast %123 : vector<1x1x2x16xbf16> to vector<2x16xbf16>
    %125 = arith.extf %124 : vector<2x16xbf16> to vector<2x16xf32>
    %126 = vector.extract_strided_slice %125 {offsets = [0, 0], sizes = [2, 8], strides = [1, 1]} : vector<2x16xf32> to vector<2x8xf32>
    %c0_79 = arith.constant 0 : index
    %c0_80 = arith.constant 0 : index
    %127 = vector.load %arg10[%c0_79, %c0_80] : memref<1x8xf32, #tpu.memory_space<vmem>>, vector<1x8xf32>
    %128 = vector.broadcast %127 : vector<1x8xf32> to vector<2x8xf32>
    %129 = arith.mulf %126, %128 : vector<2x8xf32>
    %c0_81 = arith.constant 0 : index
    %c0_82 = arith.constant 0 : index
    %130 = vector.load %arg11[%c0_81, %c0_82] : memref<1x8xf32, #tpu.memory_space<vmem>>, vector<1x8xf32>
    %131 = vector.broadcast %130 : vector<1x8xf32> to vector<2x8xf32>
    %132 = arith.addf %129, %131 : vector<2x8xf32>
    %cst_83 = arith.constant 0.000000e+00 : f32
    %133 = vector.broadcast %cst_83 : f32 to vector<2x8xf32>
    %134 = arith.maximumf %132, %133 : vector<2x8xf32>
    %135 = arith.addf %122, %134 : vector<2x8xf32>
    %136 = vector.extract_strided_slice %125 {offsets = [0, 8], sizes = [2, 8], strides = [1, 1]} : vector<2x16xf32> to vector<2x8xf32>
    %c0_84 = arith.constant 0 : index
    %c0_85 = arith.constant 0 : index
    %137 = vector.load %arg10[%c0_84, %c0_85] : memref<1x8xf32, #tpu.memory_space<vmem>>, vector<1x8xf32>
    %138 = vector.broadcast %137 : vector<1x8xf32> to vector<2x8xf32>
    %139 = arith.mulf %136, %138 : vector<2x8xf32>
    %c0_86 = arith.constant 0 : index
    %c0_87 = arith.constant 0 : index
    %140 = vector.load %arg11[%c0_86, %c0_87] : memref<1x8xf32, #tpu.memory_space<vmem>>, vector<1x8xf32>
    %141 = vector.broadcast %140 : vector<1x8xf32> to vector<2x8xf32>
    %142 = arith.addf %139, %141 : vector<2x8xf32>
    %cst_88 = arith.constant 0.000000e+00 : f32
    %143 = vector.broadcast %cst_88 : f32 to vector<2x8xf32>
    %144 = arith.maximumf %142, %143 : vector<2x8xf32>
    %145 = arith.addf %135, %144 : vector<2x8xf32>
    %cst_89 = arith.constant 2.500000e-01 : f32
    %146 = vector.broadcast %cst_89 : f32 to vector<2x8xf32>
    %147 = arith.mulf %145, %146 : vector<2x8xf32>
    %148 = arith.truncf %147 : vector<2x8xf32> to vector<2x8xbf16>
    %c0_90 = arith.constant 0 : index
    %c0_91 = arith.constant 0 : index
    %149 = vector.load %arg12[%c0_90, %c0_91] : memref<8x16xbf16, #tpu.memory_space<vmem>>, vector<8x16xbf16>
    %cst_92 = arith.constant dense<0.000000e+00> : vector<2x16xf32>
    %150 = tpu.matmul %148, %149, %cst_92 {dimension_numbers = #tpu.dot_dimension_numbers<[1], [0], [0], [1], [0, 0, 1, 1], [], []>} : vector<2x8xbf16>, vector<8x16xbf16>, vector<2x16xf32> -> vector<2x16xf32>
    %151 = arith.addf %100, %150 : vector<2x16xf32>
    %152 = arith.truncf %151 : vector<2x16xf32> to vector<2x16xbf16>
    %c0_93 = arith.constant 0 : index
    %c0_94 = arith.constant 0 : index
    %c0_95 = arith.constant 0 : index
    %c0_96 = arith.constant 0 : index
    %153 = vector.load %arg13[%c0_93, %c0_94, %c0_95, %c0_96] : memref<1x2x2x16xbf16, #tpu.memory_space<vmem>>, vector<1x1x2x16xbf16>
    %154 = vector.shape_cast %153 : vector<1x1x2x16xbf16> to vector<2x16xbf16>
    %155 = vector.shape_cast %152 : vector<2x16xbf16> to vector<1x1x2x16xbf16>
    tpu.vector_store %arg13[%c0_93, %c0_94, %c0_95, %c0_96], %155 {strides = array<i32>} : memref<1x2x2x16xbf16, #tpu.memory_space<vmem>>, vector<1x1x2x16xbf16>,
    %c0_97 = arith.constant 0 : index
    %c2 = arith.constant 2 : index
    %c0_98 = arith.constant 0 : index
    %c0_99 = arith.constant 0 : index
    %156 = vector.load %arg1[%c0_97, %c2, %c0_98, %c0_99] : memref<1x4x2x32xbf16, #tpu.memory_space<vmem>>, vector<1x1x2x32xbf16>
    %157 = vector.shape_cast %156 : vector<1x1x2x32xbf16> to vector<2x32xbf16>
    %158 = arith.extf %157 : vector<2x32xbf16> to vector<2x32xf32>
    %159 = vector.extract_strided_slice %158 {offsets = [0, 0], sizes = [2, 16], strides = [1, 1]} : vector<2x32xf32> to vector<2x16xf32>
    %c0_100 = arith.constant 0 : index
    %c0_101 = arith.constant 0 : index
    %160 = vector.load %arg2[%c0_100, %c0_101] : memref<1x16xf32, #tpu.memory_space<vmem>>, vector<1x16xf32>
    %161 = vector.broadcast %160 : vector<1x16xf32> to vector<2x16xf32>
    %162 = arith.mulf %159, %161 : vector<2x16xf32>
    %c0_102 = arith.constant 0 : index
    %c0_103 = arith.constant 0 : index
    %163 = vector.load %arg3[%c0_102, %c0_103] : memref<1x16xf32, #tpu.memory_space<vmem>>, vector<1x16xf32>
    %164 = vector.broadcast %163 : vector<1x16xf32> to vector<2x16xf32>
    %165 = arith.addf %162, %164 : vector<2x16xf32>
    %cst_104 = arith.constant 0.000000e+00 : f32
    %166 = vector.broadcast %cst_104 : f32 to vector<2x16xf32>
    %167 = arith.maximumf %165, %166 : vector<2x16xf32>
    %168 = vector.extract_strided_slice %158 {offsets = [0, 16], sizes = [2, 16], strides = [1, 1]} : vector<2x32xf32> to vector<2x16xf32>
    %c0_105 = arith.constant 0 : index
    %c0_106 = arith.constant 0 : index
    %169 = vector.load %arg2[%c0_105, %c0_106] : memref<1x16xf32, #tpu.memory_space<vmem>>, vector<1x16xf32>
    %170 = vector.broadcast %169 : vector<1x16xf32> to vector<2x16xf32>
    %171 = arith.mulf %168, %170 : vector<2x16xf32>
    %c0_107 = arith.constant 0 : index
    %c0_108 = arith.constant 0 : index
    %172 = vector.load %arg3[%c0_107, %c0_108] : memref<1x16xf32, #tpu.memory_space<vmem>>, vector<1x16xf32>
    %173 = vector.broadcast %172 : vector<1x16xf32> to vector<2x16xf32>
    %174 = arith.addf %171, %173 : vector<2x16xf32>
    %cst_109 = arith.constant 0.000000e+00 : f32
    %175 = vector.broadcast %cst_109 : f32 to vector<2x16xf32>
    %176 = arith.maximumf %174, %175 : vector<2x16xf32>
    %177 = arith.addf %167, %176 : vector<2x16xf32>
    %c0_110 = arith.constant 0 : index
    %c3 = arith.constant 3 : index
    %c0_111 = arith.constant 0 : index
    %c0_112 = arith.constant 0 : index
    %178 = vector.load %arg1[%c0_110, %c3, %c0_111, %c0_112] : memref<1x4x2x32xbf16, #tpu.memory_space<vmem>>, vector<1x1x2x32xbf16>
    %179 = vector.shape_cast %178 : vector<1x1x2x32xbf16> to vector<2x32xbf16>
    %180 = arith.extf %179 : vector<2x32xbf16> to vector<2x32xf32>
    %181 = vector.extract_strided_slice %180 {offsets = [0, 0], sizes = [2, 16], strides = [1, 1]} : vector<2x32xf32> to vector<2x16xf32>
    %c0_113 = arith.constant 0 : index
    %c0_114 = arith.constant 0 : index
    %182 = vector.load %arg2[%c0_113, %c0_114] : memref<1x16xf32, #tpu.memory_space<vmem>>, vector<1x16xf32>
    %183 = vector.broadcast %182 : vector<1x16xf32> to vector<2x16xf32>
    %184 = arith.mulf %181, %183 : vector<2x16xf32>
    %c0_115 = arith.constant 0 : index
    %c0_116 = arith.constant 0 : index
    %185 = vector.load %arg3[%c0_115, %c0_116] : memref<1x16xf32, #tpu.memory_space<vmem>>, vector<1x16xf32>
    %186 = vector.broadcast %185 : vector<1x16xf32> to vector<2x16xf32>
    %187 = arith.addf %184, %186 : vector<2x16xf32>
    %cst_117 = arith.constant 0.000000e+00 : f32
    %188 = vector.broadcast %cst_117 : f32 to vector<2x16xf32>
    %189 = arith.maximumf %187, %188 : vector<2x16xf32>
    %190 = arith.addf %177, %189 : vector<2x16xf32>
    %191 = vector.extract_strided_slice %180 {offsets = [0, 16], sizes = [2, 16], strides = [1, 1]} : vector<2x32xf32> to vector<2x16xf32>
    %c0_118 = arith.constant 0 : index
    %c0_119 = arith.constant 0 : index
    %192 = vector.load %arg2[%c0_118, %c0_119] : memref<1x16xf32, #tpu.memory_space<vmem>>, vector<1x16xf32>
    %193 = vector.broadcast %192 : vector<1x16xf32> to vector<2x16xf32>
    %194 = arith.mulf %191, %193 : vector<2x16xf32>
    %c0_120 = arith.constant 0 : index
    %c0_121 = arith.constant 0 : index
    %195 = vector.load %arg3[%c0_120, %c0_121] : memref<1x16xf32, #tpu.memory_space<vmem>>, vector<1x16xf32>
    %196 = vector.broadcast %195 : vector<1x16xf32> to vector<2x16xf32>
    %197 = arith.addf %194, %196 : vector<2x16xf32>
    %cst_122 = arith.constant 0.000000e+00 : f32
    %198 = vector.broadcast %cst_122 : f32 to vector<2x16xf32>
    %199 = arith.maximumf %197, %198 : vector<2x16xf32>
    %200 = arith.addf %190, %199 : vector<2x16xf32>
    %cst_123 = arith.constant 2.500000e-01 : f32
    %201 = vector.broadcast %cst_123 : f32 to vector<2x16xf32>
    %202 = arith.mulf %200, %201 : vector<2x16xf32>
    %203 = arith.truncf %202 : vector<2x16xf32> to vector<2x16xbf16>
    %c0_124 = arith.constant 0 : index
    %c0_125 = arith.constant 0 : index
    %204 = vector.load %arg4[%c0_124, %c0_125] : memref<16x16xbf16, #tpu.memory_space<vmem>>, vector<16x16xbf16>
    %cst_126 = arith.constant dense<0.000000e+00> : vector<2x16xf32>
    %205 = tpu.matmul %203, %204, %cst_126 {dimension_numbers = #tpu.dot_dimension_numbers<[1], [0], [0], [1], [0, 0, 1, 1], [], []>} : vector<2x16xbf16>, vector<16x16xbf16>, vector<2x16xf32> -> vector<2x16xf32>
    %c0_127 = arith.constant 0 : index
    %c2_128 = arith.constant 2 : index
    %c0_129 = arith.constant 0 : index
    %c0_130 = arith.constant 0 : index
    %206 = vector.load %arg5[%c0_127, %c2_128, %c0_129, %c0_130] : memref<1x4x2x16xbf16, #tpu.memory_space<vmem>>, vector<1x1x2x16xbf16>
    %207 = vector.shape_cast %206 : vector<1x1x2x16xbf16> to vector<2x16xbf16>
    %208 = arith.extf %207 : vector<2x16xbf16> to vector<2x16xf32>
    %209 = vector.extract_strided_slice %208 {offsets = [0, 0], sizes = [2, 8], strides = [1, 1]} : vector<2x16xf32> to vector<2x8xf32>
    %c0_131 = arith.constant 0 : index
    %c0_132 = arith.constant 0 : index
    %210 = vector.load %arg6[%c0_131, %c0_132] : memref<1x8xf32, #tpu.memory_space<vmem>>, vector<1x8xf32>
    %211 = vector.broadcast %210 : vector<1x8xf32> to vector<2x8xf32>
    %212 = arith.mulf %209, %211 : vector<2x8xf32>
    %c0_133 = arith.constant 0 : index
    %c0_134 = arith.constant 0 : index
    %213 = vector.load %arg7[%c0_133, %c0_134] : memref<1x8xf32, #tpu.memory_space<vmem>>, vector<1x8xf32>
    %214 = vector.broadcast %213 : vector<1x8xf32> to vector<2x8xf32>
    %215 = arith.addf %212, %214 : vector<2x8xf32>
    %cst_135 = arith.constant 0.000000e+00 : f32
    %216 = vector.broadcast %cst_135 : f32 to vector<2x8xf32>
    %217 = arith.maximumf %215, %216 : vector<2x8xf32>
    %218 = vector.extract_strided_slice %208 {offsets = [0, 8], sizes = [2, 8], strides = [1, 1]} : vector<2x16xf32> to vector<2x8xf32>
    %c0_136 = arith.constant 0 : index
    %c0_137 = arith.constant 0 : index
    %219 = vector.load %arg6[%c0_136, %c0_137] : memref<1x8xf32, #tpu.memory_space<vmem>>, vector<1x8xf32>
    %220 = vector.broadcast %219 : vector<1x8xf32> to vector<2x8xf32>
    %221 = arith.mulf %218, %220 : vector<2x8xf32>
    %c0_138 = arith.constant 0 : index
    %c0_139 = arith.constant 0 : index
    %222 = vector.load %arg7[%c0_138, %c0_139] : memref<1x8xf32, #tpu.memory_space<vmem>>, vector<1x8xf32>
    %223 = vector.broadcast %222 : vector<1x8xf32> to vector<2x8xf32>
    %224 = arith.addf %221, %223 : vector<2x8xf32>
    %cst_140 = arith.constant 0.000000e+00 : f32
    %225 = vector.broadcast %cst_140 : f32 to vector<2x8xf32>
    %226 = arith.maximumf %224, %225 : vector<2x8xf32>
    %227 = arith.addf %217, %226 : vector<2x8xf32>
    %c0_141 = arith.constant 0 : index
    %c3_142 = arith.constant 3 : index
    %c0_143 = arith.constant 0 : index
    %c0_144 = arith.constant 0 : index
    %228 = vector.load %arg5[%c0_141, %c3_142, %c0_143, %c0_144] : memref<1x4x2x16xbf16, #tpu.memory_space<vmem>>, vector<1x1x2x16xbf16>
    %229 = vector.shape_cast %228 : vector<1x1x2x16xbf16> to vector<2x16xbf16>
    %230 = arith.extf %229 : vector<2x16xbf16> to vector<2x16xf32>
    %231 = vector.extract_strided_slice %230 {offsets = [0, 0], sizes = [2, 8], strides = [1, 1]} : vector<2x16xf32> to vector<2x8xf32>
    %c0_145 = arith.constant 0 : index
    %c0_146 = arith.constant 0 : index
    %232 = vector.load %arg6[%c0_145, %c0_146] : memref<1x8xf32, #tpu.memory_space<vmem>>, vector<1x8xf32>
    %233 = vector.broadcast %232 : vector<1x8xf32> to vector<2x8xf32>
    %234 = arith.mulf %231, %233 : vector<2x8xf32>
    %c0_147 = arith.constant 0 : index
    %c0_148 = arith.constant 0 : index
    %235 = vector.load %arg7[%c0_147, %c0_148] : memref<1x8xf32, #tpu.memory_space<vmem>>, vector<1x8xf32>
    %236 = vector.broadcast %235 : vector<1x8xf32> to vector<2x8xf32>
    %237 = arith.addf %234, %236 : vector<2x8xf32>
    %cst_149 = arith.constant 0.000000e+00 : f32
    %238 = vector.broadcast %cst_149 : f32 to vector<2x8xf32>
    %239 = arith.maximumf %237, %238 : vector<2x8xf32>
    %240 = arith.addf %227, %239 : vector<2x8xf32>
    %241 = vector.extract_strided_slice %230 {offsets = [0, 8], sizes = [2, 8], strides = [1, 1]} : vector<2x16xf32> to vector<2x8xf32>
    %c0_150 = arith.constant 0 : index
    %c0_151 = arith.constant 0 : index
    %242 = vector.load %arg6[%c0_150, %c0_151] : memref<1x8xf32, #tpu.memory_space<vmem>>, vector<1x8xf32>
    %243 = vector.broadcast %242 : vector<1x8xf32> to vector<2x8xf32>
    %244 = arith.mulf %241, %243 : vector<2x8xf32>
    %c0_152 = arith.constant 0 : index
    %c0_153 = arith.constant 0 : index
    %245 = vector.load %arg7[%c0_152, %c0_153] : memref<1x8xf32, #tpu.memory_space<vmem>>, vector<1x8xf32>
    %246 = vector.broadcast %245 : vector<1x8xf32> to vector<2x8xf32>
    %247 = arith.addf %244, %246 : vector<2x8xf32>
    %cst_154 = arith.constant 0.000000e+00 : f32
    %248 = vector.broadcast %cst_154 : f32 to vector<2x8xf32>
    %249 = arith.maximumf %247, %248 : vector<2x8xf32>
    %250 = arith.addf %240, %249 : vector<2x8xf32>
    %cst_155 = arith.constant 2.500000e-01 : f32
    %251 = vector.broadcast %cst_155 : f32 to vector<2x8xf32>
    %252 = arith.mulf %250, %251 : vector<2x8xf32>
    %253 = arith.truncf %252 : vector<2x8xf32> to vector<2x8xbf16>
    %c0_156 = arith.constant 0 : index
    %c0_157 = arith.constant 0 : index
    %254 = vector.load %arg8[%c0_156, %c0_157] : memref<8x16xbf16, #tpu.memory_space<vmem>>, vector<8x16xbf16>
    %cst_158 = arith.constant dense<0.000000e+00> : vector<2x16xf32>
    %255 = tpu.matmul %253, %254, %cst_158 {dimension_numbers = #tpu.dot_dimension_numbers<[1], [0], [0], [1], [0, 0, 1, 1], [], []>} : vector<2x8xbf16>, vector<8x16xbf16>, vector<2x16xf32> -> vector<2x16xf32>
    %256 = arith.addf %205, %255 : vector<2x16xf32>
    %c0_159 = arith.constant 0 : index
    %c2_160 = arith.constant 2 : index
    %c0_161 = arith.constant 0 : index
    %c0_162 = arith.constant 0 : index
    %257 = vector.load %arg9[%c0_159, %c2_160, %c0_161, %c0_162] : memref<1x4x2x16xbf16, #tpu.memory_space<vmem>>, vector<1x1x2x16xbf16>
    %258 = vector.shape_cast %257 : vector<1x1x2x16xbf16> to vector<2x16xbf16>
    %259 = arith.extf %258 : vector<2x16xbf16> to vector<2x16xf32>
    %260 = vector.extract_strided_slice %259 {offsets = [0, 0], sizes = [2, 8], strides = [1, 1]} : vector<2x16xf32> to vector<2x8xf32>
    %c0_163 = arith.constant 0 : index
    %c0_164 = arith.constant 0 : index
    %261 = vector.load %arg10[%c0_163, %c0_164] : memref<1x8xf32, #tpu.memory_space<vmem>>, vector<1x8xf32>
    %262 = vector.broadcast %261 : vector<1x8xf32> to vector<2x8xf32>
    %263 = arith.mulf %260, %262 : vector<2x8xf32>
    %c0_165 = arith.constant 0 : index
    %c0_166 = arith.constant 0 : index
    %264 = vector.load %arg11[%c0_165, %c0_166] : memref<1x8xf32, #tpu.memory_space<vmem>>, vector<1x8xf32>
    %265 = vector.broadcast %264 : vector<1x8xf32> to vector<2x8xf32>
    %266 = arith.addf %263, %265 : vector<2x8xf32>
    %cst_167 = arith.constant 0.000000e+00 : f32
    %267 = vector.broadcast %cst_167 : f32 to vector<2x8xf32>
    %268 = arith.maximumf %266, %267 : vector<2x8xf32>
    %269 = vector.extract_strided_slice %259 {offsets = [0, 8], sizes = [2, 8], strides = [1, 1]} : vector<2x16xf32> to vector<2x8xf32>
    %c0_168 = arith.constant 0 : index
    %c0_169 = arith.constant 0 : index
    %270 = vector.load %arg10[%c0_168, %c0_169] : memref<1x8xf32, #tpu.memory_space<vmem>>, vector<1x8xf32>
    %271 = vector.broadcast %270 : vector<1x8xf32> to vector<2x8xf32>
    %272 = arith.mulf %269, %271 : vector<2x8xf32>
    %c0_170 = arith.constant 0 : index
    %c0_171 = arith.constant 0 : index
    %273 = vector.load %arg11[%c0_170, %c0_171] : memref<1x8xf32, #tpu.memory_space<vmem>>, vector<1x8xf32>
    %274 = vector.broadcast %273 : vector<1x8xf32> to vector<2x8xf32>
    %275 = arith.addf %272, %274 : vector<2x8xf32>
    %cst_172 = arith.constant 0.000000e+00 : f32
    %276 = vector.broadcast %cst_172 : f32 to vector<2x8xf32>
    %277 = arith.maximumf %275, %276 : vector<2x8xf32>
    %278 = arith.addf %268, %277 : vector<2x8xf32>
    %c0_173 = arith.constant 0 : index
    %c3_174 = arith.constant 3 : index
    %c0_175 = arith.constant 0 : index
    %c0_176 = arith.constant 0 : index
    %279 = vector.load %arg9[%c0_173, %c3_174, %c0_175, %c0_176] : memref<1x4x2x16xbf16, #tpu.memory_space<vmem>>, vector<1x1x2x16xbf16>
    %280 = vector.shape_cast %279 : vector<1x1x2x16xbf16> to vector<2x16xbf16>
    %281 = arith.extf %280 : vector<2x16xbf16> to vector<2x16xf32>
    %282 = vector.extract_strided_slice %281 {offsets = [0, 0], sizes = [2, 8], strides = [1, 1]} : vector<2x16xf32> to vector<2x8xf32>
    %c0_177 = arith.constant 0 : index
    %c0_178 = arith.constant 0 : index
    %283 = vector.load %arg10[%c0_177, %c0_178] : memref<1x8xf32, #tpu.memory_space<vmem>>, vector<1x8xf32>
    %284 = vector.broadcast %283 : vector<1x8xf32> to vector<2x8xf32>
    %285 = arith.mulf %282, %284 : vector<2x8xf32>
    %c0_179 = arith.constant 0 : index
    %c0_180 = arith.constant 0 : index
    %286 = vector.load %arg11[%c0_179, %c0_180] : memref<1x8xf32, #tpu.memory_space<vmem>>, vector<1x8xf32>
    %287 = vector.broadcast %286 : vector<1x8xf32> to vector<2x8xf32>
    %288 = arith.addf %285, %287 : vector<2x8xf32>
    %cst_181 = arith.constant 0.000000e+00 : f32
    %289 = vector.broadcast %cst_181 : f32 to vector<2x8xf32>
    %290 = arith.maximumf %288, %289 : vector<2x8xf32>
    %291 = arith.addf %278, %290 : vector<2x8xf32>
    %292 = vector.extract_strided_slice %281 {offsets = [0, 8], sizes = [2, 8], strides = [1, 1]} : vector<2x16xf32> to vector<2x8xf32>
    %c0_182 = arith.constant 0 : index
    %c0_183 = arith.constant 0 : index
    %293 = vector.load %arg10[%c0_182, %c0_183] : memref<1x8xf32, #tpu.memory_space<vmem>>, vector<1x8xf32>
    %294 = vector.broadcast %293 : vector<1x8xf32> to vector<2x8xf32>
    %295 = arith.mulf %292, %294 : vector<2x8xf32>
    %c0_184 = arith.constant 0 : index
    %c0_185 = arith.constant 0 : index
    %296 = vector.load %arg11[%c0_184, %c0_185] : memref<1x8xf32, #tpu.memory_space<vmem>>, vector<1x8xf32>
    %297 = vector.broadcast %296 : vector<1x8xf32> to vector<2x8xf32>
    %298 = arith.addf %295, %297 : vector<2x8xf32>
    %cst_186 = arith.constant 0.000000e+00 : f32
    %299 = vector.broadcast %cst_186 : f32 to vector<2x8xf32>
    %300 = arith.maximumf %298, %299 : vector<2x8xf32>
    %301 = arith.addf %291, %300 : vector<2x8xf32>
    %cst_187 = arith.constant 2.500000e-01 : f32
    %302 = vector.broadcast %cst_187 : f32 to vector<2x8xf32>
    %303 = arith.mulf %301, %302 : vector<2x8xf32>
    %304 = arith.truncf %303 : vector<2x8xf32> to vector<2x8xbf16>
    %c0_188 = arith.constant 0 : index
    %c0_189 = arith.constant 0 : index
    %305 = vector.load %arg12[%c0_188, %c0_189] : memref<8x16xbf16, #tpu.memory_space<vmem>>, vector<8x16xbf16>
    %cst_190 = arith.constant dense<0.000000e+00> : vector<2x16xf32>
    %306 = tpu.matmul %304, %305, %cst_190 {dimension_numbers = #tpu.dot_dimension_numbers<[1], [0], [0], [1], [0, 0, 1, 1], [], []>} : vector<2x8xbf16>, vector<8x16xbf16>, vector<2x16xf32> -> vector<2x16xf32>
    %307 = arith.addf %256, %306 : vector<2x16xf32>
    %308 = arith.truncf %307 : vector<2x16xf32> to vector<2x16xbf16>
    %c0_191 = arith.constant 0 : index
    %c1_192 = arith.constant 1 : index
    %c0_193 = arith.constant 0 : index
    %c0_194 = arith.constant 0 : index
    %309 = vector.load %arg13[%c0_191, %c1_192, %c0_193, %c0_194] : memref<1x2x2x16xbf16, #tpu.memory_space<vmem>>, vector<1x1x2x16xbf16>
    %310 = vector.shape_cast %309 : vector<1x1x2x16xbf16> to vector<2x16xbf16>
    %311 = vector.shape_cast %308 : vector<2x16xbf16> to vector<1x1x2x16xbf16>
    tpu.vector_store %arg13[%c0_191, %c1_192, %c0_193, %c0_194], %311 {strides = array<i32>} : memref<1x2x2x16xbf16, #tpu.memory_space<vmem>>, vector<1x1x2x16xbf16>,
    return
  }
  func.func @transform_0(%arg0: i32) -> (i32, i32, i32, i32) {
    %c0_i32 = arith.constant 0 : i32
    %c0_i32_0 = arith.constant 0 : i32
    %c0_i32_1 = arith.constant 0 : i32
    %c0_i32_2 = arith.constant 0 : i32
    return %arg0, %c0_i32, %c0_i32_0, %c0_i32_1 : i32, i32, i32, i32
  }
  func.func @transform_1(%arg0: i32) -> (i32, i32) {
    %c0_i32 = arith.constant 0 : i32
    %c0_i32_0 = arith.constant 0 : i32
    %c0_i32_1 = arith.constant 0 : i32
    return %c0_i32, %c0_i32_0 : i32, i32
  }
  func.func @transform_2(%arg0: i32) -> (i32, i32) {
    %c0_i32 = arith.constant 0 : i32
    %c0_i32_0 = arith.constant 0 : i32
    %c0_i32_1 = arith.constant 0 : i32
    return %c0_i32, %c0_i32_0 : i32, i32
  }
  func.func @transform_3(%arg0: i32) -> (i32, i32) {
    %c0_i32 = arith.constant 0 : i32
    %c0_i32_0 = arith.constant 0 : i32
    %c0_i32_1 = arith.constant 0 : i32
    return %c0_i32, %c0_i32_0 : i32, i32
  }
  func.func @transform_4(%arg0: i32) -> (i32, i32, i32, i32) {
    %c0_i32 = arith.constant 0 : i32
    %c0_i32_0 = arith.constant 0 : i32
    %c0_i32_1 = arith.constant 0 : i32
    %c0_i32_2 = arith.constant 0 : i32
    return %arg0, %c0_i32, %c0_i32_0, %c0_i32_1 : i32, i32, i32, i32
  }
  func.func @transform_5(%arg0: i32) -> (i32, i32) {
    %c0_i32 = arith.constant 0 : i32
    %c0_i32_0 = arith.constant 0 : i32
    %c0_i32_1 = arith.constant 0 : i32
    return %c0_i32, %c0_i32_0 : i32, i32
  }
  func.func @transform_6(%arg0: i32) -> (i32, i32) {
    %c0_i32 = arith.constant 0 : i32
    %c0_i32_0 = arith.constant 0 : i32
    %c0_i32_1 = arith.constant 0 : i32
    return %c0_i32, %c0_i32_0 : i32, i32
  }
  func.func @transform_7(%arg0: i32) -> (i32, i32) {
    %c0_i32 = arith.constant 0 : i32
    %c0_i32_0 = arith.constant 0 : i32
    %c0_i32_1 = arith.constant 0 : i32
    return %c0_i32, %c0_i32_0 : i32, i32
  }
  func.func @transform_8(%arg0: i32) -> (i32, i32, i32, i32) {
    %c0_i32 = arith.constant 0 : i32
    %c0_i32_0 = arith.constant 0 : i32
    %c0_i32_1 = arith.constant 0 : i32
    %c0_i32_2 = arith.constant 0 : i32
    return %arg0, %c0_i32, %c0_i32_0, %c0_i32_1 : i32, i32, i32, i32
  }
  func.func @transform_9(%arg0: i32) -> (i32, i32) {
    %c0_i32 = arith.constant 0 : i32
    %c0_i32_0 = arith.constant 0 : i32
    %c0_i32_1 = arith.constant 0 : i32
    return %c0_i32, %c0_i32_0 : i32, i32
  }
  func.func @transform_10(%arg0: i32) -> (i32, i32) {
    %c0_i32 = arith.constant 0 : i32
    %c0_i32_0 = arith.constant 0 : i32
    %c0_i32_1 = arith.constant 0 : i32
    return %c0_i32, %c0_i32_0 : i32, i32
  }
  func.func @transform_11(%arg0: i32) -> (i32, i32) {
    %c0_i32 = arith.constant 0 : i32
    %c0_i32_0 = arith.constant 0 : i32
    %c0_i32_1 = arith.constant 0 : i32
    return %c0_i32, %c0_i32_0 : i32, i32
  }
  func.func @transform_12(%arg0: i32) -> (i32, i32, i32, i32) {
    %c0_i32 = arith.constant 0 : i32
    %c0_i32_0 = arith.constant 0 : i32
    %c0_i32_1 = arith.constant 0 : i32
    %c0_i32_2 = arith.constant 0 : i32
    return %arg0, %c0_i32, %c0_i32_0, %c0_i32_1 : i32, i32, i32, i32
  }
}

module attributes {stable_mosaic.version = 11 : i64} {
  func.func @kernel(%arg0: i32, %arg1: memref<1x4x4x16xbf16, #tpu.memory_space<vmem>>, %arg2: memref<9x16x8xbf16, #tpu.memory_space<vmem>>, %arg3: memref<1x2x2x8xbf16, #tpu.memory_space<vmem>>) attributes {dimension_semantics = [#tpu.dimension_semantics<parallel>], iteration_bounds = array<i64: 2>, scalar_prefetch = 0 : i64, scratch_operands = 0 : i64, tpu.core_type = #tpu.core_type<tc>, window_params = [{transform_indices = @transform_0, window_bounds = array<i64: 1, 4, 4, 16>}, {pipeline_mode = #tpu.pipeline_mode<synchronous>, transform_indices = @transform_1, window_bounds = array<i64: 9, 16, 8>}, {transform_indices = @transform_2, window_bounds = array<i64: 1, 2, 2, 8>}]} {
    %c0 = arith.constant 0 : index
    %c0_0 = arith.constant 0 : index
    %c0_1 = arith.constant 0 : index
    %c0_2 = arith.constant 0 : index
    %0 = vector.load %arg1[%c0, %c0_0, %c0_1, %c0_2] : memref<1x4x4x16xbf16, #tpu.memory_space<vmem>>, vector<1x1x4x16xbf16>
    %1 = vector.shape_cast %0 : vector<1x1x4x16xbf16> to vector<4x16xbf16>
    %2 = vector.extract_strided_slice %1 {offsets = [0, 0], sizes = [2, 16], strides = [1, 1]} : vector<4x16xbf16> to vector<2x16xbf16>
    %c0_3 = arith.constant 0 : index
    %c0_4 = arith.constant 0 : index
    %c0_5 = arith.constant 0 : index
    %3 = vector.load %arg2[%c0_3, %c0_4, %c0_5] : memref<9x16x8xbf16, #tpu.memory_space<vmem>>, vector<1x16x8xbf16>
    %4 = vector.shape_cast %3 : vector<1x16x8xbf16> to vector<16x8xbf16>
    %cst = arith.constant dense<0.000000e+00> : vector<2x8xf32>
    %5 = tpu.matmul %2, %4, %cst {dimension_numbers = #tpu.dot_dimension_numbers<[1], [0], [0], [1], [0, 0, 1, 1], [], []>} : vector<2x16xbf16>, vector<16x8xbf16>, vector<2x8xf32> -> vector<2x8xf32>
    %6 = vector.extract_strided_slice %1 {offsets = [1, 0], sizes = [2, 16], strides = [1, 1]} : vector<4x16xbf16> to vector<2x16xbf16>
    %c1 = arith.constant 1 : index
    %c0_6 = arith.constant 0 : index
    %c0_7 = arith.constant 0 : index
    %7 = vector.load %arg2[%c1, %c0_6, %c0_7] : memref<9x16x8xbf16, #tpu.memory_space<vmem>>, vector<1x16x8xbf16>
    %8 = vector.shape_cast %7 : vector<1x16x8xbf16> to vector<16x8xbf16>
    %cst_8 = arith.constant dense<0.000000e+00> : vector<2x8xf32>
    %9 = tpu.matmul %6, %8, %cst_8 {dimension_numbers = #tpu.dot_dimension_numbers<[1], [0], [0], [1], [0, 0, 1, 1], [], []>} : vector<2x16xbf16>, vector<16x8xbf16>, vector<2x8xf32> -> vector<2x8xf32>
    %10 = arith.addf %5, %9 : vector<2x8xf32>
    %11 = vector.extract_strided_slice %1 {offsets = [2, 0], sizes = [2, 16], strides = [1, 1]} : vector<4x16xbf16> to vector<2x16xbf16>
    %c2 = arith.constant 2 : index
    %c0_9 = arith.constant 0 : index
    %c0_10 = arith.constant 0 : index
    %12 = vector.load %arg2[%c2, %c0_9, %c0_10] : memref<9x16x8xbf16, #tpu.memory_space<vmem>>, vector<1x16x8xbf16>
    %13 = vector.shape_cast %12 : vector<1x16x8xbf16> to vector<16x8xbf16>
    %cst_11 = arith.constant dense<0.000000e+00> : vector<2x8xf32>
    %14 = tpu.matmul %11, %13, %cst_11 {dimension_numbers = #tpu.dot_dimension_numbers<[1], [0], [0], [1], [0, 0, 1, 1], [], []>} : vector<2x16xbf16>, vector<16x8xbf16>, vector<2x8xf32> -> vector<2x8xf32>
    %15 = arith.addf %10, %14 : vector<2x8xf32>
    %c0_12 = arith.constant 0 : index
    %c1_13 = arith.constant 1 : index
    %c0_14 = arith.constant 0 : index
    %c0_15 = arith.constant 0 : index
    %16 = vector.load %arg1[%c0_12, %c1_13, %c0_14, %c0_15] : memref<1x4x4x16xbf16, #tpu.memory_space<vmem>>, vector<1x1x4x16xbf16>
    %17 = vector.shape_cast %16 : vector<1x1x4x16xbf16> to vector<4x16xbf16>
    %18 = vector.extract_strided_slice %17 {offsets = [0, 0], sizes = [2, 16], strides = [1, 1]} : vector<4x16xbf16> to vector<2x16xbf16>
    %c3 = arith.constant 3 : index
    %c0_16 = arith.constant 0 : index
    %c0_17 = arith.constant 0 : index
    %19 = vector.load %arg2[%c3, %c0_16, %c0_17] : memref<9x16x8xbf16, #tpu.memory_space<vmem>>, vector<1x16x8xbf16>
    %20 = vector.shape_cast %19 : vector<1x16x8xbf16> to vector<16x8xbf16>
    %cst_18 = arith.constant dense<0.000000e+00> : vector<2x8xf32>
    %21 = tpu.matmul %18, %20, %cst_18 {dimension_numbers = #tpu.dot_dimension_numbers<[1], [0], [0], [1], [0, 0, 1, 1], [], []>} : vector<2x16xbf16>, vector<16x8xbf16>, vector<2x8xf32> -> vector<2x8xf32>
    %22 = arith.addf %15, %21 : vector<2x8xf32>
    %23 = vector.extract_strided_slice %17 {offsets = [1, 0], sizes = [2, 16], strides = [1, 1]} : vector<4x16xbf16> to vector<2x16xbf16>
    %c4 = arith.constant 4 : index
    %c0_19 = arith.constant 0 : index
    %c0_20 = arith.constant 0 : index
    %24 = vector.load %arg2[%c4, %c0_19, %c0_20] : memref<9x16x8xbf16, #tpu.memory_space<vmem>>, vector<1x16x8xbf16>
    %25 = vector.shape_cast %24 : vector<1x16x8xbf16> to vector<16x8xbf16>
    %cst_21 = arith.constant dense<0.000000e+00> : vector<2x8xf32>
    %26 = tpu.matmul %23, %25, %cst_21 {dimension_numbers = #tpu.dot_dimension_numbers<[1], [0], [0], [1], [0, 0, 1, 1], [], []>} : vector<2x16xbf16>, vector<16x8xbf16>, vector<2x8xf32> -> vector<2x8xf32>
    %27 = arith.addf %22, %26 : vector<2x8xf32>
    %28 = vector.extract_strided_slice %17 {offsets = [2, 0], sizes = [2, 16], strides = [1, 1]} : vector<4x16xbf16> to vector<2x16xbf16>
    %c5 = arith.constant 5 : index
    %c0_22 = arith.constant 0 : index
    %c0_23 = arith.constant 0 : index
    %29 = vector.load %arg2[%c5, %c0_22, %c0_23] : memref<9x16x8xbf16, #tpu.memory_space<vmem>>, vector<1x16x8xbf16>
    %30 = vector.shape_cast %29 : vector<1x16x8xbf16> to vector<16x8xbf16>
    %cst_24 = arith.constant dense<0.000000e+00> : vector<2x8xf32>
    %31 = tpu.matmul %28, %30, %cst_24 {dimension_numbers = #tpu.dot_dimension_numbers<[1], [0], [0], [1], [0, 0, 1, 1], [], []>} : vector<2x16xbf16>, vector<16x8xbf16>, vector<2x8xf32> -> vector<2x8xf32>
    %32 = arith.addf %27, %31 : vector<2x8xf32>
    %c0_25 = arith.constant 0 : index
    %c2_26 = arith.constant 2 : index
    %c0_27 = arith.constant 0 : index
    %c0_28 = arith.constant 0 : index
    %33 = vector.load %arg1[%c0_25, %c2_26, %c0_27, %c0_28] : memref<1x4x4x16xbf16, #tpu.memory_space<vmem>>, vector<1x1x4x16xbf16>
    %34 = vector.shape_cast %33 : vector<1x1x4x16xbf16> to vector<4x16xbf16>
    %35 = vector.extract_strided_slice %34 {offsets = [0, 0], sizes = [2, 16], strides = [1, 1]} : vector<4x16xbf16> to vector<2x16xbf16>
    %c6 = arith.constant 6 : index
    %c0_29 = arith.constant 0 : index
    %c0_30 = arith.constant 0 : index
    %36 = vector.load %arg2[%c6, %c0_29, %c0_30] : memref<9x16x8xbf16, #tpu.memory_space<vmem>>, vector<1x16x8xbf16>
    %37 = vector.shape_cast %36 : vector<1x16x8xbf16> to vector<16x8xbf16>
    %cst_31 = arith.constant dense<0.000000e+00> : vector<2x8xf32>
    %38 = tpu.matmul %35, %37, %cst_31 {dimension_numbers = #tpu.dot_dimension_numbers<[1], [0], [0], [1], [0, 0, 1, 1], [], []>} : vector<2x16xbf16>, vector<16x8xbf16>, vector<2x8xf32> -> vector<2x8xf32>
    %39 = arith.addf %32, %38 : vector<2x8xf32>
    %40 = vector.extract_strided_slice %34 {offsets = [1, 0], sizes = [2, 16], strides = [1, 1]} : vector<4x16xbf16> to vector<2x16xbf16>
    %c7 = arith.constant 7 : index
    %c0_32 = arith.constant 0 : index
    %c0_33 = arith.constant 0 : index
    %41 = vector.load %arg2[%c7, %c0_32, %c0_33] : memref<9x16x8xbf16, #tpu.memory_space<vmem>>, vector<1x16x8xbf16>
    %42 = vector.shape_cast %41 : vector<1x16x8xbf16> to vector<16x8xbf16>
    %cst_34 = arith.constant dense<0.000000e+00> : vector<2x8xf32>
    %43 = tpu.matmul %40, %42, %cst_34 {dimension_numbers = #tpu.dot_dimension_numbers<[1], [0], [0], [1], [0, 0, 1, 1], [], []>} : vector<2x16xbf16>, vector<16x8xbf16>, vector<2x8xf32> -> vector<2x8xf32>
    %44 = arith.addf %39, %43 : vector<2x8xf32>
    %45 = vector.extract_strided_slice %34 {offsets = [2, 0], sizes = [2, 16], strides = [1, 1]} : vector<4x16xbf16> to vector<2x16xbf16>
    %c8 = arith.constant 8 : index
    %c0_35 = arith.constant 0 : index
    %c0_36 = arith.constant 0 : index
    %46 = vector.load %arg2[%c8, %c0_35, %c0_36] : memref<9x16x8xbf16, #tpu.memory_space<vmem>>, vector<1x16x8xbf16>
    %47 = vector.shape_cast %46 : vector<1x16x8xbf16> to vector<16x8xbf16>
    %cst_37 = arith.constant dense<0.000000e+00> : vector<2x8xf32>
    %48 = tpu.matmul %45, %47, %cst_37 {dimension_numbers = #tpu.dot_dimension_numbers<[1], [0], [0], [1], [0, 0, 1, 1], [], []>} : vector<2x16xbf16>, vector<16x8xbf16>, vector<2x8xf32> -> vector<2x8xf32>
    %49 = arith.addf %44, %48 : vector<2x8xf32>
    %50 = arith.truncf %49 : vector<2x8xf32> to vector<2x8xbf16>
    %c0_38 = arith.constant 0 : index
    %c0_39 = arith.constant 0 : index
    %c0_40 = arith.constant 0 : index
    %c0_41 = arith.constant 0 : index
    %51 = vector.load %arg3[%c0_38, %c0_39, %c0_40, %c0_41] : memref<1x2x2x8xbf16, #tpu.memory_space<vmem>>, vector<1x1x2x8xbf16>
    %52 = vector.shape_cast %51 : vector<1x1x2x8xbf16> to vector<2x8xbf16>
    %53 = vector.shape_cast %50 : vector<2x8xbf16> to vector<1x1x2x8xbf16>
    tpu.vector_store %arg3[%c0_38, %c0_39, %c0_40, %c0_41], %53 {strides = array<i32>} : memref<1x2x2x8xbf16, #tpu.memory_space<vmem>>, vector<1x1x2x8xbf16>,
    %c0_42 = arith.constant 0 : index
    %c1_43 = arith.constant 1 : index
    %c0_44 = arith.constant 0 : index
    %c0_45 = arith.constant 0 : index
    %54 = vector.load %arg1[%c0_42, %c1_43, %c0_44, %c0_45] : memref<1x4x4x16xbf16, #tpu.memory_space<vmem>>, vector<1x1x4x16xbf16>
    %55 = vector.shape_cast %54 : vector<1x1x4x16xbf16> to vector<4x16xbf16>
    %56 = vector.extract_strided_slice %55 {offsets = [0, 0], sizes = [2, 16], strides = [1, 1]} : vector<4x16xbf16> to vector<2x16xbf16>
    %c0_46 = arith.constant 0 : index
    %c0_47 = arith.constant 0 : index
    %c0_48 = arith.constant 0 : index
    %57 = vector.load %arg2[%c0_46, %c0_47, %c0_48] : memref<9x16x8xbf16, #tpu.memory_space<vmem>>, vector<1x16x8xbf16>
    %58 = vector.shape_cast %57 : vector<1x16x8xbf16> to vector<16x8xbf16>
    %cst_49 = arith.constant dense<0.000000e+00> : vector<2x8xf32>
    %59 = tpu.matmul %56, %58, %cst_49 {dimension_numbers = #tpu.dot_dimension_numbers<[1], [0], [0], [1], [0, 0, 1, 1], [], []>} : vector<2x16xbf16>, vector<16x8xbf16>, vector<2x8xf32> -> vector<2x8xf32>
    %60 = vector.extract_strided_slice %55 {offsets = [1, 0], sizes = [2, 16], strides = [1, 1]} : vector<4x16xbf16> to vector<2x16xbf16>
    %c1_50 = arith.constant 1 : index
    %c0_51 = arith.constant 0 : index
    %c0_52 = arith.constant 0 : index
    %61 = vector.load %arg2[%c1_50, %c0_51, %c0_52] : memref<9x16x8xbf16, #tpu.memory_space<vmem>>, vector<1x16x8xbf16>
    %62 = vector.shape_cast %61 : vector<1x16x8xbf16> to vector<16x8xbf16>
    %cst_53 = arith.constant dense<0.000000e+00> : vector<2x8xf32>
    %63 = tpu.matmul %60, %62, %cst_53 {dimension_numbers = #tpu.dot_dimension_numbers<[1], [0], [0], [1], [0, 0, 1, 1], [], []>} : vector<2x16xbf16>, vector<16x8xbf16>, vector<2x8xf32> -> vector<2x8xf32>
    %64 = arith.addf %59, %63 : vector<2x8xf32>
    %65 = vector.extract_strided_slice %55 {offsets = [2, 0], sizes = [2, 16], strides = [1, 1]} : vector<4x16xbf16> to vector<2x16xbf16>
    %c2_54 = arith.constant 2 : index
    %c0_55 = arith.constant 0 : index
    %c0_56 = arith.constant 0 : index
    %66 = vector.load %arg2[%c2_54, %c0_55, %c0_56] : memref<9x16x8xbf16, #tpu.memory_space<vmem>>, vector<1x16x8xbf16>
    %67 = vector.shape_cast %66 : vector<1x16x8xbf16> to vector<16x8xbf16>
    %cst_57 = arith.constant dense<0.000000e+00> : vector<2x8xf32>
    %68 = tpu.matmul %65, %67, %cst_57 {dimension_numbers = #tpu.dot_dimension_numbers<[1], [0], [0], [1], [0, 0, 1, 1], [], []>} : vector<2x16xbf16>, vector<16x8xbf16>, vector<2x8xf32> -> vector<2x8xf32>
    %69 = arith.addf %64, %68 : vector<2x8xf32>
    %c0_58 = arith.constant 0 : index
    %c2_59 = arith.constant 2 : index
    %c0_60 = arith.constant 0 : index
    %c0_61 = arith.constant 0 : index
    %70 = vector.load %arg1[%c0_58, %c2_59, %c0_60, %c0_61] : memref<1x4x4x16xbf16, #tpu.memory_space<vmem>>, vector<1x1x4x16xbf16>
    %71 = vector.shape_cast %70 : vector<1x1x4x16xbf16> to vector<4x16xbf16>
    %72 = vector.extract_strided_slice %71 {offsets = [0, 0], sizes = [2, 16], strides = [1, 1]} : vector<4x16xbf16> to vector<2x16xbf16>
    %c3_62 = arith.constant 3 : index
    %c0_63 = arith.constant 0 : index
    %c0_64 = arith.constant 0 : index
    %73 = vector.load %arg2[%c3_62, %c0_63, %c0_64] : memref<9x16x8xbf16, #tpu.memory_space<vmem>>, vector<1x16x8xbf16>
    %74 = vector.shape_cast %73 : vector<1x16x8xbf16> to vector<16x8xbf16>
    %cst_65 = arith.constant dense<0.000000e+00> : vector<2x8xf32>
    %75 = tpu.matmul %72, %74, %cst_65 {dimension_numbers = #tpu.dot_dimension_numbers<[1], [0], [0], [1], [0, 0, 1, 1], [], []>} : vector<2x16xbf16>, vector<16x8xbf16>, vector<2x8xf32> -> vector<2x8xf32>
    %76 = arith.addf %69, %75 : vector<2x8xf32>
    %77 = vector.extract_strided_slice %71 {offsets = [1, 0], sizes = [2, 16], strides = [1, 1]} : vector<4x16xbf16> to vector<2x16xbf16>
    %c4_66 = arith.constant 4 : index
    %c0_67 = arith.constant 0 : index
    %c0_68 = arith.constant 0 : index
    %78 = vector.load %arg2[%c4_66, %c0_67, %c0_68] : memref<9x16x8xbf16, #tpu.memory_space<vmem>>, vector<1x16x8xbf16>
    %79 = vector.shape_cast %78 : vector<1x16x8xbf16> to vector<16x8xbf16>
    %cst_69 = arith.constant dense<0.000000e+00> : vector<2x8xf32>
    %80 = tpu.matmul %77, %79, %cst_69 {dimension_numbers = #tpu.dot_dimension_numbers<[1], [0], [0], [1], [0, 0, 1, 1], [], []>} : vector<2x16xbf16>, vector<16x8xbf16>, vector<2x8xf32> -> vector<2x8xf32>
    %81 = arith.addf %76, %80 : vector<2x8xf32>
    %82 = vector.extract_strided_slice %71 {offsets = [2, 0], sizes = [2, 16], strides = [1, 1]} : vector<4x16xbf16> to vector<2x16xbf16>
    %c5_70 = arith.constant 5 : index
    %c0_71 = arith.constant 0 : index
    %c0_72 = arith.constant 0 : index
    %83 = vector.load %arg2[%c5_70, %c0_71, %c0_72] : memref<9x16x8xbf16, #tpu.memory_space<vmem>>, vector<1x16x8xbf16>
    %84 = vector.shape_cast %83 : vector<1x16x8xbf16> to vector<16x8xbf16>
    %cst_73 = arith.constant dense<0.000000e+00> : vector<2x8xf32>
    %85 = tpu.matmul %82, %84, %cst_73 {dimension_numbers = #tpu.dot_dimension_numbers<[1], [0], [0], [1], [0, 0, 1, 1], [], []>} : vector<2x16xbf16>, vector<16x8xbf16>, vector<2x8xf32> -> vector<2x8xf32>
    %86 = arith.addf %81, %85 : vector<2x8xf32>
    %c0_74 = arith.constant 0 : index
    %c3_75 = arith.constant 3 : index
    %c0_76 = arith.constant 0 : index
    %c0_77 = arith.constant 0 : index
    %87 = vector.load %arg1[%c0_74, %c3_75, %c0_76, %c0_77] : memref<1x4x4x16xbf16, #tpu.memory_space<vmem>>, vector<1x1x4x16xbf16>
    %88 = vector.shape_cast %87 : vector<1x1x4x16xbf16> to vector<4x16xbf16>
    %89 = vector.extract_strided_slice %88 {offsets = [0, 0], sizes = [2, 16], strides = [1, 1]} : vector<4x16xbf16> to vector<2x16xbf16>
    %c6_78 = arith.constant 6 : index
    %c0_79 = arith.constant 0 : index
    %c0_80 = arith.constant 0 : index
    %90 = vector.load %arg2[%c6_78, %c0_79, %c0_80] : memref<9x16x8xbf16, #tpu.memory_space<vmem>>, vector<1x16x8xbf16>
    %91 = vector.shape_cast %90 : vector<1x16x8xbf16> to vector<16x8xbf16>
    %cst_81 = arith.constant dense<0.000000e+00> : vector<2x8xf32>
    %92 = tpu.matmul %89, %91, %cst_81 {dimension_numbers = #tpu.dot_dimension_numbers<[1], [0], [0], [1], [0, 0, 1, 1], [], []>} : vector<2x16xbf16>, vector<16x8xbf16>, vector<2x8xf32> -> vector<2x8xf32>
    %93 = arith.addf %86, %92 : vector<2x8xf32>
    %94 = vector.extract_strided_slice %88 {offsets = [1, 0], sizes = [2, 16], strides = [1, 1]} : vector<4x16xbf16> to vector<2x16xbf16>
    %c7_82 = arith.constant 7 : index
    %c0_83 = arith.constant 0 : index
    %c0_84 = arith.constant 0 : index
    %95 = vector.load %arg2[%c7_82, %c0_83, %c0_84] : memref<9x16x8xbf16, #tpu.memory_space<vmem>>, vector<1x16x8xbf16>
    %96 = vector.shape_cast %95 : vector<1x16x8xbf16> to vector<16x8xbf16>
    %cst_85 = arith.constant dense<0.000000e+00> : vector<2x8xf32>
    %97 = tpu.matmul %94, %96, %cst_85 {dimension_numbers = #tpu.dot_dimension_numbers<[1], [0], [0], [1], [0, 0, 1, 1], [], []>} : vector<2x16xbf16>, vector<16x8xbf16>, vector<2x8xf32> -> vector<2x8xf32>
    %98 = arith.addf %93, %97 : vector<2x8xf32>
    %99 = vector.extract_strided_slice %88 {offsets = [2, 0], sizes = [2, 16], strides = [1, 1]} : vector<4x16xbf16> to vector<2x16xbf16>
    %c8_86 = arith.constant 8 : index
    %c0_87 = arith.constant 0 : index
    %c0_88 = arith.constant 0 : index
    %100 = vector.load %arg2[%c8_86, %c0_87, %c0_88] : memref<9x16x8xbf16, #tpu.memory_space<vmem>>, vector<1x16x8xbf16>
    %101 = vector.shape_cast %100 : vector<1x16x8xbf16> to vector<16x8xbf16>
    %cst_89 = arith.constant dense<0.000000e+00> : vector<2x8xf32>
    %102 = tpu.matmul %99, %101, %cst_89 {dimension_numbers = #tpu.dot_dimension_numbers<[1], [0], [0], [1], [0, 0, 1, 1], [], []>} : vector<2x16xbf16>, vector<16x8xbf16>, vector<2x8xf32> -> vector<2x8xf32>
    %103 = arith.addf %98, %102 : vector<2x8xf32>
    %104 = arith.truncf %103 : vector<2x8xf32> to vector<2x8xbf16>
    %c0_90 = arith.constant 0 : index
    %c1_91 = arith.constant 1 : index
    %c0_92 = arith.constant 0 : index
    %c0_93 = arith.constant 0 : index
    %105 = vector.load %arg3[%c0_90, %c1_91, %c0_92, %c0_93] : memref<1x2x2x8xbf16, #tpu.memory_space<vmem>>, vector<1x1x2x8xbf16>
    %106 = vector.shape_cast %105 : vector<1x1x2x8xbf16> to vector<2x8xbf16>
    %107 = vector.shape_cast %104 : vector<2x8xbf16> to vector<1x1x2x8xbf16>
    tpu.vector_store %arg3[%c0_90, %c1_91, %c0_92, %c0_93], %107 {strides = array<i32>} : memref<1x2x2x8xbf16, #tpu.memory_space<vmem>>, vector<1x1x2x8xbf16>,
    return
  }
  func.func @transform_0(%arg0: i32) -> (i32, i32, i32, i32) {
    %c0_i32 = arith.constant 0 : i32
    %c0_i32_0 = arith.constant 0 : i32
    %c0_i32_1 = arith.constant 0 : i32
    %c0_i32_2 = arith.constant 0 : i32
    return %arg0, %c0_i32, %c0_i32_0, %c0_i32_1 : i32, i32, i32, i32
  }
  func.func @transform_1(%arg0: i32) -> (i32, i32, i32) {
    %c0_i32 = arith.constant 0 : i32
    %c0_i32_0 = arith.constant 0 : i32
    %c0_i32_1 = arith.constant 0 : i32
    %c0_i32_2 = arith.constant 0 : i32
    return %c0_i32, %c0_i32_0, %c0_i32_1 : i32, i32, i32
  }
  func.func @transform_2(%arg0: i32) -> (i32, i32, i32, i32) {
    %c0_i32 = arith.constant 0 : i32
    %c0_i32_0 = arith.constant 0 : i32
    %c0_i32_1 = arith.constant 0 : i32
    %c0_i32_2 = arith.constant 0 : i32
    return %arg0, %c0_i32, %c0_i32_0, %c0_i32_1 : i32, i32, i32, i32
  }
}

module attributes {stable_mosaic.version = 11 : i64} {
  func.func @kernel(%arg0: i32, %arg1: i32, %arg2: memref<8x16xbf16, #tpu.memory_space<vmem>>, %arg3: memref<16x16xbf16, #tpu.memory_space<vmem>>, %arg4: memref<1x16xf32, #tpu.memory_space<vmem>>, %arg5: memref<1x16xf32, #tpu.memory_space<vmem>>, %arg6: memref<8x8xbf16, #tpu.memory_space<vmem>>, %arg7: memref<8x16xbf16, #tpu.memory_space<vmem>>, %arg8: memref<1x8xf32, #tpu.memory_space<vmem>>, %arg9: memref<1x8xf32, #tpu.memory_space<vmem>>, %arg10: memref<1x16xf32, #tpu.memory_space<vmem>>, %arg11: memref<1x16xf32, #tpu.memory_space<vmem>>, %arg12: memref<8x16xbf16, #tpu.memory_space<vmem>>) attributes {dimension_semantics = [#tpu.dimension_semantics<parallel>, #tpu.dimension_semantics<parallel>], iteration_bounds = array<i64: 1, 1>, scalar_prefetch = 0 : i64, scratch_operands = 0 : i64, tpu.core_type = #tpu.core_type<tc>, window_params = [{transform_indices = @transform_0, window_bounds = array<i64: 8, 16>}, {transform_indices = @transform_1, window_bounds = array<i64: 16, 16>}, {pipeline_mode = #tpu.pipeline_mode<synchronous>, transform_indices = @transform_2, window_bounds = array<i64: 1, 16>}, {pipeline_mode = #tpu.pipeline_mode<synchronous>, transform_indices = @transform_3, window_bounds = array<i64: 1, 16>}, {transform_indices = @transform_4, window_bounds = array<i64: 8, 8>}, {transform_indices = @transform_5, window_bounds = array<i64: 8, 16>}, {pipeline_mode = #tpu.pipeline_mode<synchronous>, transform_indices = @transform_6, window_bounds = array<i64: 1, 8>}, {pipeline_mode = #tpu.pipeline_mode<synchronous>, transform_indices = @transform_7, window_bounds = array<i64: 1, 8>}, {transform_indices = @transform_8, window_bounds = array<i64: 1, 16>}, {transform_indices = @transform_9, window_bounds = array<i64: 1, 16>}, {transform_indices = @transform_10, window_bounds = array<i64: 8, 16>}]} {
    %c0 = arith.constant 0 : index
    %c0_0 = arith.constant 0 : index
    %0 = vector.load %arg2[%c0, %c0_0] : memref<8x16xbf16, #tpu.memory_space<vmem>>, vector<8x16xbf16>
    %1 = arith.extf %0 : vector<8x16xbf16> to vector<8x16xf32>
    %c0_1 = arith.constant 0 : index
    %c0_2 = arith.constant 0 : index
    %2 = vector.load %arg4[%c0_1, %c0_2] : memref<1x16xf32, #tpu.memory_space<vmem>>, vector<1x16xf32>
    %3 = vector.broadcast %2 : vector<1x16xf32> to vector<8x16xf32>
    %4 = arith.mulf %1, %3 : vector<8x16xf32>
    %c0_3 = arith.constant 0 : index
    %c0_4 = arith.constant 0 : index
    %5 = vector.load %arg5[%c0_3, %c0_4] : memref<1x16xf32, #tpu.memory_space<vmem>>, vector<1x16xf32>
    %6 = vector.broadcast %5 : vector<1x16xf32> to vector<8x16xf32>
    %7 = arith.addf %4, %6 : vector<8x16xf32>
    %cst = arith.constant 0.000000e+00 : f32
    %8 = vector.broadcast %cst : f32 to vector<8x16xf32>
    %9 = arith.maximumf %7, %8 : vector<8x16xf32>
    %10 = arith.truncf %9 : vector<8x16xf32> to vector<8x16xbf16>
    %c0_5 = arith.constant 0 : index
    %c0_6 = arith.constant 0 : index
    %11 = vector.load %arg3[%c0_5, %c0_6] : memref<16x16xbf16, #tpu.memory_space<vmem>>, vector<16x16xbf16>
    %cst_7 = arith.constant dense<0.000000e+00> : vector<8x16xf32>
    %12 = tpu.matmul %10, %11, %cst_7 {dimension_numbers = #tpu.dot_dimension_numbers<[1], [0], [0], [1], [0, 0, 1, 1], [], []>} : vector<8x16xbf16>, vector<16x16xbf16>, vector<8x16xf32> -> vector<8x16xf32>
    %c0_8 = arith.constant 0 : index
    %c0_9 = arith.constant 0 : index
    %13 = vector.load %arg6[%c0_8, %c0_9] : memref<8x8xbf16, #tpu.memory_space<vmem>>, vector<8x8xbf16>
    %14 = arith.extf %13 : vector<8x8xbf16> to vector<8x8xf32>
    %c0_10 = arith.constant 0 : index
    %c0_11 = arith.constant 0 : index
    %15 = vector.load %arg8[%c0_10, %c0_11] : memref<1x8xf32, #tpu.memory_space<vmem>>, vector<1x8xf32>
    %16 = vector.broadcast %15 : vector<1x8xf32> to vector<8x8xf32>
    %17 = arith.mulf %14, %16 : vector<8x8xf32>
    %c0_12 = arith.constant 0 : index
    %c0_13 = arith.constant 0 : index
    %18 = vector.load %arg9[%c0_12, %c0_13] : memref<1x8xf32, #tpu.memory_space<vmem>>, vector<1x8xf32>
    %19 = vector.broadcast %18 : vector<1x8xf32> to vector<8x8xf32>
    %20 = arith.addf %17, %19 : vector<8x8xf32>
    %cst_14 = arith.constant 0.000000e+00 : f32
    %21 = vector.broadcast %cst_14 : f32 to vector<8x8xf32>
    %22 = arith.maximumf %20, %21 : vector<8x8xf32>
    %23 = arith.truncf %22 : vector<8x8xf32> to vector<8x8xbf16>
    %c0_15 = arith.constant 0 : index
    %c0_16 = arith.constant 0 : index
    %24 = vector.load %arg7[%c0_15, %c0_16] : memref<8x16xbf16, #tpu.memory_space<vmem>>, vector<8x16xbf16>
    %cst_17 = arith.constant dense<0.000000e+00> : vector<8x16xf32>
    %25 = tpu.matmul %23, %24, %cst_17 {dimension_numbers = #tpu.dot_dimension_numbers<[1], [0], [0], [1], [0, 0, 1, 1], [], []>} : vector<8x8xbf16>, vector<8x16xbf16>, vector<8x16xf32> -> vector<8x16xf32>
    %26 = arith.addf %12, %25 : vector<8x16xf32>
    %c0_18 = arith.constant 0 : index
    %c0_19 = arith.constant 0 : index
    %27 = vector.load %arg10[%c0_18, %c0_19] : memref<1x16xf32, #tpu.memory_space<vmem>>, vector<1x16xf32>
    %28 = vector.broadcast %27 : vector<1x16xf32> to vector<8x16xf32>
    %29 = arith.mulf %26, %28 : vector<8x16xf32>
    %c0_20 = arith.constant 0 : index
    %c0_21 = arith.constant 0 : index
    %30 = vector.load %arg11[%c0_20, %c0_21] : memref<1x16xf32, #tpu.memory_space<vmem>>, vector<1x16xf32>
    %31 = vector.broadcast %30 : vector<1x16xf32> to vector<8x16xf32>
    %32 = arith.addf %29, %31 : vector<8x16xf32>
    %cst_22 = arith.constant 0.000000e+00 : f32
    %33 = vector.broadcast %cst_22 : f32 to vector<8x16xf32>
    %34 = arith.maximumf %32, %33 : vector<8x16xf32>
    %35 = arith.truncf %34 : vector<8x16xf32> to vector<8x16xbf16>
    %c0_23 = arith.constant 0 : index
    %c0_24 = arith.constant 0 : index
    %36 = vector.load %arg12[%c0_23, %c0_24] : memref<8x16xbf16, #tpu.memory_space<vmem>>, vector<8x16xbf16>
    tpu.vector_store %arg12[%c0_23, %c0_24], %35 {strides = array<i32>} : memref<8x16xbf16, #tpu.memory_space<vmem>>, vector<8x16xbf16>,
    return
  }
  func.func @transform_0(%arg0: i32, %arg1: i32) -> (i32, i32) {
    %c0_i32 = arith.constant 0 : i32
    %c0_i32_0 = arith.constant 0 : i32
    return %arg0, %c0_i32 : i32, i32
  }
  func.func @transform_1(%arg0: i32, %arg1: i32) -> (i32, i32) {
    %c0_i32 = arith.constant 0 : i32
    %c0_i32_0 = arith.constant 0 : i32
    return %c0_i32, %arg1 : i32, i32
  }
  func.func @transform_2(%arg0: i32, %arg1: i32) -> (i32, i32) {
    %c0_i32 = arith.constant 0 : i32
    %c0_i32_0 = arith.constant 0 : i32
    %c0_i32_1 = arith.constant 0 : i32
    return %c0_i32, %c0_i32_0 : i32, i32
  }
  func.func @transform_3(%arg0: i32, %arg1: i32) -> (i32, i32) {
    %c0_i32 = arith.constant 0 : i32
    %c0_i32_0 = arith.constant 0 : i32
    %c0_i32_1 = arith.constant 0 : i32
    return %c0_i32, %c0_i32_0 : i32, i32
  }
  func.func @transform_4(%arg0: i32, %arg1: i32) -> (i32, i32) {
    %c0_i32 = arith.constant 0 : i32
    %c0_i32_0 = arith.constant 0 : i32
    return %arg0, %c0_i32 : i32, i32
  }
  func.func @transform_5(%arg0: i32, %arg1: i32) -> (i32, i32) {
    %c0_i32 = arith.constant 0 : i32
    %c0_i32_0 = arith.constant 0 : i32
    return %c0_i32, %arg1 : i32, i32
  }
  func.func @transform_6(%arg0: i32, %arg1: i32) -> (i32, i32) {
    %c0_i32 = arith.constant 0 : i32
    %c0_i32_0 = arith.constant 0 : i32
    %c0_i32_1 = arith.constant 0 : i32
    return %c0_i32, %c0_i32_0 : i32, i32
  }
  func.func @transform_7(%arg0: i32, %arg1: i32) -> (i32, i32) {
    %c0_i32 = arith.constant 0 : i32
    %c0_i32_0 = arith.constant 0 : i32
    %c0_i32_1 = arith.constant 0 : i32
    return %c0_i32, %c0_i32_0 : i32, i32
  }
  func.func @transform_8(%arg0: i32, %arg1: i32) -> (i32, i32) {
    %c0_i32 = arith.constant 0 : i32
    %c0_i32_0 = arith.constant 0 : i32
    return %c0_i32, %arg1 : i32, i32
  }
  func.func @transform_9(%arg0: i32, %arg1: i32) -> (i32, i32) {
    %c0_i32 = arith.constant 0 : i32
    %c0_i32_0 = arith.constant 0 : i32
    return %c0_i32, %arg1 : i32, i32
  }
  func.func @transform_10(%arg0: i32, %arg1: i32) -> (i32, i32) {
    %c0_i32 = arith.constant 0 : i32
    return %arg0, %arg1 : i32, i32
  }
}

module attributes {stable_mosaic.version = 11 : i64} {
  func.func @kernel(%arg0: memref<2x4x16xbf16, #tpu.memory_space<vmem>>, %arg1: memref<1x1x16xf32, #tpu.memory_space<vmem>>, %arg2: memref<1x1x16xf32, #tpu.memory_space<vmem>>, %arg3: memref<16x128xbf16, #tpu.memory_space<vmem>>, %arg4: memref<2x4x8xbf16, #tpu.memory_space<vmem>>, %arg5: memref<1x1x8xf32, #tpu.memory_space<vmem>>, %arg6: memref<1x1x8xf32, #tpu.memory_space<vmem>>, %arg7: memref<8x128xbf16, #tpu.memory_space<vmem>>, %arg8: memref<2x4x8xbf16, #tpu.memory_space<vmem>>, %arg9: memref<1x1x8xf32, #tpu.memory_space<vmem>>, %arg10: memref<1x1x8xf32, #tpu.memory_space<vmem>>, %arg11: memref<8x128xbf16, #tpu.memory_space<vmem>>, %arg12: memref<1x128xf32, #tpu.memory_space<vmem>>, %arg13: memref<2x128xf32, #tpu.memory_space<vmem>>) attributes {dimension_semantics = [], scalar_prefetch = 0 : i64, scratch_operands = 0 : i64, tpu.core_type = #tpu.core_type<tc>} {
    %cst = arith.constant 0.000000e+00 : f32
    %0 = vector.broadcast %cst : f32 to vector<2x128xf32>
    %c0 = arith.constant 0 : index
    %c0_0 = arith.constant 0 : index
    %1 = vector.load %arg12[%c0, %c0_0] : memref<1x128xf32, #tpu.memory_space<vmem>>, vector<1x128xf32>
    %2 = vector.broadcast %1 : vector<1x128xf32> to vector<2x128xf32>
    %3 = arith.addf %0, %2 : vector<2x128xf32>
    %c0_1 = arith.constant 0 : index
    %c0_2 = arith.constant 0 : index
    %c0_3 = arith.constant 0 : index
    %4 = vector.load %arg0[%c0_1, %c0_2, %c0_3] : memref<2x4x16xbf16, #tpu.memory_space<vmem>>, vector<2x4x16xbf16>
    %5 = arith.extf %4 : vector<2x4x16xbf16> to vector<2x4x16xf32>
    %c0_4 = arith.constant 0 : index
    %c0_5 = arith.constant 0 : index
    %c0_6 = arith.constant 0 : index
    %6 = vector.load %arg1[%c0_4, %c0_5, %c0_6] : memref<1x1x16xf32, #tpu.memory_space<vmem>>, vector<1x1x16xf32>
    %7 = vector.broadcast %6 : vector<1x1x16xf32> to vector<2x4x16xf32>
    %8 = arith.mulf %5, %7 : vector<2x4x16xf32>
    %c0_7 = arith.constant 0 : index
    %c0_8 = arith.constant 0 : index
    %c0_9 = arith.constant 0 : index
    %9 = vector.load %arg2[%c0_7, %c0_8, %c0_9] : memref<1x1x16xf32, #tpu.memory_space<vmem>>, vector<1x1x16xf32>
    %10 = vector.broadcast %9 : vector<1x1x16xf32> to vector<2x4x16xf32>
    %11 = arith.addf %8, %10 : vector<2x4x16xf32>
    %cst_10 = arith.constant 0.000000e+00 : f32
    %12 = vector.broadcast %cst_10 : f32 to vector<2x4x16xf32>
    %13 = arith.maximumf %11, %12 : vector<2x4x16xf32>
    %cst_11 = arith.constant dense<0.000000e+00> : vector<2x16xf32>
    %14 = vector.multi_reduction <add>, %13, %cst_11 [1] : vector<2x4x16xf32> to vector<2x16xf32>
    %cst_12 = arith.constant 4.000000e+00 : f32
    %15 = vector.broadcast %cst_12 : f32 to vector<2x16xf32>
    %16 = arith.divf %14, %15 : vector<2x16xf32>
    %17 = arith.truncf %16 : vector<2x16xf32> to vector<2x16xbf16>
    %c0_13 = arith.constant 0 : index
    %c0_14 = arith.constant 0 : index
    %18 = vector.load %arg3[%c0_13, %c0_14] : memref<16x128xbf16, #tpu.memory_space<vmem>>, vector<16x128xbf16>
    %cst_15 = arith.constant dense<0.000000e+00> : vector<2x128xf32>
    %19 = tpu.matmul %17, %18, %cst_15 {dimension_numbers = #tpu.dot_dimension_numbers<[1], [0], [0], [1], [0, 0, 1, 1], [], []>} : vector<2x16xbf16>, vector<16x128xbf16>, vector<2x128xf32> -> vector<2x128xf32>
    %20 = arith.addf %3, %19 : vector<2x128xf32>
    %c0_16 = arith.constant 0 : index
    %c0_17 = arith.constant 0 : index
    %c0_18 = arith.constant 0 : index
    %21 = vector.load %arg4[%c0_16, %c0_17, %c0_18] : memref<2x4x8xbf16, #tpu.memory_space<vmem>>, vector<2x4x8xbf16>
    %22 = arith.extf %21 : vector<2x4x8xbf16> to vector<2x4x8xf32>
    %c0_19 = arith.constant 0 : index
    %c0_20 = arith.constant 0 : index
    %c0_21 = arith.constant 0 : index
    %23 = vector.load %arg5[%c0_19, %c0_20, %c0_21] : memref<1x1x8xf32, #tpu.memory_space<vmem>>, vector<1x1x8xf32>
    %24 = vector.broadcast %23 : vector<1x1x8xf32> to vector<2x4x8xf32>
    %25 = arith.mulf %22, %24 : vector<2x4x8xf32>
    %c0_22 = arith.constant 0 : index
    %c0_23 = arith.constant 0 : index
    %c0_24 = arith.constant 0 : index
    %26 = vector.load %arg6[%c0_22, %c0_23, %c0_24] : memref<1x1x8xf32, #tpu.memory_space<vmem>>, vector<1x1x8xf32>
    %27 = vector.broadcast %26 : vector<1x1x8xf32> to vector<2x4x8xf32>
    %28 = arith.addf %25, %27 : vector<2x4x8xf32>
    %cst_25 = arith.constant 0.000000e+00 : f32
    %29 = vector.broadcast %cst_25 : f32 to vector<2x4x8xf32>
    %30 = arith.maximumf %28, %29 : vector<2x4x8xf32>
    %cst_26 = arith.constant dense<0.000000e+00> : vector<2x8xf32>
    %31 = vector.multi_reduction <add>, %30, %cst_26 [1] : vector<2x4x8xf32> to vector<2x8xf32>
    %cst_27 = arith.constant 4.000000e+00 : f32
    %32 = vector.broadcast %cst_27 : f32 to vector<2x8xf32>
    %33 = arith.divf %31, %32 : vector<2x8xf32>
    %34 = arith.truncf %33 : vector<2x8xf32> to vector<2x8xbf16>
    %c0_28 = arith.constant 0 : index
    %c0_29 = arith.constant 0 : index
    %35 = vector.load %arg7[%c0_28, %c0_29] : memref<8x128xbf16, #tpu.memory_space<vmem>>, vector<8x128xbf16>
    %cst_30 = arith.constant dense<0.000000e+00> : vector<2x128xf32>
    %36 = tpu.matmul %34, %35, %cst_30 {dimension_numbers = #tpu.dot_dimension_numbers<[1], [0], [0], [1], [0, 0, 1, 1], [], []>} : vector<2x8xbf16>, vector<8x128xbf16>, vector<2x128xf32> -> vector<2x128xf32>
    %37 = arith.addf %20, %36 : vector<2x128xf32>
    %c0_31 = arith.constant 0 : index
    %c0_32 = arith.constant 0 : index
    %c0_33 = arith.constant 0 : index
    %38 = vector.load %arg8[%c0_31, %c0_32, %c0_33] : memref<2x4x8xbf16, #tpu.memory_space<vmem>>, vector<2x4x8xbf16>
    %39 = arith.extf %38 : vector<2x4x8xbf16> to vector<2x4x8xf32>
    %c0_34 = arith.constant 0 : index
    %c0_35 = arith.constant 0 : index
    %c0_36 = arith.constant 0 : index
    %40 = vector.load %arg9[%c0_34, %c0_35, %c0_36] : memref<1x1x8xf32, #tpu.memory_space<vmem>>, vector<1x1x8xf32>
    %41 = vector.broadcast %40 : vector<1x1x8xf32> to vector<2x4x8xf32>
    %42 = arith.mulf %39, %41 : vector<2x4x8xf32>
    %c0_37 = arith.constant 0 : index
    %c0_38 = arith.constant 0 : index
    %c0_39 = arith.constant 0 : index
    %43 = vector.load %arg10[%c0_37, %c0_38, %c0_39] : memref<1x1x8xf32, #tpu.memory_space<vmem>>, vector<1x1x8xf32>
    %44 = vector.broadcast %43 : vector<1x1x8xf32> to vector<2x4x8xf32>
    %45 = arith.addf %42, %44 : vector<2x4x8xf32>
    %cst_40 = arith.constant 0.000000e+00 : f32
    %46 = vector.broadcast %cst_40 : f32 to vector<2x4x8xf32>
    %47 = arith.maximumf %45, %46 : vector<2x4x8xf32>
    %cst_41 = arith.constant dense<0.000000e+00> : vector<2x8xf32>
    %48 = vector.multi_reduction <add>, %47, %cst_41 [1] : vector<2x4x8xf32> to vector<2x8xf32>
    %cst_42 = arith.constant 4.000000e+00 : f32
    %49 = vector.broadcast %cst_42 : f32 to vector<2x8xf32>
    %50 = arith.divf %48, %49 : vector<2x8xf32>
    %51 = arith.truncf %50 : vector<2x8xf32> to vector<2x8xbf16>
    %c0_43 = arith.constant 0 : index
    %c0_44 = arith.constant 0 : index
    %52 = vector.load %arg11[%c0_43, %c0_44] : memref<8x128xbf16, #tpu.memory_space<vmem>>, vector<8x128xbf16>
    %cst_45 = arith.constant dense<0.000000e+00> : vector<2x128xf32>
    %53 = tpu.matmul %51, %52, %cst_45 {dimension_numbers = #tpu.dot_dimension_numbers<[1], [0], [0], [1], [0, 0, 1, 1], [], []>} : vector<2x8xbf16>, vector<8x128xbf16>, vector<2x128xf32> -> vector<2x128xf32>
    %54 = arith.addf %37, %53 : vector<2x128xf32>
    %c0_46 = arith.constant 0 : index
    %c0_47 = arith.constant 0 : index
    %55 = vector.load %arg13[%c0_46, %c0_47] : memref<2x128xf32, #tpu.memory_space<vmem>>, vector<2x128xf32>
    tpu.vector_store %arg13[%c0_46, %c0_47], %54 {strides = array<i32>} : memref<2x128xf32, #tpu.memory_space<vmem>>, vector<2x128xf32>,
    return
  }
}

</mosaic_0001>

<bundles_post_ra>
// kernel: _lambda_.13
= control target key start
LH: loop header
LB: loop body
LE: loop exit
PB: predicated region body
PF: predicated region fallthrough
CT: control target
= control target key end

     0   :  { %s454_s6 = smov 0   ;;  %s557_s0 = inlined_call_operand.vmem [shape: bf16[2,10,5,32], index: 0, kind: input, shape index: {}]   ;;  %s558_s1 = inlined_call_operand.vmem [shape: bf16[2,4,4,16], index: 1, kind: output, shape index: {}]  }
   0x1 LB: > { %s400_s7 = sadd.s32 4294967295, %s441_s6   ;;  %p404_p0 = scmp.ge.s32.totalorder %s441_s6, 1  ;;  %s441_s6 = sphi %s454_s6, %s11_s6  }
   0x2   : > { %p87_p1 = scmp.lt.s32.totalorder %s441_s6, 3 }
   0x4   : > { %p88_p2 = pnand %p404_p0, %p87_p1 }
   0x5   : > { %p107_p3 = scmp.lt.s32.totalorder (!%p88_p2), %s400_s7, 1  ;;  %s443_s12 = smov (!%p88_p2), 112   ;;  %vm172_vm0 = vcmask (!%p88_p2), 123904  }
   0x6   : > { %91 = sbr.rel (%p88_p2) target bundleno = 160 (0xa0), region = 24 }
   0xd   : > { %s560_s7 = smov (!%p107_p3, %s400_s7), 1 }
   0xe   : > { %s425_s8 = smul.u32 40, %s560_s7  ;;  %s424_s13 = sshll.u32 %s560_s7, 3 }
   0xf   : > { %s116_s16 = scalar_lea.vmem %s558_s1, %s424_s13 }
  0x10   : > { %s111_s11 = scalar_lea.vmem %s557_s0, %s425_s8 }
  0x11   : > { %v468_v0 = vld [vmem:[%s111_s11 + $0x8] sm:$0x7]  ;;  %v470_v1 = vld [vmem:[%s111_s11] sm:$0x7]  ;;  %v474_v2 = vld [vmem:[%s111_s11 + $0xc] sm:$0x7] }
  0x12   : > { %176 = vrot.lane.b32.xlu1 %v468_v0, %s443_s12  ;;  %119 = vrot.lane.b32.xlu0 %v470_v1, %s443_s12  ;;  %v476_v3 = vld [vmem:[%s111_s11 + $0x4] sm:$0x7]  ;;  %v480_v4 = vld [vmem:[%s111_s11 + $0x14] sm:$0x7]  ;;  %v181_v12 = vshrl.u32 %v468_v0, 16  ;;  %v184_v13 = vshll.u32 %v468_v0, 16 }
  0x13   : > { %v482_v5 = vld [vmem:[%s111_s11 + $0x10] sm:$0x7]  ;;  %v486_v6 = vld [vmem:[%s111_s11 + $0x1c] sm:$0x7]  ;;  %v488_v7 = vld [vmem:[%s111_s11 + $0x18] sm:$0x7] }
  0x14   : > { %v492_v8 = vld [vmem:[%s111_s11 + $0x10] sm:$0x7]  ;;  %v494_v9 = vld [vmem:[%s111_s11 + $0x8] sm:$0x7]  ;;  %v498_v10 = vld [vmem:[%s111_s11 + $0x20] sm:$0x7] }
  0x15   : > { %v500_v11 = vld [vmem:[%s111_s11 + $0x18] sm:$0x7]  ;;  %v124_v14 = vshrl.u32 %v470_v1, 16  ;;  %v127_v15 = vshll.u32 %v470_v1, 16  ;;  %v199_v16 = vshrl.u32 %v474_v2, 16  ;;  %v202_v17 = vshll.u32 %v474_v2, 16 }
  0x16   : > { %194 = vrot.lane.b32.xlu1 %v474_v2, %s443_s12  ;;  %137 = vrot.lane.b32.xlu0 %v476_v3, %s443_s12  ;;  %v142_v18 = vshrl.u32 %v476_v3, 16  ;;  %v145_v19 = vshll.u32 %v476_v3, 16  ;;  %v256_v20 = vshrl.u32 %v480_v4, 16  ;;  %v259_v21 = vshll.u32 %v480_v4, 16 }
  0x17   : > { %v238_v22 = vshrl.u32 %v482_v5, 16  ;;  %v241_v23 = vshll.u32 %v482_v5, 16  ;;  %v183_v24 = vrot.slane %v181_v12, 4  ;;  %v186_v25 = vrot.slane %v184_v13, 5 }
  0x18   : > { %v126_v26 = vrot.slane %v124_v14, 4  ;;  %v129_v27 = vrot.slane %v127_v15, 5  ;;  %v313_v30 = vshrl.u32 %v486_v6, 16  ;;  %v316_v31 = vshll.u32 %v486_v6, 16 }
  0x19   : > { %v295_v32 = vshrl.u32 %v488_v7, 16  ;;  %v298_v33 = vshll.u32 %v488_v7, 16  ;;  %v201_v34 = vrot.slane %v199_v16, 4  ;;  %v204_v35 = vrot.slane %v202_v17, 5 }
  0x1a   : > { %251 = vrot.lane.b32.xlu1 %v480_v4, %s443_s12  ;;  %233 = vrot.lane.b32.xlu0 %v482_v5, %s443_s12  ;;  %v144_v36 = vrot.slane %v142_v18, 4  ;;  %v147_v37 = vrot.slane %v145_v19, 5  ;;  %v258_v38 = vrot.slane %v256_v20, 4  ;;  %v261_v39 = vrot.slane %v259_v21, 5 }
  0x1b   : > { %v240_v40 = vrot.slane %v238_v22, 4  ;;  %v243_v41 = vrot.slane %v241_v23, 5  ;;  %v218_v42 = vshrl.u32 %v492_v8, 16  ;;  %v221_v43 = vshll.u32 %v492_v8, 16 }
  0x1c   : > { %v161_v44 = vshrl.u32 %v494_v9, 16  ;;  %v164_v45 = vshll.u32 %v494_v9, 16  ;;  %v315_v48 = vrot.slane %v313_v30, 4  ;;  %v318_v49 = vrot.slane %v316_v31, 5 }
  0x1d   : > { %v297_v50 = vrot.slane %v295_v32, 4  ;;  %v300_v51 = vrot.slane %v298_v33, 5  ;;  %v332_v52 = vshrl.u32 %v498_v10, 16  ;;  %v335_v53 = vshll.u32 %v498_v10, 16 }
  0x1e   : > { %308 = vrot.lane.b32.xlu1 %v486_v6, %s443_s12  ;;  %290 = vrot.lane.b32.xlu0 %v488_v7, %s443_s12  ;;  %v275_v54 = vshrl.u32 %v500_v11, 16  ;;  %v278_v55 = vshll.u32 %v500_v11, 16  ;;  %v187_v56 = vor.u32 %v186_v25, %v183_v24  ;;  %v130_v57 = vor.u32 %v129_v27, %v126_v26 }
  0x1f   : > { %v205_v58 = vor.u32 %v204_v35, %v201_v34  ;;  %v148_v59 = vor.u32 %v147_v37, %v144_v36  ;;  %v220_v60 = vrot.slane %v218_v42, 4  ;;  %v223_v61 = vrot.slane %v221_v43, 5 }
  0x20   : > { %v163_v62 = vrot.slane %v161_v44, 4  ;;  %v166_v63 = vrot.slane %v164_v45, 5  ;;  %v262_v12 = vor.u32 %v261_v39, %v258_v38  ;;  %v244_v14 = vor.u32 %v243_v41, %v240_v40 }
  0x21   : > { %v319_v16 = vor.u32 %v318_v49, %v315_v48  ;;  %v301_v17 = vor.u32 %v300_v51, %v297_v50  ;;  %v334_v18 = vrot.slane %v332_v52, 4  ;;  %v337_v19 = vrot.slane %v335_v53, 5 }
  0x22   : > { %213 = vrot.lane.b32.xlu1 %v492_v8, %s443_s12  ;;  %156 = vrot.lane.b32.xlu0 %v494_v9, %s443_s12  ;;  %v277_v20 = vrot.slane %v275_v54, 4  ;;  %v280_v21 = vrot.slane %v278_v55, 5  ;;  %v206_v22 = vrot.slane %v205_v58, 4  ;;  %v149_v24 = vrot.slane %v148_v59, 4 }
  0x23   : > { %v188_v26 = vrot.slane %v187_v56, 4  ;;  %v131_v27 = vrot.slane %v130_v57, 4  ;;  %v224_v30 = vor.u32 %v223_v61, %v220_v60  ;;  %v167_v31 = vor.u32 %v166_v63, %v163_v62 }
  0x24   : > { %v263_v34 = vrot.slane %v262_v12, 4  ;;  %v245_v35 = vrot.slane %v244_v14, 4  ;;  %v320_v38 = vrot.slane %v319_v16, 4  ;;  %v338_v39 = vor.u32 %v337_v19, %v334_v18 }
  0x25   : > { %v281_v40 = vor.u32 %v280_v21, %v277_v20 }
  0x26   : > { %327 = vrot.lane.b32.xlu1 %v498_v10, %s443_s12  ;;  %270 = vrot.lane.b32.xlu0 %v500_v11, %s443_s12  ;;  %v339_v50 = vrot.slane %v338_v39, 4 }
  0x27   : > { %v282_v51 = vrot.slane %v281_v40, 4 }
  0x84   : > { %v516_v28 = vpop.permute.xlu1 %176  ;;  %v518_v29 = vpop.permute.xlu0 %119 }
  0x85   : > { %v179_v32 = vmax.bf16 %v468_v0, %v516_v28  ;;  %v122_v33 = vmax.bf16 %v518_v29, %v470_v1  ;;  %v225_v1 = vrot.slane %v224_v30, 4  ;;  %v168_v29 = vrot.slane %v167_v31, 4 }
  0x87   : > { %v190_v44 = vmax.bf16 %v188_v26, %v179_v32  ;;  %v133_v45 = vmax.bf16 %v131_v27, %v122_v33 }
  0x88   : > { %v195_v46 = vpop.permute.xlu1 %194  ;;  %v138_v47 = vpop.permute.xlu0 %137 }
  0x89   : > { %v197_v23 = vmax.bf16 %v474_v2, %v195_v46  ;;  %v140_v25 = vmax.bf16 %v476_v3, %v138_v47  ;;  %v302_v2 = vrot.slane %v301_v17, 4 }
  0x8b   : > { %v208_v3 = vmax.bf16 %v206_v22, %v197_v23  ;;  %v151_v41 = vmax.bf16 %v149_v24, %v140_v25 }
  0x8c   : > { %v252_v13 = vpop.permute.xlu1 %251  ;;  %v234_v15 = vpop.permute.xlu0 %233 }
  0x8d   : > { %v254_v42 = vmax.bf16 %v480_v4, %v252_v13  ;;  %v236_v43 = vmax.bf16 %v482_v5, %v234_v15  ;;  %v209_v4 = vmax.bf16 %v208_v3, %v190_v44  ;;  %v152_v52 = vmax.bf16 %v151_v41, %v133_v45 }
  0x8f   : > { %v265_v5 = vmax.bf16 %v263_v34, %v254_v42  ;;  %v247_v53 = vmax.bf16 %v245_v35, %v236_v43 }
  0x90   : > { %v309_v36 = vpop.permute.xlu1 %308  ;;  %v291_v37 = vpop.permute.xlu0 %290 }
  0x91   : > { %v311_v0 = vmax.bf16 %v486_v6, %v309_v36  ;;  %v293_v28 = vmax.bf16 %v488_v7, %v291_v37  ;;  %v266_v60 = vmax.bf16 %v265_v5, %v247_v53 }
  0x93   : > { %v322_v6 = vmax.bf16 %v320_v38, %v311_v0  ;;  %v304_v54 = vmax.bf16 %v302_v2, %v293_v28 }
  0x94   : > { %v214_v46 = vpop.permute.xlu1 %213  ;;  %v157_v47 = vpop.permute.xlu0 %156 }
  0x95   : > { %v216_v48 = vmax.bf16 %v492_v8, %v214_v46  ;;  %v159_v49 = vmax.bf16 %v494_v9, %v157_v47  ;;  %v323_v61 = vmax.bf16 %v322_v6, %v304_v54 }
  0x97   : > { %v227_v7 = vmax.bf16 %v225_v1, %v216_v48  ;;  %v170_v55 = vmax.bf16 %v168_v29, %v159_v49 }
  0x98   : > { %v328_v56 = vpop.permute.xlu1 %327  ;;  %v271_v57 = vpop.permute.xlu0 %270 }
  0x99   : > { %v228_v8 = vmax.bf16 %v227_v7, %v209_v4  ;;  %v171_v58 = vmax.bf16 %v170_v55, %v152_v52  ;;  %v330_v9 = vmax.bf16 %v498_v10, %v328_v56  ;;  %v273_v59 = vmax.bf16 %v500_v11, %v271_v57 }
  0x9b   : > { %413 = vst.msk [vmem:[%s116_s16 + $0x2] sm:$0x3] %vm172_vm0, %v228_v8  ;;  %173 = vst.msk [vmem:[%s116_s16] sm:$0x3] %vm172_vm0, %v171_v58  ;;  %v341_v62 = vmax.bf16 %v339_v50, %v330_v9  ;;  %v284_v63 = vmax.bf16 %v282_v51, %v273_v59 }
  0x9d   : > { %v342_v12 = vmax.bf16 %v341_v62, %v323_v61  ;;  %v285_v13 = vmax.bf16 %v284_v63, %v266_v60 }
  0x9f   : > { %421 = vst.msk [vmem:[%s116_s16 + $0x6] sm:$0x3] %vm172_vm0, %v342_v12  ;;  %417 = vst.msk [vmem:[%s116_s16 + $0x4] sm:$0x3] %vm172_vm0, %v285_v13 }
  0xa0 PF: > { %s11_s6 = sadd.s32 1, %s441_s6  }
  0xa1   : > { %p8_p4 = scmp.ge.s32.totalorder %s11_s6, 4  }
  0xa3   :  { %10 = sbr.rel (!%p8_p4) target bundleno = 1 (0x1), region = 65 }

// kernel: _lambda_.14
= control target key start
LH: loop header
LB: loop body
LE: loop exit
PB: predicated region body
PF: predicated region fallthrough
CT: control target
= control target key end

     0   :  { %s668_s21 = smov 0   ;;  %s670_s22 = smov 0   ;;  %s719_s0 = inlined_call_operand.vmem [shape: bf16[32,16], index: 0, kind: input, shape index: {}]   ;;  %s720_s1 = inlined_call_operand.vmem [shape: bf16[16,16], index: 1, kind: input, shape index: {}]   ;;  %s721_s2 = inlined_call_operand.vmem [shape: f32[1,16], index: 2, kind: input, shape index: {}, may-alias: {2,4}]   ;;  %s722_s3 = inlined_call_operand.vmem [shape: f32[1,16], index: 3, kind: input, shape index: {}, may-alias: {3,5}]   ;;  %s723_s4 = inlined_call_operand.vmem [shape: f32[1,16], index: 4, kind: input, shape index: {}, may-alias: {2,4}]   ;;  %s724_s5 = inlined_call_operand.vmem [shape: f32[1,16], index: 5, kind: input, shape index: {}, may-alias: {3,5}]   ;;  %s725_s6 = inlined_call_operand.vmem [shape: bf16[32,16], index: 6, kind: output, shape index: {}]  }
   0x1   :  { %s672_s23 = smov 0  }
   0x2 LB: > { %s28_s24 = sadd.s32 1, %s625_s22  ;;  %p551_p0 = scmp.ge.s32.totalorder %s629_s23, 1  ;;  %s629_s23 = sphi %s672_s23, %s16_s23   ;;  %s625_s22 = sphi %s670_s22, %s727_s22   ;;  %s621_s21 = sphi %s668_s21, %s726_s21  }
   0x3   : > { %p30_p1 = scmp.ge.s32.totalorder %s28_s24, 2  ;;  %p252_p2 = scmp.lt.s32.totalorder %s629_s23, 3 }
   0x5   : > { %s729_s24 = smov (%p30_p1, %s28_s24), 0  ;;  %p253_p3 = pnand %p551_p0, %p252_p2 }
   0x6   : > { %v606_v0 = vld [vmem:[%s720_s1] sm:$0xff] (!%p253_p3)   ;;  %v631_v1 = vmov (!%p253_p3), 0.0   ;;  %s552_s27 = sshll.u32 (!%p253_p3), %s621_s21, 1  ;;  %vm632_vm0 = vmmov (!%p253_p3), 0   ;;  %vm354_vm1 = vcmask (!%p253_p3), 130048   ;;  %vm427_vm2 = vcmask (!%p253_p3), 125952  }
   0x7   : > { %256 = sbr.rel (%p253_p3) target bundleno = 251 (0xfb), region = 44  ;;  %574 = vmatprep.subr.bf16.mxu0 (!%p253_p3), %v631_v1  ;;  %576 = vmatprep.mubr.msk.bf16.mxu0 (!%p253_p3), %vm632_vm0, %v631_v1  ;;  %p296_p4 = scmp.lt.s32.totalorder (!%p253_p3), %s552_s27, 3  ;;  %v556_v3 = vld [vmem:[%s721_s2] ss:$0 sm:$0xff] (!%p253_p3) }
   0x8   : > { %575 = vmatpush3.bf16.msra.mxu0 (!%p253_p3), %v606_v0  ;;  %v557_v6 = vld [vmem:[%s722_s3] ss:$0 sm:$0xff] (!%p253_p3) }
   0x9   : > { %v560_v14 = vld [vmem:[%s723_s4] ss:$0 sm:$0xff] (!%p253_p3) }
   0xa   : > { %v561_v16 = vld [vmem:[%s724_s5] ss:$0 sm:$0xff] (!%p253_p3) }
   0xe   : > { %s731_s27 = smov (!%p296_p4, %s552_s27), 3 }
   0xf   : > { %s553_s28 = sshll.u32 %s731_s27, 2 }
  0x10   : > { %s299_s7 = scalar_lea.vmem %s719_s0, %s553_s28  ;;  %s318_s18 = scalar_lea.vmem %s725_s6, %s553_s28 }
  0x11   : > { %v569_v2 = vld [vmem:[%s299_s7] sm:$0xff]  }
  0x12   : > { %v570_v4 = vunpack.c.l.bf16 %v569_v2  ;;  %v571_v5 = vunpack.c.h.bf16 %v569_v2 }
  0x14   : > { %v332_v7 = vmul.f32 %v570_v4, %v556_v3  ;;  %v333_v8 = vmul.f32 %v571_v5, %v556_v3 }
  0x16   : > { %v341_v9 = vadd.f32 %v557_v6, %v332_v7  ;;  %v342_v10 = vadd.f32 %v557_v6, %v333_v8 }
  0x18   : > { %v343_v11 = vmax.f32 %v341_v9, 0.0  ;;  %v344_v12 = vmax.f32 %v342_v10, 0.0 }
  0x1a   : > { %v345_v13 = vpack.c.bf16 %v344_v12, %v343_v11 }
  0x1c   : > { %577 = vmatmul.mubr.msk.bf16.vlgmr.msra.gmra.mrb[0].mxu0 %vm354_vm1, %v345_v13 }
  0xef   : > { %v392_v15 = vpop.f32.mrb[0].mxu0 }
  0xf0   : > { %v406_v17 = vmul.f32 %v560_v14, %v392_v15  ;;  %v578_v18 = vpop.f32.mrb[1].mxu0 }
  0xf1   : > { %v395_v19 = vpop.f32.mrb[2].mxu0 }
  0xf2   : > { %v415_v20 = vadd.f32 %v561_v16, %v406_v17  ;;  %v407_v21 = vmul.f32 %v560_v14, %v395_v19  ;;  %v579_v22 = vpop.f32.mrb[3].mxu0 }
  0xf4   : > { %v417_v23 = vmax.f32 %v415_v20, 0.0  ;;  %v416_v24 = vadd.f32 %v561_v16, %v407_v21 }
  0xf6   : > { %v566_v25 = vpack.c.bf16 %v417_v23, %v417_v23  ;;  %v418_v26 = vmax.f32 %v416_v24, 0.0 }
  0xf8   : > { %428 = vst.msk [vmem:[%s318_s18] sm:$0xf] %vm427_vm2, %v566_v25  ;;  %v567_v27 = vpack.c.bf16 %v418_v26, %v418_v26 }
  0xfa   : > { %429 = vst.msk [vmem:[%s318_s18 + $0x4] sm:$0xf] %vm427_vm2, %v567_v27 }
  0xfb PF: > { %s16_s23 = sadd.s32 1, %s629_s23   ;;  %s726_s21 = smov %s625_s22 }
  0xfc   : > { %p13_p5 = scmp.ge.s32.totalorder %s16_s23, 4   ;;  %s727_s22 = smov %s729_s24 }
  0xfe   :  { %15 = sbr.rel (!%p13_p5) target bundleno = 2 (0x2), region = 83 }

// kernel: _lambda_.12
= control target key start
LH: loop header
LB: loop body
LE: loop exit
PB: predicated region body
PF: predicated region fallthrough
CT: control target
= control target key end

     0   :  { %s919_s15 = smov 0   ;;  %s921_s16 = smov 0   ;;  %s1038_s0 = inlined_call_operand.vmem [shape: bf16[128,256], index: 0, kind: input, shape index: {}]   ;;  %s1039_s1 = inlined_call_operand.vmem [shape: bf16[256,16], index: 1, kind: input, shape index: {}]   ;;  %s1040_s2 = inlined_call_operand.vmem [shape: f32[1,16], index: 2, kind: input, shape index: {}]   ;;  %s1041_s3 = inlined_call_operand.vmem [shape: f32[1,16], index: 3, kind: input, shape index: {}]   ;;  %s1042_s4 = inlined_call_operand.vmem [shape: bf16[128,16], index: 4, kind: output, shape index: {}]  }
   0x1   :  { %s923_s17 = smov 0  }
   0x2 LB: > { %s26_s18 = sadd.s32 1, %s888_s16  ;;  %p711_p0 = scmp.ge.s32.totalorder %s892_s17, 1  ;;  %s892_s17 = sphi %s923_s17, %s14_s17   ;;  %s888_s16 = sphi %s921_s16, %s1044_s16   ;;  %s884_s15 = sphi %s919_s15, %s1043_s15  }
   0x3   : > { %p28_p1 = scmp.ge.s32.totalorder %s26_s18, 2  ;;  %p203_p2 = scmp.lt.s32.totalorder %s892_s17, 3 }
   0x5   : > { %s1046_s18 = smov (%p28_p1, %s26_s18), 0  ;;  %p204_p3 = pnand %p711_p0, %p203_p2 }
   0x6   : > { %v842_v0 = vld [vmem:[%s1039_s1 + $0x40] sm:$0xff] (!%p204_p3)   ;;  %s712_s21 = sshll.u32 (!%p204_p3), %s884_s15, 3  ;;  %v844_v2 = vld [vmem:[%s1039_s1 + $0x48] sm:$0xff] (!%p204_p3)   ;;  %v846_v4 = vld [vmem:[%s1039_s1 + $0x50] sm:$0xff] (!%p204_p3)   ;;  %vm581_vm0 = vcmask (!%p204_p3), 125952  }
   0x7   : > { %207 = sbr.rel (%p204_p3) target bundleno = 274 (0x112), region = 36  ;;  %v843_v1 = vld [vmem:[%s1039_s1] sm:$0xff] (!%p204_p3)   ;;  %762 = vmatprep.subr.bf16.mxu0 (!%p204_p3), %v842_v0  ;;  %802 = vmatprep.subr.bf16.mxu1 (!%p204_p3), %v842_v0  ;;  %v845_v3 = vld [vmem:[%s1039_s1 + $0x8] sm:$0xff] (!%p204_p3)   ;;  %p244_p4 = scmp.lt.s32.totalorder (!%p204_p3), %s712_s21, 15  ;;  %v847_v5 = vld [vmem:[%s1039_s1 + $0x10] sm:$0xff] (!%p204_p3)  }
   0x8   : > { %763 = vmatpush3.bf16.msra.mxu0 (!%p204_p3), %v843_v1  ;;  %810 = vmatpush3.bf16.msra.mxu1 (!%p204_p3), %v843_v1  ;;  %v848_v6 = vld [vmem:[%s1039_s1 + $0x58] sm:$0xff] (!%p204_p3)   ;;  %v850_v8 = vld [vmem:[%s1039_s1 + $0x60] sm:$0xff] (!%p204_p3)   ;;  %v852_v10 = vld [vmem:[%s1039_s1 + $0x68] sm:$0xff] (!%p204_p3)  }
   0x9   : > { %764 = vmatprep.subr.bf16.mxu0 (!%p204_p3), %v844_v2  ;;  %803 = vmatprep.subr.bf16.mxu1 (!%p204_p3), %v844_v2  ;;  %v849_v7 = vld [vmem:[%s1039_s1 + $0x18] sm:$0xff] (!%p204_p3)   ;;  %v851_v9 = vld [vmem:[%s1039_s1 + $0x20] sm:$0xff] (!%p204_p3)   ;;  %v853_v13 = vld [vmem:[%s1039_s1 + $0x28] sm:$0xff] (!%p204_p3)  }
   0xa   : > { %v854_v14 = vld [vmem:[%s1039_s1 + $0x70] sm:$0xff] (!%p204_p3)   ;;  %v856_v16 = vld [vmem:[%s1039_s1 + $0x78] sm:$0xff] (!%p204_p3)   ;;  %v741_v27 = vld [vmem:[%s1040_s2] ss:$0 sm:$0xff] (!%p204_p3) }
   0xb   : > { %v855_v15 = vld [vmem:[%s1039_s1 + $0x30] sm:$0xff] (!%p204_p3)   ;;  %v857_v17 = vld [vmem:[%s1039_s1 + $0x38] sm:$0xff] (!%p204_p3)   ;;  %v742_v33 = vld [vmem:[%s1041_s3] ss:$0 sm:$0xff] (!%p204_p3) }
   0xc   : > { %765 = vmatpush3.bf16.msra.mxu0 (!%p204_p3), %v845_v3  ;;  %811 = vmatpush3.bf16.msra.mxu1 (!%p204_p3), %v845_v3 }
   0xd   : > { %766 = vmatprep.subr.bf16.mxu0 (!%p204_p3), %v846_v4  ;;  %804 = vmatprep.subr.bf16.mxu1 (!%p204_p3), %v846_v4 }
   0xe   : > { %s1048_s21 = smov (!%p244_p4, %s712_s21), 15 }
   0xf   : > { %s753_s10 = sshll.u32 %s1048_s21, 3  ;;  %s716_s12 = sshll.u32 %s1048_s21, 2 }
  0x10   : > { %767 = vmatpush3.bf16.msra.mxu0 %v847_v5  ;;  %812 = vmatpush3.bf16.msra.mxu1 %v847_v5  ;;  %s970_s15 = scalar_lea.vmem %s1038_s0, %s753_s10 }
  0x11   : > { %768 = vmatprep.subr.bf16.mxu0 %v848_v6  ;;  %805 = vmatprep.subr.bf16.mxu1 %v848_v6  ;;  %v860_v11 = vld [vmem:[%s970_s15 + $0x4] ss:$8 sps:$4 sm:$0xff]   ;;  %v858_v18 = vld [vmem:[%s970_s15] ss:$8 sps:$4 sm:$0xff]   ;;  %v864_v20 = vld [vmem:[%s970_s15 + $0x14] ss:$8 sps:$4 sm:$0xff]  }
  0x12   : > { %v863_v12 = vld [vmem:[%s970_s15 + $0x24] ss:$8 sps:$4 sm:$0xff]   ;;  %478 = vmatprep.mubr.bf16.mxu0 %v860_v11  ;;  %v861_v19 = vld [vmem:[%s970_s15 + $0x20] ss:$8 sps:$4 sm:$0xff]   ;;  %v866_v21 = vld [vmem:[%s970_s15 + $0x34] ss:$8 sps:$4 sm:$0xff]  }
  0x13   : > { %494 = vmatprep.mubr.bf16.mxu1 %v863_v12  ;;  %v868_v22 = vld [vmem:[%s970_s15 + $0x10] ss:$8 sps:$4 sm:$0xff]  }
  0x14   : > { %769 = vmatpush3.bf16.msra.mxu0 %v849_v7  ;;  %813 = vmatpush3.bf16.msra.mxu1 %v849_v7  ;;  %v869_v23 = vld [vmem:[%s970_s15 + $0x30] ss:$8 sps:$4 sm:$0xff]   ;;  %s1011_s15 = scalar_lea.vmem %s1042_s4, %s716_s12 }
  0x15   : > { %770 = vmatprep.subr.bf16.mxu0 %v850_v8  ;;  %806 = vmatprep.subr.bf16.mxu1 %v850_v8 }
  0x18   : > { %771 = vmatpush3.bf16.msra.mxu0 %v851_v9  ;;  %814 = vmatpush3.bf16.msra.mxu1 %v851_v9 }
  0x19   : > { %772 = vmatprep.subr.bf16.mxu0 %v852_v10  ;;  %807 = vmatprep.subr.bf16.mxu1 %v852_v10 }
  0x1c   : > { %773 = vmatpush3.bf16.msra.mxu0 %v853_v13  ;;  %815 = vmatpush3.bf16.msra.mxu1 %v853_v13 }
  0x1d   : > { %774 = vmatprep.subr.bf16.mxu0 %v854_v14  ;;  %808 = vmatprep.subr.bf16.mxu1 %v854_v14 }
  0x20   : > { %775 = vmatpush3.bf16.msra.mxu0 %v855_v15  ;;  %816 = vmatpush3.bf16.msra.mxu1 %v855_v15 }
  0x21   : > { %776 = vmatprep.subr.bf16.mxu0 %v856_v16  ;;  %809 = vmatprep.subr.bf16.mxu1 %v856_v16 }
  0x24   : > { %777 = vmatpush3.bf16.msra.mxu0 %v857_v17  ;;  %817 = vmatpush3.bf16.msra.mxu1 %v857_v17 }
  0x27   : > { %479 = vmatmul.mubr.bf16.vlgmr.msra.gmra.mrb[0].mxu0 %v858_v18  ;;  %495 = vmatmul.mubr.bf16.vlgmr.msra.gmra.mrb[0].mxu1 %v861_v19 }
  0x28   : > { %486 = vmatprep.mubr.bf16.mxu0 %v864_v20  ;;  %502 = vmatprep.mubr.bf16.mxu1 %v866_v21 }
  0x2f   : > { %487 = vmatmul.mubr.bf16.gmra.mrb[4].mxu0 %v868_v22  ;;  %503 = vmatmul.mubr.bf16.gmra.mrb[4].mxu1 %v869_v23 }
  0xfa   : > { %v778_v24 = vpop.f32.mrb[0].mxu0  ;;  %v790_v25 = vpop.f32.mrb[0].mxu1 }
  0xfb   : > { %v779_v26 = vpop.f32.mrb[1].mxu0  ;;  %v791_v28 = vpop.f32.mrb[1].mxu1 }
  0xfc   : > { %v780_v29 = vadd.f32 %v779_v26, %v778_v24  ;;  %v792_v30 = vadd.f32 %v791_v28, %v790_v25  ;;  %v781_v31 = vpop.f32.mrb[2].mxu0  ;;  %v793_v32 = vpop.f32.mrb[2].mxu1 }
  0xfd   : > { %v782_v34 = vpop.f32.mrb[3].mxu0  ;;  %v794_v35 = vpop.f32.mrb[3].mxu1 }
  0xfe   : > { %v518_v36 = vmul.f32 %v780_v29, %v741_v27  ;;  %v522_v37 = vmul.f32 %v792_v30, %v741_v27  ;;  %v783_v38 = vadd.f32 %v782_v34, %v781_v31  ;;  %v795_v39 = vadd.f32 %v794_v35, %v793_v32 }
 0x100   : > { %v533_v40 = vadd.f32 %v742_v33, %v518_v36  ;;  %v537_v41 = vadd.f32 %v742_v33, %v522_v37  ;;  %v519_v42 = vmul.f32 %v783_v38, %v741_v27  ;;  %v523_v43 = vmul.f32 %v795_v39, %v741_v27 }
 0x102   : > { %v541_v44 = vmax.f32 %v533_v40, 0.0  ;;  %v545_v45 = vmax.f32 %v537_v41, 0.0  ;;  %v534_v46 = vadd.f32 %v742_v33, %v519_v42  ;;  %v538_v47 = vadd.f32 %v742_v33, %v523_v43  ;;  %v784_v48 = vpop.f32.mrb[4].mxu0  ;;  %v796_v49 = vpop.f32.mrb[4].mxu1 }
 0x103   : > { %v785_v50 = vpop.f32.mrb[5].mxu0  ;;  %v797_v51 = vpop.f32.mrb[5].mxu1 }
 0x104   : > { %v754_v52 = vpack.c.bf16 %v541_v44, %v541_v44  ;;  %v758_v53 = vpack.c.bf16 %v545_v45, %v545_v45  ;;  %v542_v54 = vmax.f32 %v534_v46, 0.0  ;;  %v546_v55 = vmax.f32 %v538_v47, 0.0  ;;  %v787_v56 = vpop.f32.mrb[6].mxu0  ;;  %v799_v57 = vpop.f32.mrb[6].mxu1 }
 0x105   : > { %v786_v58 = vadd.f32 %v785_v50, %v784_v48  ;;  %v798_v59 = vadd.f32 %v797_v51, %v796_v49  ;;  %v788_v60 = vpop.f32.mrb[7].mxu0  ;;  %v800_v61 = vpop.f32.mrb[7].mxu1 }
 0x106   : > { %582 = vst.msk [vmem:[%s1011_s15] sm:$0xf] %vm581_vm0, %v754_v52  ;;  %586 = vst.msk [vmem:[%s1011_s15 + $0x10] sm:$0xf] %vm581_vm0, %v758_v53  ;;  %v755_v62 = vpack.c.bf16 %v542_v54, %v542_v54  ;;  %v759_v63 = vpack.c.bf16 %v546_v55, %v546_v55  ;;  %v789_v0 = vadd.f32 %v788_v60, %v787_v56 }
 0x107   : > { %v801_v1 = vadd.f32 %v800_v61, %v799_v57  ;;  %v520_v2 = vmul.f32 %v786_v58, %v741_v27  ;;  %v524_v3 = vmul.f32 %v798_v59, %v741_v27 }
 0x108   : > { %583 = vst.msk [vmem:[%s1011_s15 + $0x4] sm:$0xf] %vm581_vm0, %v755_v62  ;;  %587 = vst.msk [vmem:[%s1011_s15 + $0x14] sm:$0xf] %vm581_vm0, %v759_v63  ;;  %v521_v4 = vmul.f32 %v789_v0, %v741_v27 }
 0x109   : > { %v525_v5 = vmul.f32 %v801_v1, %v741_v27  ;;  %v535_v6 = vadd.f32 %v742_v33, %v520_v2  ;;  %v539_v7 = vadd.f32 %v742_v33, %v524_v3 }
 0x10a   : > { %v536_v8 = vadd.f32 %v742_v33, %v521_v4 }
 0x10b   : > { %v540_v9 = vadd.f32 %v742_v33, %v525_v5  ;;  %v543_v10 = vmax.f32 %v535_v6, 0.0  ;;  %v547_v11 = vmax.f32 %v539_v7, 0.0 }
 0x10c   : > { %v544_v12 = vmax.f32 %v536_v8, 0.0 }
 0x10d   : > { %v548_v13 = vmax.f32 %v540_v9, 0.0  ;;  %v756_v14 = vpack.c.bf16 %v543_v10, %v543_v10  ;;  %v760_v15 = vpack.c.bf16 %v547_v11, %v547_v11 }
 0x10e   : > { %v757_v16 = vpack.c.bf16 %v544_v12, %v544_v12 }
 0x10f   : > { %v761_v17 = vpack.c.bf16 %v548_v13, %v548_v13  ;;  %584 = vst.msk [vmem:[%s1011_s15 + $0x8] sm:$0xf] %vm581_vm0, %v756_v14  ;;  %588 = vst.msk [vmem:[%s1011_s15 + $0x18] sm:$0xf] %vm581_vm0, %v760_v15 }
 0x110   : > { %585 = vst.msk [vmem:[%s1011_s15 + $0xc] sm:$0xf] %vm581_vm0, %v757_v16 }
 0x111   : > { %589 = vst.msk [vmem:[%s1011_s15 + $0x1c] sm:$0xf] %vm581_vm0, %v761_v17 }
 0x112 PF: > { %s14_s17 = sadd.s32 1, %s892_s17   ;;  %s1043_s15 = smov %s888_s16 }
 0x113   : > { %p11_p5 = scmp.ge.s32.totalorder %s14_s17, 4   ;;  %s1044_s16 = smov %s1046_s18 }
 0x115   :  { %13 = sbr.rel (!%p11_p5) target bundleno = 2 (0x2), region = 75 }

// kernel: _lambda_.16
= control target key start
LH: loop header
LB: loop body
LE: loop exit
PB: predicated region body
PF: predicated region fallthrough
CT: control target
= control target key end

     0   :  { %s957_s13 = smov 0   ;;  %s959_s14 = smov 0   ;;  %s1022_s0 = inlined_call_operand.vmem [shape: bf16[32,16], index: 0, kind: input, shape index: {}]   ;;  %s1023_s1 = inlined_call_operand.vmem [shape: bf16[16,16], index: 1, kind: input, shape index: {}]   ;;  %s1024_s2 = inlined_call_operand.vmem [shape: f32[1,16], index: 2, kind: input, shape index: {}, may-alias: {2,8}]   ;;  %s1025_s3 = inlined_call_operand.vmem [shape: f32[1,16], index: 3, kind: input, shape index: {}, may-alias: {3,9}]   ;;  %s1026_s4 = inlined_call_operand.vmem [shape: bf16[32,8], index: 4, kind: input, shape index: {}]   ;;  %s1027_s5 = inlined_call_operand.vmem [shape: bf16[8,16], index: 5, kind: input, shape index: {}]   ;;  %s1028_s6 = inlined_call_operand.vmem [shape: f32[1,8], index: 6, kind: input, shape index: {}]   ;;  %s1029_s7 = inlined_call_operand.vmem [shape: f32[1,8], index: 7, kind: input, shape index: {}]   ;;  %s1030_s8 = inlined_call_operand.vmem [shape: f32[1,16], index: 8, kind: input, shape index: {}, may-alias: {2,8}]   ;;  %s1031_s9 = inlined_call_operand.vmem [shape: f32[1,16], index: 9, kind: input, shape index: {}, may-alias: {3,9}]   ;;  %s1032_s10 = inlined_call_operand.vmem [shape: bf16[32,16], index: 10, kind: output, shape index: {}]  }
   0x1   :  { %s961_s15 = smov 0  }
   0x2 LB: > { %s32_s16 = sadd.s32 1, %s894_s14  ;;  %p801_p0 = scmp.ge.s32.totalorder %s898_s15, 1  ;;  %s898_s15 = sphi %s961_s15, %s20_s15   ;;  %s894_s14 = sphi %s959_s14, %s1034_s14   ;;  %s890_s13 = sphi %s957_s13, %s1033_s13  }
   0x3   : > { %p34_p1 = scmp.ge.s32.totalorder %s32_s16, 2  ;;  %p372_p2 = scmp.lt.s32.totalorder %s898_s15, 3 }
   0x5   : > { %s1036_s16 = smov (%p34_p1, %s32_s16), 0  ;;  %p373_p3 = pnand %p801_p0, %p372_p2 }
   0x6   : > { %v520_v0 = vld [vmem:[%s1027_s5] sm:$0xf] (!%p373_p3)  ;;  %vm525_vm0 = vcmask (!%p373_p3), 1043456   ;;  %v900_v1 = vmov (!%p373_p3), 0.0   ;;  %s802_s21 = sshll.u32 (!%p373_p3), %s890_s13, 1  ;;  %vm901_vm1 = vmmov (!%p373_p3), 0  }
   0x7   : > { %376 = sbr.rel (%p373_p3) target bundleno = 254 (0xfe), region = 60  ;;  %835 = vmatprep.subr.bf16.mxu1 (!%p373_p3), %v900_v1  ;;  %841 = vmatprep.subr.bf16.mxu0 (!%p373_p3), %v900_v1  ;;  %v527_v2 = vsel (!%p373_p3), %vm525_vm0, %v520_v0, 0  ;;  %v875_v3 = vld [vmem:[%s1023_s1] sm:$0xff] (!%p373_p3)   ;;  %p433_p4 = scmp.lt.s32.totalorder (!%p373_p3), %s802_s21, 3  ;;  %vm521_vm2 = vcmask (!%p373_p3), 64512   ;;  %vm576_vm3 = vcmask (!%p373_p3), 130048  }
   0x8   : > { %836 = vmatpush3.bf16.msra.mxu1 (!%p373_p3), %v527_v2  ;;  %837 = vmatprep.mubr.msk.bf16.mxu1 (!%p373_p3), %vm901_vm1, %v900_v1  ;;  %v810_v4 = vld [vmem:[%s1028_s6] ss:$0 sm:$0xff] (!%p373_p3)  ;;  %vm649_vm4 = vcmask (!%p373_p3), 125952  }
   0x9   : > { %842 = vmatpush3.bf16.msra.mxu0 (!%p373_p3), %v875_v3  ;;  %843 = vmatprep.mubr.msk.bf16.mxu0 (!%p373_p3), %vm901_vm1, %v900_v1  ;;  %v808_v7 = vld [vmem:[%s1024_s2] ss:$0 sm:$0xff] (!%p373_p3) }
   0xa   : > { %v811_v12 = vld [vmem:[%s1029_s7] ss:$0 sm:$0xff] (!%p373_p3) }
   0xb   : > { %v809_v13 = vld [vmem:[%s1025_s3] ss:$0 sm:$0xff] (!%p373_p3) }
   0xc   : > { %v815_v30 = vld [vmem:[%s1030_s8] ss:$0 sm:$0xff] (!%p373_p3) }
   0xd   : > { %v816_v34 = vld [vmem:[%s1031_s9] ss:$0 sm:$0xff] (!%p373_p3) }
   0xe   : > { %s1038_s21 = smov (!%p433_p4, %s802_s21), 3 }
   0xf   : > { %s981_s22 = sshll.u32 %s1038_s21, 2 }
  0x10   : > { %s446_s25 = scalar_lea.vmem %s1026_s4, %s981_s22  ;;  %s436_s30 = scalar_lea.vmem %s1022_s0, %s981_s22 }
  0x11   : > { %v828_v5 = vld [vmem:[%s446_s25] sm:$0xff]   ;;  %s465_s27 = scalar_lea.vmem %s1032_s10, %s981_s22 }
  0x12   : > { %v824_v6 = vld [vmem:[%s436_s30] sm:$0xff]   ;;  %v829_v8 = vunpack.c.l.bf16 %v828_v5  ;;  %v830_v9 = vunpack.c.h.bf16 %v828_v5 }
  0x13   : > { %v825_v10 = vunpack.c.l.bf16 %v824_v6  ;;  %v826_v11 = vunpack.c.h.bf16 %v824_v6 }
  0x14   : > { %v506_v14 = vmul.f32 %v829_v8, %v810_v4  ;;  %v507_v15 = vmul.f32 %v830_v9, %v810_v4 }
  0x15   : > { %v479_v16 = vmul.f32 %v825_v10, %v808_v7  ;;  %v480_v17 = vmul.f32 %v826_v11, %v808_v7 }
  0x16   : > { %v515_v18 = vadd.f32 %v811_v12, %v506_v14  ;;  %v516_v19 = vadd.f32 %v811_v12, %v507_v15 }
  0x17   : > { %v488_v20 = vadd.f32 %v809_v13, %v479_v16  ;;  %v489_v21 = vadd.f32 %v809_v13, %v480_v17 }
  0x18   : > { %v517_v22 = vmax.f32 %v515_v18, 0.0  ;;  %v518_v23 = vmax.f32 %v516_v19, 0.0 }
  0x19   : > { %v490_v24 = vmax.f32 %v488_v20, 0.0  ;;  %v491_v25 = vmax.f32 %v489_v21, 0.0 }
  0x1a   : > { %v519_v26 = vpack.c.bf16 %v518_v23, %v517_v22 }
  0x1b   : > { %v492_v27 = vpack.c.bf16 %v491_v25, %v490_v24 }
  0x1c   : > { %838 = vmatmul.mubr.msk.bf16.vlgmr.msra.gmra.mrb[0].mxu1 %vm521_vm2, %v519_v26 }
  0x1d   : > { %844 = vmatmul.mubr.msk.bf16.vlgmr.msra.gmra.mrb[0].mxu0 %vm576_vm3, %v492_v27 }
  0xef   : > { %v563_v28 = vpop.f32.mrb[0].mxu1 }
  0xf0   : > { %v614_v29 = vpop.f32.mrb[0].mxu0  ;;  %v839_v32 = vpop.f32.mrb[1].mxu1 }
  0xf1   : > { %v615_v31 = vadd.f32 %v614_v29, %v563_v28  ;;  %v845_v33 = vpop.f32.mrb[1].mxu0  ;;  %v566_v35 = vpop.f32.mrb[2].mxu1 }
  0xf2   : > { %v617_v36 = vpop.f32.mrb[2].mxu0  ;;  %v840_v39 = vpop.f32.mrb[3].mxu1 }
  0xf3   : > { %v628_v37 = vmul.f32 %v815_v30, %v615_v31  ;;  %v618_v38 = vadd.f32 %v617_v36, %v566_v35  ;;  %v846_v40 = vpop.f32.mrb[3].mxu0 }
  0xf5   : > { %v637_v41 = vadd.f32 %v816_v34, %v628_v37  ;;  %v629_v42 = vmul.f32 %v815_v30, %v618_v38 }
  0xf7   : > { %v639_v43 = vmax.f32 %v637_v41, 0.0  ;;  %v638_v44 = vadd.f32 %v816_v34, %v629_v42 }
  0xf9   : > { %v821_v45 = vpack.c.bf16 %v639_v43, %v639_v43  ;;  %v640_v46 = vmax.f32 %v638_v44, 0.0 }
  0xfb   : > { %650 = vst.msk [vmem:[%s465_s27] sm:$0xf] %vm649_vm4, %v821_v45  ;;  %v822_v47 = vpack.c.bf16 %v640_v46, %v640_v46 }
  0xfd   : > { %651 = vst.msk [vmem:[%s465_s27 + $0x4] sm:$0xf] %vm649_vm4, %v822_v47 }
  0xfe PF: > { %s20_s15 = sadd.s32 1, %s898_s15   ;;  %s1033_s13 = smov %s894_s14 }
  0xff   : > { %p17_p5 = scmp.ge.s32.totalorder %s20_s15, 4   ;;  %s1034_s14 = smov %s1036_s16 }
 0x101   :  { %19 = sbr.rel (!%p17_p5) target bundleno = 2 (0x2), region = 105 }

// kernel: _lambda_.19
= control target key start
LH: loop header
LB: loop body
LE: loop exit
PB: predicated region body
PF: predicated region fallthrough
CT: control target
= control target key end

     0   :  { %v137_v0 = vmov 0.0   ;;  %vm138_vm0 = vmmov 0   ;;  %vm52_vm1 = vcmask 130048   ;;  %vm114_vm2 = vcmask 125952   ;;  %s195_s1 = inlined_call_operand.vmem [shape: bf16[16,16], index: 1, kind: input, shape index: {}]   ;;  %s196_s0 = inlined_call_operand.vmem [shape: bf16[8,16], index: 0, kind: input, shape index: {}]   ;;  %s197_s2 = inlined_call_operand.vmem [shape: f32[1,16], index: 2, kind: input, shape index: {}, may-alias: {2,4}]   ;;  %s198_s3 = inlined_call_operand.vmem [shape: f32[1,16], index: 3, kind: input, shape index: {}, may-alias: {3,5}]   ;;  %s199_s4 = inlined_call_operand.vmem [shape: f32[1,16], index: 4, kind: input, shape index: {}, may-alias: {2,4}]   ;;  %s200_s5 = inlined_call_operand.vmem [shape: f32[1,16], index: 5, kind: input, shape index: {}, may-alias: {3,5}]   ;;  %s201_s6 = inlined_call_operand.vmem [shape: bf16[8,16], index: 6, kind: output, shape index: {}]  }
   0x1   :  { %128 = vmatprep.subr.bf16.mxu0 %v137_v0  ;;  %v136_v1 = vld [vmem:[%s195_s1] sm:$0xff]   ;;  %130 = vmatprep.mubr.msk.bf16.mxu0 %vm138_vm0, %v137_v0 }
   0x2   :  { %v24_v2 = vld [vmem:[%s196_s0] sm:$0xf]  ;;  %129 = vmatpush3.bf16.msra.mxu0 %v136_v1 }
   0x3   :  { %v120_v3 = vld [vmem:[%s197_s2] ss:$0 sm:$0xff]  ;;  %v25_v4 = vunpack.c.l.bf16 %v24_v2 }
   0x4   :  { %v121_v5 = vld [vmem:[%s198_s3] ss:$0 sm:$0xff] }
   0x5   :  { %v33_v6 = vmul.f32 %v120_v3, %v25_v4  ;;  %v124_v10 = vld [vmem:[%s199_s4] ss:$0 sm:$0xff] }
   0x6   :  { %v125_v12 = vld [vmem:[%s200_s5] ss:$0 sm:$0xff] }
   0x7   :  { %v41_v7 = vadd.f32 %v121_v5, %v33_v6 }
   0x9   :  { %v42_v8 = vmax.f32 %v41_v7, 0.0 }
   0xb   :  { %v43_v9 = vpack.c.bf16 %v42_v8, %v42_v8 }
   0xd   :  { %131 = vmatmul.mubr.msk.bf16.vlgmr.msra.gmra.mrb[0].mxu0 %vm52_vm1, %v43_v9 }
  0xe0   :  { %v90_v11 = vpop.f32.mrb[0].mxu0 }
  0xe1   :  { %v103_v13 = vmul.f32 %v124_v10, %v90_v11  ;;  %v132_v14 = vpop.f32.mrb[1].mxu0 }
  0xe2   :  { %v93_v15 = vpop.f32.mrb[2].mxu0 }
  0xe3   :  { %v111_v16 = vadd.f32 %v125_v12, %v103_v13  ;;  %v133_v17 = vpop.f32.mrb[3].mxu0 }
  0xe5   :  { %v112_v18 = vmax.f32 %v111_v16, 0.0 }
  0xe7   :  { %v113_v19 = vpack.c.bf16 %v112_v18, %v112_v18 }
  0xe9   :  { %115 = vst.msk [vmem:[%s201_s6] sm:$0xf] %vm114_vm2, %v113_v19 }

// kernel: _lambda_.15
= control target key start
LH: loop header
LB: loop body
LE: loop exit
PB: predicated region body
PF: predicated region fallthrough
CT: control target
= control target key end

     0   :  { %s2907_s9 = smov 0   ;;  %s3198_s0 = inlined_call_operand.vmem [shape: bf16[2,6,6,16], index: 0, kind: input, shape index: {}]   ;;  %s3199_s1 = inlined_call_operand.vmem [shape: bf16[9,16,8], index: 1, kind: input, shape index: {}]   ;;  %s3200_s2 = inlined_call_operand.vmem [shape: bf16[2,4,4,8], index: 2, kind: output, shape index: {}]  }
   0x1 LB: > { %s2234_s10 = sadd.s32 4294967295, %s2888_s9   ;;  %p2238_p0 = scmp.ge.s32.totalorder %s2888_s9, 1  ;;  %s2888_s9 = sphi %s2907_s9, %s12_s9  }
   0x2   : > { %p112_p1 = scmp.lt.s32.totalorder %s2888_s9, 3 }
   0x4   : > { %p113_p2 = pnand %p2238_p0, %p112_p1 }
   0x5   : > { %v2834_v0 = vld [vmem:[%s3199_s1 + $0x8] sm:$0xff] (!%p113_p2)   ;;  %v2890_v1 = vmov (!%p113_p2), 0.0   ;;  %vm2891_vm0 = vmmov (!%p113_p2), 0   ;;  %p134_p3 = scmp.lt.s32.totalorder (!%p113_p2), %s2234_s10, 1  ;;  %vm167_vm1 = vcmask (!%p113_p2), 130048   ;;  %v2837_v13 = vld [vmem:[%s3199_s1] sm:$0xff] (!%p113_p2)  }
   0x6   : > { %116 = sbr.rel (%p113_p2) target bundleno = 441 (0x1b9), region = 28  ;;  %2479 = vmatprep.subr.bf16.mxu0 (!%p113_p2), %v2890_v1  ;;  %2533 = vmatprep.subr.bf16.mxu1 (!%p113_p2), %v2890_v1  ;;  %v2835_v2 = vld [vmem:[%s3199_s1 + $0x8] sm:$0xff] (!%p113_p2)   ;;  %v2839_v14 = vld [vmem:[%s3199_s1] sm:$0xff] (!%p113_p2)   ;;  %v2840_v17 = vld [vmem:[%s3199_s1 + $0x10] sm:$0xff] (!%p113_p2)   ;;  %vm659_vm2 = vcmask (!%p113_p2), 58368  }
   0x7   : > { %2480 = vmatpush3.bf16.msra.mxu0 (!%p113_p2), %v2834_v0  ;;  %2481 = vmatprep.mubr.msk.bf16.mxu0 (!%p113_p2), %vm2891_vm0, %v2890_v1  ;;  %v2841_v18 = vld [vmem:[%s3199_s1 + $0x10] sm:$0xff] (!%p113_p2)   ;;  %v2842_v20 = vld [vmem:[%s3199_s1 + $0x18] sm:$0xff] (!%p113_p2)   ;;  %v2845_v27 = vld [vmem:[%s3199_s1 + $0x20] sm:$0xff] (!%p113_p2)  }
   0x8   : > { %2534 = vmatpush3.bf16.msra.mxu1 (!%p113_p2), %v2835_v2  ;;  %2485 = vmatprep.subr.bf16.mxu0 (!%p113_p2), %v2890_v1  ;;  %v2843_v22 = vld [vmem:[%s3199_s1 + $0x18] sm:$0xff] (!%p113_p2)   ;;  %v2847_v28 = vld [vmem:[%s3199_s1 + $0x20] sm:$0xff] (!%p113_p2)   ;;  %v2848_v37 = vld [vmem:[%s3199_s1 + $0x28] sm:$0xff] (!%p113_p2)  }
   0x9   : > { %2535 = vmatprep.mubr.msk.bf16.mxu1 (!%p113_p2), %vm2891_vm0, %v2890_v1  ;;  %2539 = vmatprep.subr.bf16.mxu1 (!%p113_p2), %v2890_v1  ;;  %v2849_v38 = vld [vmem:[%s3199_s1 + $0x28] sm:$0xff] (!%p113_p2)   ;;  %v2850_v41 = vld [vmem:[%s3199_s1 + $0x30] sm:$0xff] (!%p113_p2)   ;;  %v2853_v47 = vld [vmem:[%s3199_s1 + $0x38] sm:$0xff] (!%p113_p2)  }
   0xa   : > { %v2851_v42 = vld [vmem:[%s3199_s1 + $0x30] sm:$0xff] (!%p113_p2)   ;;  %v2855_v48 = vld [vmem:[%s3199_s1 + $0x38] sm:$0xff] (!%p113_p2)   ;;  %v2856_v57 = vld [vmem:[%s3199_s1 + $0x40] sm:$0xff] (!%p113_p2)  }
   0xb   : > { %v2857_v58 = vld [vmem:[%s3199_s1 + $0x40] sm:$0xff] (!%p113_p2)  }
   0xd   : > { %s3202_s10 = smov (!%p134_p3, %s2234_s10), 1 }
   0xe   : > { %s2823_s15 = smul.u32 24, %s3202_s10  ;;  %s2406_s8 = sshll.u32 %s3202_s10, 3 }
   0xf   : > { %s143_s13 = scalar_lea.vmem %s3200_s2, %s2406_s8 }
  0x10   : > { %s2935_s18 = scalar_lea.vmem %s3198_s0, %s2823_s15 }
  0x11   : > { %v145_v3 = vld [vmem:[%s2935_s18] sm:$0x7]  ;;  %v2281_v4 = vld [vmem:[%s2935_s18 + $0x4] sm:$0x7]  ;;  %v2293_v24 = vld [vmem:[%s2935_s18 + $0x8] sm:$0x7] }
  0x12   : > { %v2244_v5 = vcombine.low %v145_v3, %v145_v3  ;;  %v2284_v6 = vcombine.low %v2281_v4, %v2281_v4  ;;  %v2253_v23 = vld [vmem:[%s2935_s18 + $0x4] sm:$0x7]  ;;  %v2300_v26 = vcombine.low %v2293_v24, %v2293_v24  ;;  %v2267_v43 = vld [vmem:[%s2935_s18 + $0x8] sm:$0x7]  ;;  %v2307_v44 = vld [vmem:[%s2935_s18 + $0xc] sm:$0x7] }
  0x13   : > { %v2260_v25 = vcombine.low %v2253_v23, %v2253_v23  ;;  %v2274_v45 = vcombine.low %v2267_v43, %v2267_v43  ;;  %v2314_v46 = vcombine.low %v2307_v44, %v2307_v44  ;;  %v2322_v59 = vld [vmem:[%s2935_s18 + $0x8] sm:$0x7]  ;;  %v2363_v60 = vld [vmem:[%s2935_s18 + $0xc] sm:$0x7] }
  0x14   : > { %v155_v7 = vshrl.u32 %v2244_v5, 16  ;;  %v157_v8 = vshll.u32 %v2244_v5, 16  ;;  %v670_v9 = vshrl.u32 %v2284_v6, 16  ;;  %v672_v10 = vshll.u32 %v2284_v6, 16 }
  0x15   : > { %v263_v19 = vrot.slane %v2244_v5, 1  ;;  %v776_v21 = vrot.slane %v2284_v6, 1  ;;  %v378_v29 = vshll.u32 %v2260_v25, 16  ;;  %v888_v30 = vshll.u32 %v2300_v26, 16  ;;  %v2859_v5 = vld [vmem:[%s3199_s1 + $0x8] sm:$0xff]  }
  0x16   : > { %v159_v11 = vrot.slane %v157_v8, 1  ;;  %v674_v12 = vrot.slane %v672_v10, 1  ;;  %v376_v31 = vshrl.u32 %v2260_v25, 16  ;;  %v886_v33 = vshrl.u32 %v2300_v26, 16 }
  0x17   : > { %v380_v32 = vrot.slane %v378_v29, 1  ;;  %v890_v34 = vrot.slane %v888_v30, 1  ;;  %v435_v39 = vrot.slane %v2260_v25, 1  ;;  %v944_v40 = vrot.slane %v2300_v26, 1  ;;  %v2871_v25 = vld [vmem:[%s3199_s1 + $0x20] sm:$0xff]  }
  0x18   : > { %v160_v15 = vor.u32 %v159_v11, %v155_v7  ;;  %v675_v16 = vor.u32 %v674_v12, %v670_v9  ;;  %v550_v49 = vshll.u32 %v2274_v45, 16  ;;  %v1057_v50 = vshll.u32 %v2314_v46, 16  ;;  %v2861_v12 = vld [vmem:[%s3199_s1] sm:$0xff]  }
  0x19   : > { %v381_v35 = vor.u32 %v380_v32, %v376_v31  ;;  %v891_v36 = vor.u32 %v890_v34, %v886_v33  ;;  %v548_v51 = vshrl.u32 %v2274_v45, 16  ;;  %v1055_v53 = vshrl.u32 %v2314_v46, 16  ;;  %v2872_v34 = vld [vmem:[%s3199_s1 + $0x28] sm:$0xff]  }
  0x1a   : > { %2482 = vmatmul.mubr.msk.bf16.vlgmr.msra.gmra.mrb[0].mxu0 %vm167_vm1, %v160_v15  ;;  %2536 = vmatmul.mubr.msk.bf16.vlgmr.msra.gmra.mrb[0].mxu1 %vm167_vm1, %v675_v16  ;;  %v552_v52 = vrot.slane %v550_v49, 1  ;;  %v1059_v54 = vrot.slane %v1057_v50, 1  ;;  %v2325_v61 = vcombine.low %v2322_v59, %v2322_v59  ;;  %v2366_v62 = vcombine.low %v2363_v60, %v2363_v60  ;;  %v2865_v15 = vld [vmem:[%s3199_s1 + $0x10] sm:$0xff]  }
  0x1b   : > { %2486 = vmatpush3.bf16.msra.mxu0 %v2837_v13  ;;  %2540 = vmatpush3.bf16.msra.mxu1 %v2839_v14  ;;  %v607_v63 = vrot.slane %v2274_v45, 1  ;;  %v1113_v0 = vrot.slane %v2314_v46, 1  ;;  %v2863_v13 = vld [vmem:[%s3199_s1] sm:$0xff]   ;;  %v2864_v14 = vld [vmem:[%s3199_s1 + $0x10] sm:$0xff]   ;;  %v2879_v45 = vld [vmem:[%s3199_s1 + $0x38] sm:$0xff]  }
  0x1c   : > { %2487 = vmatprep.mubr.msk.bf16.mxu0 %vm2891_vm0, %v2890_v1  ;;  %2491 = vmatprep.subr.bf16.mxu0 %v2890_v1  ;;  %v553_v55 = vor.u32 %v552_v52, %v548_v51  ;;  %v1060_v56 = vor.u32 %v1059_v54, %v1055_v53  ;;  %v1178_v2 = vshll.u32 %v2325_v61, 16  ;;  %v1176_v6 = vshrl.u32 %v2325_v61, 16  ;;  %v2880_v54 = vld [vmem:[%s3199_s1 + $0x40] sm:$0xff]  }
  0x1d   : > { %2541 = vmatprep.mubr.msk.bf16.mxu1 %vm2891_vm0, %v2890_v1  ;;  %2545 = vmatprep.subr.bf16.mxu1 %v2890_v1  ;;  %v1682_v8 = vshrl.u32 %v2366_v62, 16  ;;  %v1282_v16 = vrot.slane %v2325_v61, 1 }
  0x1e   : > { %v1180_v7 = vrot.slane %v1178_v2, 1 }
  0x20   : > { %v1181_v10 = vor.u32 %v1180_v7, %v1176_v6 }
  0x26   : > { %2488 = vmatmul.mubr.msk.bf16.vlgmr.msra.gmra.mrb[0].mxu0 %vm167_vm1, %v145_v3  ;;  %2542 = vmatmul.mubr.msk.bf16.vlgmr.msra.gmra.mrb[0].mxu1 %vm167_vm1, %v2281_v4  ;;  %v1684_v3 = vshll.u32 %v2366_v62, 16  ;;  %v2858_v4 = vld [vmem:[%s3199_s1 + $0x8] sm:$0xff]  }
  0x27   : > { %2492 = vmatpush3.bf16.msra.mxu0 %v2840_v17  ;;  %2546 = vmatpush3.bf16.msra.mxu1 %v2841_v18  ;;  %v1788_v17 = vrot.slane %v2366_v62, 1  ;;  %v2866_v18 = vld [vmem:[%s3199_s1 + $0x18] sm:$0xff]  }
  0x28   : > { %2493 = vmatprep.mubr.msk.bf16.mxu0 %vm2891_vm0, %v2890_v1  ;;  %2497 = vmatprep.subr.bf16.mxu0 %v2890_v1  ;;  %v1686_v9 = vrot.slane %v1684_v3, 1 }
  0x29   : > { %2547 = vmatprep.mubr.msk.bf16.mxu1 %vm2891_vm0, %v2890_v1  ;;  %2551 = vmatprep.subr.bf16.mxu1 %v2890_v1 }
  0x2a   : > { %v1687_v11 = vor.u32 %v1686_v9, %v1682_v8 }
  0x32   : > { %2494 = vmatmul.mubr.msk.bf16.vlgmr.msra.gmra.mrb[0].mxu0 %vm167_vm1, %v263_v19  ;;  %2548 = vmatmul.mubr.msk.bf16.vlgmr.msra.gmra.mrb[0].mxu1 %vm167_vm1, %v776_v21  ;;  %v2867_v19 = vld [vmem:[%s3199_s1 + $0x18] sm:$0xff]   ;;  %v2375_v21 = vld [vmem:[%s2935_s18 + $0x10] sm:$0x7] }
  0x33   : > { %2498 = vmatpush3.bf16.msra.mxu0 %v2842_v20  ;;  %2552 = vmatpush3.bf16.msra.mxu1 %v2843_v22  ;;  %v2334_v20 = vld [vmem:[%s2935_s18 + $0xc] sm:$0x7] }
  0x34   : > { %2499 = vmatprep.mubr.msk.bf16.mxu0 %vm2891_vm0, %v2890_v1  ;;  %2503 = vmatprep.subr.bf16.mxu0 %v2890_v1  ;;  %v2341_v22 = vcombine.low %v2334_v20, %v2334_v20 }
  0x35   : > { %2553 = vmatprep.mubr.msk.bf16.mxu1 %vm2891_vm0, %v2890_v1  ;;  %2557 = vmatprep.subr.bf16.mxu1 %v2890_v1 }
  0x36   : > { %v1394_v26 = vshll.u32 %v2341_v22, 16 }
  0x38   : > { %v1396_v29 = vrot.slane %v1394_v26, 1 }
  0x3e   : > { %2500 = vmatmul.mubr.msk.bf16.vlgmr.msra.gmra.mrb[0].mxu0 %vm167_vm1, %v2253_v23  ;;  %2554 = vmatmul.mubr.msk.bf16.vlgmr.msra.gmra.mrb[0].mxu1 %vm167_vm1, %v2293_v24  ;;  %v2382_v23 = vcombine.low %v2375_v21, %v2375_v21  ;;  %v2869_v24 = vld [vmem:[%s3199_s1 + $0x20] sm:$0xff]  }
  0x3f   : > { %2504 = vmatpush3.bf16.msra.mxu0 %v2845_v27  ;;  %2558 = vmatpush3.bf16.msra.mxu1 %v2847_v28  ;;  %v1392_v28 = vshrl.u32 %v2341_v22, 16 }
  0x40   : > { %2505 = vmatprep.mubr.msk.bf16.mxu0 %vm2891_vm0, %v2890_v1  ;;  %2509 = vmatprep.subr.bf16.mxu0 %v2890_v1  ;;  %v1900_v27 = vshll.u32 %v2382_v23, 16  ;;  %v1898_v30 = vshrl.u32 %v2382_v23, 16 }
  0x41   : > { %2559 = vmatprep.mubr.msk.bf16.mxu1 %vm2891_vm0, %v2890_v1  ;;  %2563 = vmatprep.subr.bf16.mxu1 %v2890_v1  ;;  %v1397_v32 = vor.u32 %v1396_v29, %v1392_v28 }
  0x42   : > { %v1902_v31 = vrot.slane %v1900_v27, 1 }
  0x44   : > { %v1903_v33 = vor.u32 %v1902_v31, %v1898_v30 }
  0x4a   : > { %2506 = vmatmul.mubr.msk.bf16.vlgmr.msra.gmra.mrb[0].mxu0 %vm167_vm1, %v381_v35  ;;  %2560 = vmatmul.mubr.msk.bf16.vlgmr.msra.gmra.mrb[0].mxu1 %vm167_vm1, %v891_v36  ;;  %v2873_v35 = vld [vmem:[%s3199_s1 + $0x28] sm:$0xff]   ;;  %v1450_v36 = vrot.slane %v2341_v22, 1 }
  0x4b   : > { %2510 = vmatpush3.bf16.msra.mxu0 %v2848_v37  ;;  %2564 = vmatpush3.bf16.msra.mxu1 %v2849_v38  ;;  %v1956_v37 = vrot.slane %v2382_v23, 1  ;;  %v2874_v38 = vld [vmem:[%s3199_s1 + $0x30] sm:$0xff]  }
  0x4c   : > { %2511 = vmatprep.mubr.msk.bf16.mxu0 %vm2891_vm0, %v2890_v1  ;;  %2515 = vmatprep.subr.bf16.mxu0 %v2890_v1 }
  0x4d   : > { %2565 = vmatprep.mubr.msk.bf16.mxu1 %vm2891_vm0, %v2890_v1  ;;  %2569 = vmatprep.subr.bf16.mxu1 %v2890_v1 }
  0x56   : > { %2512 = vmatmul.mubr.msk.bf16.vlgmr.msra.gmra.mrb[0].mxu0 %vm167_vm1, %v435_v39  ;;  %2566 = vmatmul.mubr.msk.bf16.vlgmr.msra.gmra.mrb[0].mxu1 %vm167_vm1, %v944_v40  ;;  %v2875_v39 = vld [vmem:[%s3199_s1 + $0x30] sm:$0xff]  }
  0x57   : > { %2516 = vmatpush3.bf16.msra.mxu0 %v2850_v41  ;;  %2570 = vmatpush3.bf16.msra.mxu1 %v2851_v42  ;;  %v2348_v40 = vld [vmem:[%s2935_s18 + $0x10] sm:$0x7]  ;;  %v2389_v41 = vld [vmem:[%s2935_s18 + $0x14] sm:$0x7] }
  0x58   : > { %2517 = vmatprep.mubr.msk.bf16.mxu0 %vm2891_vm0, %v2890_v1  ;;  %2521 = vmatprep.subr.bf16.mxu0 %v2890_v1  ;;  %v2355_v42 = vcombine.low %v2348_v40, %v2348_v40 }
  0x59   : > { %2571 = vmatprep.mubr.msk.bf16.mxu1 %vm2891_vm0, %v2890_v1  ;;  %2575 = vmatprep.subr.bf16.mxu1 %v2890_v1 }
  0x5a   : > { %v1563_v46 = vshll.u32 %v2355_v42, 16 }
  0x5c   : > { %v1565_v49 = vrot.slane %v1563_v46, 1 }
  0x62   : > { %2518 = vmatmul.mubr.msk.bf16.vlgmr.msra.gmra.mrb[0].mxu0 %vm167_vm1, %v2267_v43  ;;  %2572 = vmatmul.mubr.msk.bf16.vlgmr.msra.gmra.mrb[0].mxu1 %vm167_vm1, %v2307_v44  ;;  %v2396_v43 = vcombine.low %v2389_v41, %v2389_v41  ;;  %v2877_v44 = vld [vmem:[%s3199_s1 + $0x38] sm:$0xff]  }
  0x63   : > { %2522 = vmatpush3.bf16.msra.mxu0 %v2853_v47  ;;  %2576 = vmatpush3.bf16.msra.mxu1 %v2855_v48  ;;  %v1561_v48 = vshrl.u32 %v2355_v42, 16 }
  0x64   : > { %2523 = vmatprep.mubr.msk.bf16.mxu0 %vm2891_vm0, %v2890_v1  ;;  %2527 = vmatprep.subr.bf16.mxu0 %v2890_v1  ;;  %v2069_v47 = vshll.u32 %v2396_v43, 16  ;;  %v2067_v50 = vshrl.u32 %v2396_v43, 16 }
  0x65   : > { %2577 = vmatprep.mubr.msk.bf16.mxu1 %vm2891_vm0, %v2890_v1  ;;  %2581 = vmatprep.subr.bf16.mxu1 %v2890_v1  ;;  %v1566_v52 = vor.u32 %v1565_v49, %v1561_v48 }
  0x66   : > { %v2071_v51 = vrot.slane %v2069_v47, 1 }
  0x68   : > { %v2072_v53 = vor.u32 %v2071_v51, %v2067_v50 }
  0x6e   : > { %2524 = vmatmul.mubr.msk.bf16.vlgmr.msra.gmra.mrb[0].mxu0 %vm167_vm1, %v553_v55  ;;  %2578 = vmatmul.mubr.msk.bf16.vlgmr.msra.gmra.mrb[0].mxu1 %vm167_vm1, %v1060_v56  ;;  %v2881_v55 = vld [vmem:[%s3199_s1 + $0x40] sm:$0xff]   ;;  %v1619_v56 = vrot.slane %v2355_v42, 1 }
  0x6f   : > { %2528 = vmatpush3.bf16.msra.mxu0 %v2856_v57  ;;  %2582 = vmatpush3.bf16.msra.mxu1 %v2857_v58  ;;  %v2125_v57 = vrot.slane %v2396_v43, 1 }
  0x70   : > { %2529 = vmatprep.mubr.msk.bf16.mxu0 %vm2891_vm0, %v2890_v1  ;;  %2583 = vmatprep.mubr.msk.bf16.mxu1 %vm2891_vm0, %v2890_v1 }
  0x71   : > { %2587 = vmatprep.subr.bf16.mxu0 %v2890_v1  ;;  %2641 = vmatprep.subr.bf16.mxu1 %v2890_v1 }
  0x7a   : > { %2530 = vmatmul.mubr.msk.bf16.vlgmr.msra.gmra.mrb[0].mxu0 %vm167_vm1, %v607_v63  ;;  %2584 = vmatmul.mubr.msk.bf16.vlgmr.msra.gmra.mrb[0].mxu1 %vm167_vm1, %v1113_v0 }
  0x7b   : > { %2588 = vmatpush3.bf16.msra.mxu0 %v2858_v4  ;;  %2642 = vmatpush3.bf16.msra.mxu1 %v2859_v5 }
  0x7c   : > { %2589 = vmatprep.mubr.msk.bf16.mxu0 %vm2891_vm0, %v2890_v1  ;;  %2593 = vmatprep.subr.bf16.mxu0 %v2890_v1 }
  0x7d   : > { %2643 = vmatprep.mubr.msk.bf16.mxu1 %vm2891_vm0, %v2890_v1  ;;  %2647 = vmatprep.subr.bf16.mxu1 %v2890_v1 }
  0x82   : > { %2590 = vmatmul.mubr.msk.bf16.vlgmr.msra.gmra.mrb[4].mxu0 %vm167_vm1, %v1181_v10  ;;  %2644 = vmatmul.mubr.msk.bf16.vlgmr.msra.gmra.mrb[4].mxu1 %vm167_vm1, %v1687_v11 }
  0x83   : > { %2594 = vmatpush3.bf16.msra.mxu0 %v2861_v12  ;;  %2648 = vmatpush3.bf16.msra.mxu1 %v2863_v13 }
  0x84   : > { %2595 = vmatprep.mubr.msk.bf16.mxu0 %vm2891_vm0, %v2890_v1  ;;  %2599 = vmatprep.subr.bf16.mxu0 %v2890_v1 }
  0x85   : > { %2649 = vmatprep.mubr.msk.bf16.mxu1 %vm2891_vm0, %v2890_v1  ;;  %2653 = vmatprep.subr.bf16.mxu1 %v2890_v1 }
  0x8e   : > { %2596 = vmatmul.mubr.msk.bf16.vlgmr.msra.gmra.mrb[4].mxu0 %vm167_vm1, %v2322_v59  ;;  %2650 = vmatmul.mubr.msk.bf16.vlgmr.msra.gmra.mrb[4].mxu1 %vm167_vm1, %v2363_v60 }
  0x8f   : > { %2600 = vmatpush3.bf16.msra.mxu0 %v2864_v14  ;;  %2654 = vmatpush3.bf16.msra.mxu1 %v2865_v15 }
  0x90   : > { %2601 = vmatprep.mubr.msk.bf16.mxu0 %vm2891_vm0, %v2890_v1  ;;  %2605 = vmatprep.subr.bf16.mxu0 %v2890_v1 }
  0x91   : > { %2655 = vmatprep.mubr.msk.bf16.mxu1 %vm2891_vm0, %v2890_v1  ;;  %2659 = vmatprep.subr.bf16.mxu1 %v2890_v1 }
  0x9a   : > { %2602 = vmatmul.mubr.msk.bf16.vlgmr.msra.gmra.mrb[4].mxu0 %vm167_vm1, %v1282_v16  ;;  %2656 = vmatmul.mubr.msk.bf16.vlgmr.msra.gmra.mrb[4].mxu1 %vm167_vm1, %v1788_v17 }
  0x9b   : > { %2606 = vmatpush3.bf16.msra.mxu0 %v2866_v18  ;;  %2660 = vmatpush3.bf16.msra.mxu1 %v2867_v19 }
  0x9c   : > { %2607 = vmatprep.mubr.msk.bf16.mxu0 %vm2891_vm0, %v2890_v1  ;;  %2611 = vmatprep.subr.bf16.mxu0 %v2890_v1 }
  0x9d   : > { %2661 = vmatprep.mubr.msk.bf16.mxu1 %vm2891_vm0, %v2890_v1  ;;  %2665 = vmatprep.subr.bf16.mxu1 %v2890_v1 }
  0xa6   : > { %2608 = vmatmul.mubr.msk.bf16.vlgmr.msra.gmra.mrb[4].mxu0 %vm167_vm1, %v2334_v20  ;;  %2662 = vmatmul.mubr.msk.bf16.vlgmr.msra.gmra.mrb[4].mxu1 %vm167_vm1, %v2375_v21 }
  0xa7   : > { %2612 = vmatpush3.bf16.msra.mxu0 %v2869_v24  ;;  %2666 = vmatpush3.bf16.msra.mxu1 %v2871_v25 }
  0xa8   : > { %2613 = vmatprep.mubr.msk.bf16.mxu0 %vm2891_vm0, %v2890_v1  ;;  %2617 = vmatprep.subr.bf16.mxu0 %v2890_v1 }
  0xa9   : > { %2667 = vmatprep.mubr.msk.bf16.mxu1 %vm2891_vm0, %v2890_v1  ;;  %2671 = vmatprep.subr.bf16.mxu1 %v2890_v1 }
  0xb2   : > { %2614 = vmatmul.mubr.msk.bf16.vlgmr.msra.gmra.mrb[4].mxu0 %vm167_vm1, %v1397_v32  ;;  %2668 = vmatmul.mubr.msk.bf16.vlgmr.msra.gmra.mrb[4].mxu1 %vm167_vm1, %v1903_v33 }
  0xb3   : > { %2618 = vmatpush3.bf16.msra.mxu0 %v2872_v34  ;;  %2672 = vmatpush3.bf16.msra.mxu1 %v2873_v35 }
  0xb4   : > { %2619 = vmatprep.mubr.msk.bf16.mxu0 %vm2891_vm0, %v2890_v1  ;;  %2623 = vmatprep.subr.bf16.mxu0 %v2890_v1 }
  0xb5   : > { %2673 = vmatprep.mubr.msk.bf16.mxu1 %vm2891_vm0, %v2890_v1  ;;  %2677 = vmatprep.subr.bf16.mxu1 %v2890_v1 }
  0xbe   : > { %2620 = vmatmul.mubr.msk.bf16.vlgmr.msra.gmra.mrb[4].mxu0 %vm167_vm1, %v1450_v36  ;;  %2674 = vmatmul.mubr.msk.bf16.vlgmr.msra.gmra.mrb[4].mxu1 %vm167_vm1, %v1956_v37 }
  0xbf   : > { %2624 = vmatpush3.bf16.msra.mxu0 %v2874_v38  ;;  %2678 = vmatpush3.bf16.msra.mxu1 %v2875_v39 }
  0xc0   : > { %2625 = vmatprep.mubr.msk.bf16.mxu0 %vm2891_vm0, %v2890_v1  ;;  %2629 = vmatprep.subr.bf16.mxu0 %v2890_v1 }
  0xc1   : > { %2679 = vmatprep.mubr.msk.bf16.mxu1 %vm2891_vm0, %v2890_v1  ;;  %2683 = vmatprep.subr.bf16.mxu1 %v2890_v1 }
  0xca   : > { %2626 = vmatmul.mubr.msk.bf16.vlgmr.msra.gmra.mrb[4].mxu0 %vm167_vm1, %v2348_v40  ;;  %2680 = vmatmul.mubr.msk.bf16.vlgmr.msra.gmra.mrb[4].mxu1 %vm167_vm1, %v2389_v41 }
  0xcb   : > { %2630 = vmatpush3.bf16.msra.mxu0 %v2877_v44  ;;  %2684 = vmatpush3.bf16.msra.mxu1 %v2879_v45 }
  0xcc   : > { %2631 = vmatprep.mubr.msk.bf16.mxu0 %vm2891_vm0, %v2890_v1  ;;  %2635 = vmatprep.subr.bf16.mxu0 %v2890_v1 }
  0xcd   : > { %2685 = vmatprep.mubr.msk.bf16.mxu1 %vm2891_vm0, %v2890_v1  ;;  %2689 = vmatprep.subr.bf16.mxu1 %v2890_v1 }
  0xd6   : > { %2632 = vmatmul.mubr.msk.bf16.vlgmr.msra.gmra.mrb[4].mxu0 %vm167_vm1, %v1566_v52  ;;  %2686 = vmatmul.mubr.msk.bf16.vlgmr.msra.gmra.mrb[4].mxu1 %vm167_vm1, %v2072_v53 }
  0xd7   : > { %2636 = vmatpush3.bf16.msra.mxu0 %v2880_v54  ;;  %2690 = vmatpush3.bf16.msra.mxu1 %v2881_v55 }
  0xd8   : > { %2637 = vmatprep.mubr.msk.bf16.mxu0 %vm2891_vm0, %v2890_v1  ;;  %2691 = vmatprep.mubr.msk.bf16.mxu1 %vm2891_vm0, %v2890_v1 }
  0xe2   : > { %2638 = vmatmul.mubr.msk.bf16.vlgmr.msra.gmra.mrb[4].mxu0 %vm167_vm1, %v1619_v56  ;;  %2692 = vmatmul.mubr.msk.bf16.vlgmr.msra.gmra.mrb[4].mxu1 %vm167_vm1, %v2125_v57 }
 0x14d   : > { %v651_v58 = vpop.f32.mrb[0].mxu0  ;;  %v1157_v59 = vpop.f32.mrb[0].mxu1 }
 0x14e   : > { %v658_v60 = vpack.c.bf16 %v651_v58, %v651_v58  ;;  %v1164_v61 = vpack.c.bf16 %v1157_v59, %v1157_v59  ;;  %v2531_v62 = vpop.f32.mrb[1].mxu0  ;;  %v2585_v63 = vpop.f32.mrb[1].mxu1 }
 0x14f   : > { %v654_v0 = vpop.f32.mrb[2].mxu0  ;;  %v1160_v1 = vpop.f32.mrb[2].mxu1 }
 0x150   : > { %660 = vst.msk [vmem:[%s143_s13] sm:$0x3] %vm659_vm2, %v658_v60  ;;  %2321 = vst.msk [vmem:[%s143_s13 + $0x2] sm:$0x3] %vm659_vm2, %v1164_v61  ;;  %v2532_v2 = vpop.f32.mrb[3].mxu0  ;;  %v2586_v3 = vpop.f32.mrb[3].mxu1 }
 0x1b5   : > { %v1663_v4 = vpop.f32.mrb[4].mxu0  ;;  %v2169_v5 = vpop.f32.mrb[4].mxu1 }
 0x1b6   : > { %v1670_v6 = vpack.c.bf16 %v1663_v4, %v1663_v4  ;;  %v2176_v7 = vpack.c.bf16 %v2169_v5, %v2169_v5  ;;  %v2639_v8 = vpop.f32.mrb[5].mxu0  ;;  %v2693_v9 = vpop.f32.mrb[5].mxu1 }
 0x1b7   : > { %v1666_v10 = vpop.f32.mrb[6].mxu0  ;;  %v2172_v11 = vpop.f32.mrb[6].mxu1 }
 0x1b8   : > { %2362 = vst.msk [vmem:[%s143_s13 + $0x4] sm:$0x3] %vm659_vm2, %v1670_v6  ;;  %2403 = vst.msk [vmem:[%s143_s13 + $0x6] sm:$0x3] %vm659_vm2, %v2176_v7  ;;  %v2640_v12 = vpop.f32.mrb[7].mxu0  ;;  %v2694_v13 = vpop.f32.mrb[7].mxu1 }
 0x1b9 PF: > { %s12_s9 = sadd.s32 1, %s2888_s9  }
 0x1ba   : > { %p9_p4 = scmp.ge.s32.totalorder %s12_s9, 4  }
 0x1bc   :  { %11 = sbr.rel (!%p9_p4) target bundleno = 1 (0x1), region = 74 }

// kernel: _lambda_.18
= control target key start
LH: loop header
LB: loop body
LE: loop exit
PB: predicated region body
PF: predicated region fallthrough
CT: control target
= control target key end

     0   :  { %s1411_s21 = smov 0   ;;  %s1651_s0 = inlined_call_operand.vmem [shape: bf16[2,4,2,32], index: 0, kind: input, shape index: {}]   ;;  %s1652_s1 = inlined_call_operand.vmem [shape: f32[1,16], index: 1, kind: input, shape index: {}]   ;;  %s1653_s2 = inlined_call_operand.vmem [shape: f32[1,16], index: 2, kind: input, shape index: {}]   ;;  %s1654_s3 = inlined_call_operand.vmem [shape: bf16[16,16], index: 3, kind: input, shape index: {}]   ;;  %s1655_s4 = inlined_call_operand.vmem [shape: bf16[2,4,2,16], index: 4, kind: input, shape index: {}]   ;;  %s1656_s5 = inlined_call_operand.vmem [shape: f32[1,8], index: 5, kind: input, shape index: {}, may-alias: {5,9}]   ;;  %s1657_s6 = inlined_call_operand.vmem [shape: f32[1,8], index: 6, kind: input, shape index: {}, may-alias: {6,10}]   ;;  %s1658_s7 = inlined_call_operand.vmem [shape: bf16[8,16], index: 7, kind: input, shape index: {}]   ;;  %s1659_s8 = inlined_call_operand.vmem [shape: bf16[2,4,2,16], index: 8, kind: input, shape index: {}]   ;;  %s1660_s9 = inlined_call_operand.vmem [shape: f32[1,8], index: 9, kind: input, shape index: {}, may-alias: {5,9}]   ;;  %s1661_s10 = inlined_call_operand.vmem [shape: f32[1,8], index: 10, kind: input, shape index: {}, may-alias: {6,10}]   ;;  %s1662_s11 = inlined_call_operand.vmem [shape: bf16[8,16], index: 11, kind: input, shape index: {}]   ;;  %s1663_s12 = inlined_call_operand.vmem [shape: bf16[2,2,2,16], index: 12, kind: output, shape index: {}]  }
   0x1 LB: > { %s1209_s22 = sadd.s32 4294967295, %s1337_s21   ;;  %p1213_p0 = scmp.ge.s32.totalorder %s1337_s21, 1  ;;  %s1337_s21 = sphi %s1411_s21, %s22_s21  }
   0x2   : > { %p379_p1 = scmp.lt.s32.totalorder %s1337_s21, 3 }
   0x4   : > { %p380_p2 = pnand %p1213_p0, %p379_p1 }
   0x5   : > { %v466_v0 = vlaneseq (!%p380_p2)  ;;  %v1339_v1 = vmov (!%p380_p2), 1983009808   ;;  %v1422_v5 = vld [vmem:[%s1656_s5] ss:$0 sm:$0xff] (!%p380_p2)  ;;  %s1340_s27 = smov (!%p380_p2), 8   ;;  %s1341_s14 = smov (!%p380_p2), 16  }
   0x6   : > { %383 = sbr.rel (%p380_p2) target bundleno = 503 (0x1f7), region = 68  ;;  %v464_v2 = vunpack.c.l.s4 (!%p380_p2), %v1339_v1  ;;  %v1427_v6 = vld [vmem:[%s1657_s6] ss:$0 sm:$0xff] (!%p380_p2)  ;;  %p427_p3 = scmp.lt.s32.totalorder (!%p380_p2), %s1209_s22, 1  ;;  %vm579_vm0 = vcmask (!%p380_p2), 1043456   ;;  %v1342_v27 = vmov (!%p380_p2), 0.0  }
   0x7   : > { %v467_v3 = vshrl.u32 (!%p380_p2), %v466_v0, 7  ;;  %v1434_v10 = vld [vmem:[%s1652_s1] ss:$0 sm:$0xff] (!%p380_p2)  ;;  %1262 = vmatprep.subr.bf16.mxu0 (!%p380_p2), %v1342_v27  ;;  %1280 = vmatprep.subr.bf16.mxu1 (!%p380_p2), %v1342_v27  ;;  %vm1343_vm1 = vmmov (!%p380_p2), 0   ;;  %s1344_s17 = smov (!%p380_p2), 120   ;;  %s1345_s18 = smov (!%p380_p2), 112  }
   0x8   : > { %v465_v4 = vunpack.c.0.s8 (!%p380_p2), %v464_v2  ;;  %v1440_v12 = vld [vmem:[%s1653_s2] ss:$0 sm:$0xff] (!%p380_p2)  ;;  %1264 = vmatprep.mubr.msk.bf16.mxu0 (!%p380_p2), %vm1343_vm1, %v1342_v27  ;;  %1282 = vmatprep.mubr.msk.bf16.mxu1 (!%p380_p2), %vm1343_vm1, %v1342_v27  ;;  %vm575_vm2 = vcmask (!%p380_p2), 64512   ;;  %vm629_vm3 = vcmask (!%p380_p2), 130048   ;;  %vm786_vm4 = vcmask (!%p380_p2), 122880  }
   0x9   : > { %v1446_v14 = vld [vmem:[%s1660_s9] ss:$0 sm:$0xff] (!%p380_p2) }
   0xa   : > { %v468_v7 = vsub.s32 (!%p380_p2), %v465_v4, %v467_v3  ;;  %v1452_v16 = vld [vmem:[%s1661_s10] ss:$0 sm:$0xff] (!%p380_p2) }
   0xb   : > { %v574_v24 = vld [vmem:[%s1658_s7] sm:$0xf] (!%p380_p2) }
   0xc   : > { %v535_v8 = vrot.slane (!%p380_p2), %v1422_v5, %v468_v7  ;;  %v546_v9 = vrot.slane (!%p380_p2), %v1427_v6, %v468_v7  ;;  %v469_v11 = vrot.slane (!%p380_p2), %v1434_v10, %v468_v7  ;;  %v480_v13 = vrot.slane (!%p380_p2), %v1440_v12, %v468_v7  ;;  %v920_v37 = vld [vmem:[%s1658_s7] sm:$0xf] (!%p380_p2) }
   0xd   : > { %v1042_v15 = vrot.slane %v1446_v14, %v468_v7  ;;  %v1053_v17 = vrot.slane %v1452_v16, %v468_v7  ;;  %s1665_s22 = smov (!%p427_p3, %s1209_s22), 1  ;;  %v581_v28 = vsel %vm579_vm0, %v574_v24, 0  ;;  %v925_v42 = vsel %vm579_vm0, %v920_v37, 0 }
   0xe   : > { %536 = vrot.lane.b32.xlu0 %v535_v8, %s1340_s27  ;;  %547 = vrot.lane.b32.xlu1 %v546_v9, %s1340_s27  ;;  %s1462_s19 = sshll.u32 %s1665_s22, 2  ;;  %s1217_s29 = sshll.u32 %s1665_s22, 1 }
   0xf   : > { %s434_s24 = scalar_lea.vmem %s1655_s4, %s1462_s19  ;;  %1263 = vmatpush3.bf16.msra.mxu0 %v581_v28  ;;  %s438_s16 = scalar_lea.vmem %s1659_s8, %s1462_s19  ;;  %1281 = vmatpush3.bf16.msra.mxu1 %v925_v42 }
  0x10   : > { %v1468_v18 = vld [vmem:[%s434_s24] sm:$0x1]  ;;  %v1470_v19 = vld [vmem:[%s434_s24 + $0x1] sm:$0x1]  ;;  %v1474_v22 = vld [vmem:[%s434_s24 + $0x2] sm:$0x1]  ;;  %1268 = vmatprep.subr.bf16.mxu0 %v1342_v27  ;;  %1286 = vmatprep.subr.bf16.mxu1 %v1342_v27 }
  0x11   : > { %v511_v20 = vunpack.c.l.bf16 %v1468_v18  ;;  %v559_v21 = vunpack.c.l.bf16 %v1470_v19  ;;  %v1476_v23 = vld [vmem:[%s434_s24 + $0x3] sm:$0x1]  ;;  %v857_v31 = vunpack.c.l.bf16 %v1474_v22  ;;  %v1531_v54 = vld [vmem:[%s438_s16 + $0x2] sm:$0x1]  ;;  %v1537_v59 = vld [vmem:[%s438_s16] sm:$0x1] }
  0x12   : > { %882 = vrot.lane.b32.xlu0 %v535_v8, %s1340_s27  ;;  %893 = vrot.lane.b32.xlu1 %v546_v9, %s1340_s27  ;;  %v905_v32 = vunpack.c.l.bf16 %v1476_v23  ;;  %v1539_v60 = vld [vmem:[%s438_s16 + $0x1] sm:$0x1]  ;;  %v1018_v1 = vunpack.c.l.bf16 %v1531_v54  ;;  %v1548_v2 = vld [vmem:[%s438_s16 + $0x3] sm:$0x1]  ;;  %v674_v3 = vunpack.c.l.bf16 %v1537_v59 }
  0x13   : > { %v722_v4 = vunpack.c.l.bf16 %v1539_v60  ;;  %v1330_v54 = vld [vmem:[%s1654_s3] sm:$0xff]  }
  0x16   : > { %470 = vrot.lane.b32.xlu0 %v469_v11, %s1341_s14  ;;  %815 = vrot.lane.b32.xlu1 %v469_v11, %s1341_s14 }
  0x1a   : > { %481 = vrot.lane.b32.xlu0 %v480_v13, %s1341_s14  ;;  %826 = vrot.lane.b32.xlu1 %v480_v13, %s1341_s14  ;;  %s442_s14 = scalar_lea.vmem %s1663_s12, %s1217_s29 }
  0x1e   : > { %1043 = vrot.lane.b32.xlu1 %v1042_v15, %s1340_s27  ;;  %699 = vrot.lane.b32.xlu0 %v1042_v15, %s1340_s27 }
  0x22   : > { %1054 = vrot.lane.b32.xlu1 %v1053_v17, %s1340_s27  ;;  %710 = vrot.lane.b32.xlu0 %v1053_v17, %s1340_s27  ;;  %s1482_s27 = scalar_lea.vmem %s1651_s0, %s1462_s19  ;;  %v1066_v17 = vunpack.c.l.bf16 %v1548_v2 }
  0x23   : > { %v1497_v33 = vld [vmem:[%s1482_s27] sm:$0x1]  ;;  %v1500_v34 = vld [vmem:[%s1482_s27 + $0x1] sm:$0x1]  ;;  %v1504_v36 = vld [vmem:[%s1482_s27 + $0x2] sm:$0x1] }
  0x24   : > { %v445_v41 = vunpack.c.l.bf16 %v1497_v33  ;;  %v493_v46 = vunpack.c.l.bf16 %v1500_v34  ;;  %v1521_v47 = vld [vmem:[%s1482_s27 + $0x3] sm:$0x1]  ;;  %v790_v48 = vunpack.c.l.bf16 %v1504_v36 }
  0x25   : > { %v838_v53 = vunpack.c.l.bf16 %v1521_v47  ;;  %v682_v47 = vmul.f32 %v1446_v14, %v674_v3 }
  0x26   : > { %v453_v19 = vmul.f32 %v1434_v10, %v445_v41  ;;  %v494_v22 = vmul.f32 %v1434_v10, %v493_v46 }
  0x27   : > { %v839_v33 = vmul.f32 %v1434_v10, %v838_v53 }
  0x80   : > { %v537_v25 = vpop.permute.xlu0 %536  ;;  %v548_v26 = vpop.permute.xlu1 %547 }
  0x81   : > { %v539_v29 = vmul.f32 %v537_v25, %v511_v20  ;;  %v564_v30 = vmul.f32 %v559_v21, %v537_v25 }
  0x83   : > { %v550_v35 = vadd.f32 %v548_v26, %v539_v29  ;;  %v565_v38 = vadd.f32 %v564_v30, %v548_v26 }
  0x84   : > { %v883_v39 = vpop.permute.xlu0 %882  ;;  %v894_v40 = vpop.permute.xlu1 %893 }
  0x85   : > { %v551_v43 = vmax.f32 %v550_v35, 0.0  ;;  %v885_v44 = vmul.f32 %v883_v39, %v857_v31  ;;  %v910_v45 = vmul.f32 %v905_v32, %v883_v39  ;;  %v566_v50 = vmax.f32 %v565_v38, 0.0 }
  0x87   : > { %v896_v49 = vadd.f32 %v894_v40, %v885_v44  ;;  %553 = vrot.lane.b32.xlu0 %v551_v43, %s1344_s17  ;;  %v911_v56 = vadd.f32 %v910_v45, %v894_v40 }
  0x88   : > { %v471_v51 = vpop.permute.xlu0 %470  ;;  %v816_v52 = vpop.permute.xlu1 %815 }
  0x89   : > { %v897_v55 = vmax.f32 %v896_v49, 0.0  ;;  %v473_v57 = vmul.f32 %v471_v51, %v445_v41  ;;  %v498_v58 = vmul.f32 %v493_v46, %v471_v51  ;;  %v818_v61 = vmul.f32 %v816_v52, %v790_v48 }
  0x8a   : > { %v843_v62 = vmul.f32 %v838_v53, %v816_v52  ;;  %v912_v7 = vmax.f32 %v911_v56, 0.0  ;;  %v560_v56 = vmul.f32 %v1422_v5, %v559_v21 }
  0x8b   : > { %899 = vrot.lane.b32.xlu1 %v897_v55, %s1344_s17  ;;  %568 = vrot.lane.b32.xlu0 %v566_v50, %s1344_s17  ;;  %v519_v55 = vmul.f32 %v1422_v5, %v511_v20 }
  0x8c   : > { %v482_v63 = vpop.permute.xlu0 %481  ;;  %v827_v0 = vpop.permute.xlu1 %826 }
  0x8d   : > { %v484_v8 = vadd.f32 %v482_v63, %v473_v57  ;;  %v499_v9 = vadd.f32 %v498_v58, %v482_v63  ;;  %v829_v11 = vadd.f32 %v827_v0, %v818_v61  ;;  %v844_v24 = vadd.f32 %v843_v62, %v827_v0 }
  0x8e   : > { %v527_v57 = vadd.f32 %v1427_v6, %v519_v55  ;;  %v865_v58 = vmul.f32 %v1422_v5, %v857_v31  ;;  %v906_v61 = vmul.f32 %v1422_v5, %v905_v32  ;;  %v561_v62 = vadd.f32 %v1427_v6, %v560_v56  ;;  %v737_v55 = vld [vmem:[%s1662_s11] sm:$0xf] }
  0x8f   : > { %v485_v13 = vmax.f32 %v484_v8, 0.0  ;;  %v830_v15 = vmax.f32 %v829_v11, 0.0  ;;  %914 = vrot.lane.b32.xlu1 %v912_v7, %s1344_s17  ;;  %v500_v28 = vmax.f32 %v499_v9, 0.0  ;;  %v845_v40 = vmax.f32 %v844_v24, 0.0  ;;  %v1329_v24 = vld [vmem:[%s1654_s3] sm:$0xff]  }
  0x90   : > { %v1044_v25 = vpop.permute.xlu1 %1043  ;;  %v700_v26 = vpop.permute.xlu0 %699  ;;  %v528_v63 = vmax.f32 %v527_v57, 0.0  ;;  %v873_v18 = vadd.f32 %v1427_v6, %v865_v58  ;;  %v562_v20 = vmax.f32 %v561_v62, 0.0  ;;  %v907_v21 = vadd.f32 %v1427_v6, %v906_v61 }
  0x91   : > { %487 = vrot.lane.b32.xlu0 %v485_v13, %s1345_s18  ;;  %v1046_v29 = vmul.f32 %v1044_v25, %v1018_v1  ;;  %v702_v30 = vmul.f32 %v700_v26, %v674_v3  ;;  %v727_v35 = vmul.f32 %v722_v4, %v700_v26  ;;  %v1071_v37 = vmul.f32 %v1066_v17, %v1044_v25 }
  0x92   : > { %v874_v31 = vmax.f32 %v873_v18, 0.0  ;;  %v798_v5 = vmul.f32 %v1434_v10, %v790_v48  ;;  %v461_v32 = vadd.f32 %v1440_v12, %v453_v19  ;;  %v908_v7 = vmax.f32 %v907_v21, 0.0  ;;  %v1081_v21 = vld [vmem:[%s1662_s11] sm:$0xf] }
  0x93   : > { %832 = vrot.lane.b32.xlu1 %v830_v15, %s1345_s18  ;;  %v495_v11 = vadd.f32 %v1440_v12, %v494_v22  ;;  %v840_v48 = vadd.f32 %v1440_v12, %v839_v33  ;;  %v723_v10 = vmul.f32 %v1446_v14, %v722_v4  ;;  %v1026_v25 = vmul.f32 %v1446_v14, %v1018_v1 }
  0x94   : > { %v1055_v38 = vpop.permute.xlu1 %1054  ;;  %v711_v39 = vpop.permute.xlu0 %710  ;;  %v806_v46 = vadd.f32 %v1440_v12, %v798_v5  ;;  %v462_v13 = vmax.f32 %v461_v32, 0.0  ;;  %v690_v4 = vadd.f32 %v1452_v16, %v682_v47  ;;  %v742_v62 = vsel %vm579_vm0, %v737_v55, 0 }
  0x95   : > { %502 = vrot.lane.b32.xlu0 %v500_v28, %s1345_s18  ;;  %v1057_v42 = vadd.f32 %v1055_v38, %v1046_v29  ;;  %v713_v43 = vadd.f32 %v711_v39, %v702_v30  ;;  %v728_v44 = vadd.f32 %v727_v35, %v711_v39  ;;  %v1072_v49 = vadd.f32 %v1071_v37, %v1055_v38 }
  0x96   : > { %v807_v28 = vmax.f32 %v806_v46, 0.0  ;;  %v496_v59 = vmax.f32 %v495_v11, 0.0  ;;  %v841_v60 = vmax.f32 %v840_v48, 0.0  ;;  %v1067_v35 = vmul.f32 %v1446_v14, %v1066_v17 }
  0x97   : > { %847 = vrot.lane.b32.xlu1 %v845_v40, %s1345_s18  ;;  %v1058_v45 = vmax.f32 %v1057_v42, 0.0  ;;  %v714_v50 = vmax.f32 %v713_v43, 0.0  ;;  %v729_v51 = vmax.f32 %v728_v44, 0.0  ;;  %v1073_v52 = vmax.f32 %v1072_v49, 0.0 }
  0x98   : > { %v1034_v1 = vadd.f32 %v1452_v16, %v1026_v25  ;;  %v724_v2 = vadd.f32 %v1452_v16, %v723_v10  ;;  %v691_v43 = vmax.f32 %v690_v4, 0.0 }
  0x99   : > { %716 = vrot.lane.b32.xlu0 %v714_v50, %s1344_s17 }
  0x9b   : > { %1060 = vrot.lane.b32.xlu1 %v1058_v45, %s1344_s17  ;;  %v1068_v45 = vadd.f32 %v1452_v16, %v1067_v35 }
  0x9d   : > { %731 = vrot.lane.b32.xlu0 %v729_v51, %s1344_s17  ;;  %v1035_v51 = vmax.f32 %v1034_v1, 0.0  ;;  %v1069_v61 = vmax.f32 %v1068_v45, 0.0 }
  0x9f   : > { %1075 = vrot.lane.b32.xlu1 %v1073_v52, %s1344_s17  ;;  %v725_v52 = vmax.f32 %v724_v2, 0.0 }
  0xf9   : > { %v554_v0 = vpop.permute.xlu0 %553 }
  0xfa   : > { %v556_v23 = vadd.f32 %v554_v0, %v528_v63 }
  0xfc   : > { %v563_v41 = vadd.f32 %v562_v20, %v556_v23 }
  0xfd   : > { %v900_v6 = vpop.permute.xlu1 %899  ;;  %v569_v8 = vpop.permute.xlu0 %568 }
  0xfe   : > { %v902_v9 = vadd.f32 %v900_v6, %v874_v31  ;;  %v571_v34 = vadd.f32 %v569_v8, %v563_v41  ;;  %v1086_v31 = vsel %vm579_vm0, %v1081_v21, 0 }
 0x100   : > { %v572_v36 = vmul.f32 0.25, %v571_v34  ;;  %v909_v15 = vadd.f32 %v908_v7, %v902_v9 }
 0x101   : > { %v915_v53 = vpop.permute.xlu1 %914 }
 0x102   : > { %v573_v26 = vpack.c.bf16 %v572_v36, %v572_v36  ;;  %v917_v12 = vadd.f32 %v915_v53, %v909_v15 }
 0x103   : > { %v488_v29 = vpop.permute.xlu0 %487 }
 0x104   : > { %v918_v3 = vmul.f32 0.25, %v917_v12  ;;  %v490_v30 = vadd.f32 %v488_v29, %v462_v13  ;;  %1265 = vmatmul.mubr.msk.bf16.vlgmr.msra.gmra.mrb[0].mxu0 %vm575_vm2, %v573_v26 }
 0x105   : > { %v833_v37 = vpop.permute.xlu1 %832  ;;  %1269 = vmatpush3.bf16.msra.mxu0 %v1329_v24  ;;  %1270 = vmatprep.mubr.msk.bf16.mxu0 %vm1343_vm1, %v1342_v27 }
 0x106   : > { %v919_v38 = vpack.c.bf16 %v918_v3, %v918_v3  ;;  %v835_v39 = vadd.f32 %v833_v37, %v807_v28  ;;  %v497_v40 = vadd.f32 %v496_v59, %v490_v30  ;;  %1274 = vmatprep.subr.bf16.mxu0 %v1342_v27 }
 0x107   : > { %v503_v42 = vpop.permute.xlu0 %502 }
 0x108   : > { %v505_v14 = vadd.f32 %v503_v42, %v497_v40  ;;  %1283 = vmatmul.mubr.msk.bf16.vlgmr.msra.gmra.mrb[0].mxu1 %vm575_vm2, %v919_v38  ;;  %v842_v17 = vadd.f32 %v841_v60, %v835_v39 }
 0x109   : > { %1287 = vmatpush3.bf16.msra.mxu1 %v1330_v54  ;;  %v848_v44 = vpop.permute.xlu1 %847  ;;  %1288 = vmatprep.mubr.msk.bf16.mxu1 %vm1343_vm1, %v1342_v27 }
 0x10a   : > { %v506_v49 = vmul.f32 0.25, %v505_v14  ;;  %v850_v50 = vadd.f32 %v848_v44, %v842_v17  ;;  %1292 = vmatprep.subr.bf16.mxu1 %v1342_v27 }
 0x10b   : > { %v717_v56 = vpop.permute.xlu0 %716 }
 0x10c   : > { %v719_v57 = vadd.f32 %v717_v56, %v691_v43  ;;  %v507_v63 = vpack.c.bf16 %v506_v49, %v506_v49  ;;  %v851_v18 = vmul.f32 0.25, %v850_v50 }
 0x10d   : > { %v1061_v58 = vpop.permute.xlu1 %1060 }
 0x10e   : > { %v1063_v16 = vadd.f32 %v1061_v58, %v1035_v51  ;;  %v726_v19 = vadd.f32 %v725_v52, %v719_v57  ;;  %v852_v0 = vpack.c.bf16 %v851_v18, %v851_v18 }
 0x10f   : > { %v732_v20 = vpop.permute.xlu0 %731 }
 0x110   : > { %1271 = vmatmul.mubr.msk.bf16.vlgmr.msra.gmra.mrb[0].mxu0 %vm629_vm3, %v507_v63  ;;  %v1070_v22 = vadd.f32 %v1069_v61, %v1063_v16  ;;  %v734_v23 = vadd.f32 %v732_v20, %v726_v19 }
 0x111   : > { %1275 = vmatpush3.bf16.msra.mxu0 %v742_v62  ;;  %1276 = vmatprep.mubr.msk.bf16.mxu0 %vm1343_vm1, %v1342_v27  ;;  %v1076_v5 = vpop.permute.xlu1 %1075 }
 0x112   : > { %v1078_v32 = vadd.f32 %v1076_v5, %v1070_v22  ;;  %v735_v33 = vmul.f32 0.25, %v734_v23 }
 0x114   : > { %1289 = vmatmul.mubr.msk.bf16.vlgmr.msra.gmra.mrb[0].mxu1 %vm629_vm3, %v852_v0  ;;  %v1079_v41 = vmul.f32 0.25, %v1078_v32  ;;  %v736_v7 = vpack.c.bf16 %v735_v33, %v735_v33 }
 0x115   : > { %1293 = vmatpush3.bf16.msra.mxu1 %v1086_v31  ;;  %1294 = vmatprep.mubr.msk.bf16.mxu1 %vm1343_vm1, %v1342_v27 }
 0x116   : > { %v1080_v6 = vpack.c.bf16 %v1079_v41, %v1079_v41 }
 0x11c   : > { %1277 = vmatmul.mubr.msk.bf16.vlgmr.msra.gmra.mrb[0].mxu0 %vm575_vm2, %v736_v7 }
 0x120   : > { %1295 = vmatmul.mubr.msk.bf16.vlgmr.msra.gmra.mrb[0].mxu1 %vm575_vm2, %v1080_v6 }
 0x1ef   : > { %v778_v8 = vpop.f32.mrb[0].mxu0 }
 0x1f0   : > { %v785_v9 = vpack.c.bf16 %v778_v8, %v778_v8  ;;  %v1278_v34 = vpop.f32.mrb[1].mxu0 }
 0x1f1   : > { %v781_v46 = vpop.f32.mrb[2].mxu0 }
 0x1f2   : > { %787 = vst.msk [vmem:[%s442_s14] sm:$0x1] %vm786_vm4, %v785_v9  ;;  %v1279_v27 = vpop.f32.mrb[3].mxu0 }
 0x1f3   : > { %v1122_v11 = vpop.f32.mrb[0].mxu1 }
 0x1f4   : > { %v1129_v13 = vpack.c.bf16 %v1122_v11, %v1122_v11  ;;  %v1296_v36 = vpop.f32.mrb[1].mxu1 }
 0x1f5   : > { %v1125_v15 = vpop.f32.mrb[2].mxu1 }
 0x1f6   : > { %1247 = vst.msk [vmem:[%s442_s14 + $0x1] sm:$0x1] %vm786_vm4, %v1129_v13  ;;  %v1297_v48 = vpop.f32.mrb[3].mxu1 }
 0x1f7 PF: > { %s22_s21 = sadd.s32 1, %s1337_s21  }
 0x1f8   : > { %p19_p4 = scmp.ge.s32.totalorder %s22_s21, 4  }
 0x1fa   :  { %21 = sbr.rel (!%p19_p4) target bundleno = 1 (0x1), region = 114 }

// kernel: _lambda_.21
= control target key start
LH: loop header
LB: loop body
LE: loop exit
PB: predicated region body
PF: predicated region fallthrough
CT: control target
= control target key end

     0   :  { %vm83_vm0 = vcmask 1043456   ;;  %v230_v0 = vmov 0.0   ;;  %vm231_vm1 = vmmov 0   ;;  %vm79_vm2 = vcmask 64512   ;;  %s320_s5 = inlined_call_operand.vmem [shape: bf16[8,16], index: 5, kind: input, shape index: {}]   ;;  %s321_s1 = inlined_call_operand.vmem [shape: bf16[16,16], index: 1, kind: input, shape index: {}]   ;;  %s322_s4 = inlined_call_operand.vmem [shape: bf16[8,8], index: 4, kind: input, shape index: {}]   ;;  %s323_s6 = inlined_call_operand.vmem [shape: f32[1,8], index: 6, kind: input, shape index: {}]   ;;  %s324_s0 = inlined_call_operand.vmem [shape: bf16[8,16], index: 0, kind: input, shape index: {}]   ;;  %s325_s2 = inlined_call_operand.vmem [shape: f32[1,16], index: 2, kind: input, shape index: {}, may-alias: {2,8}]   ;;  %s326_s7 = inlined_call_operand.vmem [shape: f32[1,8], index: 7, kind: input, shape index: {}]   ;;  %s327_s3 = inlined_call_operand.vmem [shape: f32[1,16], index: 3, kind: input, shape index: {}, may-alias: {3,9}]   ;;  %s328_s8 = inlined_call_operand.vmem [shape: f32[1,16], index: 8, kind: input, shape index: {}, may-alias: {2,8}]   ;;  %s329_s9 = inlined_call_operand.vmem [shape: f32[1,16], index: 9, kind: input, shape index: {}, may-alias: {3,9}]   ;;  %s330_s10 = inlined_call_operand.vmem [shape: bf16[8,16], index: 10, kind: output, shape index: {}]  }
   0x1   :  { %214 = vmatprep.subr.bf16.mxu1 %v230_v0  ;;  %220 = vmatprep.subr.bf16.mxu0 %v230_v0  ;;  %v78_v1 = vld [vmem:[%s320_s5] sm:$0xf]  ;;  %vm133_vm3 = vcmask 130048   ;;  %vm195_vm4 = vcmask 125952  }
   0x2   :  { %v85_v2 = vsel %vm83_vm0, %v78_v1, 0  ;;  %v229_v3 = vld [vmem:[%s321_s1] sm:$0xff]   ;;  %216 = vmatprep.mubr.msk.bf16.mxu1 %vm231_vm1, %v230_v0  ;;  %222 = vmatprep.mubr.msk.bf16.mxu0 %vm231_vm1, %v230_v0 }
   0x3   :  { %v58_v4 = vld [vmem:[%s322_s4] sm:$0xf]  ;;  %215 = vmatpush3.bf16.msra.mxu1 %v85_v2  ;;  %221 = vmatpush3.bf16.msra.mxu0 %v229_v3 }
   0x4   :  { %v203_v5 = vld [vmem:[%s323_s6] ss:$0 sm:$0xff]  ;;  %v59_v6 = vunpack.c.l.bf16 %v58_v4 }
   0x5   :  { %v36_v7 = vld [vmem:[%s324_s0] sm:$0xf] }
   0x6   :  { %v201_v8 = vld [vmem:[%s325_s2] ss:$0 sm:$0xff]  ;;  %v37_v10 = vunpack.c.l.bf16 %v36_v7  ;;  %v67_v11 = vmul.f32 %v203_v5, %v59_v6 }
   0x7   :  { %v204_v9 = vld [vmem:[%s326_s7] ss:$0 sm:$0xff] }
   0x8   :  { %v202_v12 = vld [vmem:[%s327_s3] ss:$0 sm:$0xff]  ;;  %v45_v13 = vmul.f32 %v201_v8, %v37_v10  ;;  %v75_v14 = vadd.f32 %v204_v9, %v67_v11 }
   0x9   :  { %v208_v22 = vld [vmem:[%s328_s8] ss:$0 sm:$0xff] }
   0xa   :  { %v53_v15 = vadd.f32 %v202_v12, %v45_v13  ;;  %v76_v16 = vmax.f32 %v75_v14, 0.0  ;;  %v209_v27 = vld [vmem:[%s329_s9] ss:$0 sm:$0xff] }
   0xc   :  { %v54_v17 = vmax.f32 %v53_v15, 0.0  ;;  %v77_v18 = vpack.c.bf16 %v76_v16, %v76_v16 }
   0xe   :  { %v55_v19 = vpack.c.bf16 %v54_v17, %v54_v17  ;;  %217 = vmatmul.mubr.msk.bf16.vlgmr.msra.gmra.mrb[0].mxu1 %vm79_vm2, %v77_v18 }
  0x10   :  { %223 = vmatmul.mubr.msk.bf16.vlgmr.msra.gmra.mrb[0].mxu0 %vm133_vm3, %v55_v19 }
  0xe1   :  { %v121_v20 = vpop.f32.mrb[0].mxu1 }
  0xe2   :  { %v218_v23 = vpop.f32.mrb[1].mxu1 }
  0xe3   :  { %v171_v21 = vpop.f32.mrb[0].mxu0  ;;  %v124_v26 = vpop.f32.mrb[2].mxu1 }
  0xe4   :  { %v172_v24 = vadd.f32 %v171_v21, %v121_v20  ;;  %v224_v25 = vpop.f32.mrb[1].mxu0  ;;  %v219_v29 = vpop.f32.mrb[3].mxu1 }
  0xe5   :  { %v174_v28 = vpop.f32.mrb[2].mxu0 }
  0xe6   :  { %v184_v30 = vmul.f32 %v208_v22, %v172_v24  ;;  %v225_v31 = vpop.f32.mrb[3].mxu0 }
  0xe8   :  { %v192_v32 = vadd.f32 %v209_v27, %v184_v30 }
  0xea   :  { %v193_v33 = vmax.f32 %v192_v32, 0.0 }
  0xec   :  { %v194_v34 = vpack.c.bf16 %v193_v33, %v193_v33 }
  0xee   :  { %196 = vst.msk [vmem:[%s330_s10] sm:$0xf] %vm195_vm4, %v194_v34 }

// kernel: _lambda_.20
= control target key start
LH: loop header
LB: loop body
LE: loop exit
PB: predicated region body
PF: predicated region fallthrough
CT: control target
= control target key end

     0   :  { %s1596_s9 = smov 0   ;;  %s1769_s0 = inlined_call_operand.vmem [shape: bf16[2,4,4,16], index: 0, kind: input, shape index: {}]   ;;  %s1770_s1 = inlined_call_operand.vmem [shape: bf16[9,16,8], index: 1, kind: input, shape index: {}]   ;;  %s1771_s2 = inlined_call_operand.vmem [shape: bf16[2,2,2,8], index: 2, kind: output, shape index: {}]  }
   0x1 LB: > { %s1248_s10 = sadd.s32 4294967295, %s1576_s9   ;;  %p1252_p0 = scmp.ge.s32.totalorder %s1576_s9, 1  ;;  %s1576_s9 = sphi %s1596_s9, %s12_s9  }
   0x2   : > { %p112_p1 = scmp.lt.s32.totalorder %s1576_s9, 3 }
   0x4   : > { %p113_p2 = pnand %p1252_p0, %p112_p1 }
   0x5   : > { %v1552_v0 = vld [vmem:[%s1770_s1 + $0x8] sm:$0xff] (!%p113_p2)   ;;  %v153_v1 = vlaneseq (!%p113_p2)  ;;  %v1578_v2 = vmov (!%p113_p2), 0.0   ;;  %vm1579_vm0 = vmmov (!%p113_p2), 0   ;;  %p133_p3 = scmp.lt.s32.totalorder (!%p113_p2), %s1248_s10, 1  ;;  %v1580_v5 = vmov (!%p113_p2), 1983009808  }
   0x6   : > { %116 = sbr.rel (%p113_p2) target bundleno = 336 (0x150), region = 28  ;;  %1369 = vmatprep.subr.bf16.mxu0 (!%p113_p2), %v1578_v2  ;;  %1423 = vmatprep.subr.bf16.mxu1 (!%p113_p2), %v1578_v2  ;;  %v1553_v3 = vld [vmem:[%s1770_s1 + $0x8] sm:$0xff] (!%p113_p2)   ;;  %v151_v6 = vunpack.c.l.s4 (!%p113_p2), %v1580_v5  ;;  %v1554_v18 = vld [vmem:[%s1770_s1] sm:$0xff] (!%p113_p2)   ;;  %vm170_vm1 = vcmask (!%p113_p2), 130048   ;;  %v1556_v27 = vld [vmem:[%s1770_s1 + $0x10] sm:$0xff] (!%p113_p2)   ;;  %vm672_vm2 = vcmask (!%p113_p2), 57344  }
   0x7   : > { %1370 = vmatpush3.bf16.msra.mxu0 (!%p113_p2), %v1552_v0  ;;  %1371 = vmatprep.mubr.msk.bf16.mxu0 (!%p113_p2), %vm1579_vm0, %v1578_v2  ;;  %v154_v4 = vshrl.u32 (!%p113_p2), %v153_v1, 7  ;;  %v1555_v20 = vld [vmem:[%s1770_s1] sm:$0xff] (!%p113_p2)   ;;  %v1557_v28 = vld [vmem:[%s1770_s1 + $0x10] sm:$0xff] (!%p113_p2)   ;;  %v1558_v31 = vld [vmem:[%s1770_s1 + $0x18] sm:$0xff] (!%p113_p2)  }
   0x8   : > { %1424 = vmatpush3.bf16.msra.mxu1 (!%p113_p2), %v1553_v3  ;;  %1375 = vmatprep.subr.bf16.mxu0 (!%p113_p2), %v1578_v2  ;;  %v152_v7 = vunpack.c.0.s8 (!%p113_p2), %v151_v6  ;;  %v1559_v32 = vld [vmem:[%s1770_s1 + $0x18] sm:$0xff] (!%p113_p2)   ;;  %v1560_v37 = vld [vmem:[%s1770_s1 + $0x20] sm:$0xff] (!%p113_p2)   ;;  %v1562_v47 = vld [vmem:[%s1770_s1 + $0x28] sm:$0xff] (!%p113_p2)  }
   0x9   : > { %1425 = vmatprep.mubr.msk.bf16.mxu1 (!%p113_p2), %vm1579_vm0, %v1578_v2  ;;  %1429 = vmatprep.subr.bf16.mxu1 (!%p113_p2), %v1578_v2  ;;  %v1561_v38 = vld [vmem:[%s1770_s1 + $0x20] sm:$0xff] (!%p113_p2)   ;;  %v1563_v48 = vld [vmem:[%s1770_s1 + $0x28] sm:$0xff] (!%p113_p2)   ;;  %v1564_v51 = vld [vmem:[%s1770_s1 + $0x30] sm:$0xff] (!%p113_p2)  }
   0xa   : > { %v155_v8 = vsub.s32 (!%p113_p2), %v152_v7, %v154_v4  ;;  %v1565_v52 = vld [vmem:[%s1770_s1 + $0x30] sm:$0xff] (!%p113_p2)   ;;  %v1566_v53 = vld [vmem:[%s1770_s1 + $0x38] sm:$0xff] (!%p113_p2)   ;;  %v1568_v63 = vld [vmem:[%s1770_s1 + $0x40] sm:$0xff] (!%p113_p2)  }
   0xb   : > { %v1567_v54 = vld [vmem:[%s1770_s1 + $0x38] sm:$0xff] (!%p113_p2)   ;;  %v1569_v0 = vld [vmem:[%s1770_s1 + $0x40] sm:$0xff] (!%p113_p2)  }
   0xd   : > { %s1773_s10 = smov (!%p133_p3, %s1248_s10), 1 }
   0xe   : > { %s1332_s15 = sshll.u32 %s1773_s10, 3  ;;  %s1255_s25 = sshll.u32 %s1773_s10, 1 }
   0xf   : > { %s1624_s18 = scalar_lea.vmem %s1769_s0, %s1332_s15  ;;  %s141_s28 = scalar_lea.vmem %s1771_s2, %s1255_s25 }
  0x10   : > { %v143_v9 = vld [vmem:[%s1624_s18] sm:$0x3]  ;;  %v1292_v10 = vld [vmem:[%s1624_s18 + $0x2] sm:$0x3]  ;;  %v1637_v23 = vld [vmem:[%s1624_s18 + $0x4] sm:$0x3] }
  0x11   : > { %v156_v11 = vrot.slane %v143_v9, %v155_v8  ;;  %v686_v12 = vrot.slane %v1292_v10, %v155_v8  ;;  %v1643_v24 = vrot.slane %v1637_v23, %v155_v8  ;;  %v1646_v25 = vld [vmem:[%s1624_s18 + $0x6] sm:$0x3]  ;;  %v1266_v33 = vld [vmem:[%s1624_s18 + $0x2] sm:$0x3]  ;;  %v1303_v34 = vld [vmem:[%s1624_s18 + $0x4] sm:$0x3] }
  0x12   : > { %v1652_v26 = vrot.slane %v1646_v25, %v155_v8  ;;  %v382_v35 = vrot.slane %v1266_v33, %v155_v8  ;;  %v907_v36 = vrot.slane %v1303_v34, %v155_v8 }
  0x13   : > { %v158_v13 = vshrl.u32 %v156_v11, 16  ;;  %v160_v14 = vshll.u32 %v156_v11, 16  ;;  %v688_v15 = vshrl.u32 %v686_v12, 16  ;;  %v690_v16 = vshll.u32 %v686_v12, 16 }
  0x14   : > { %v266_v29 = vrot.slane %v156_v11, 1  ;;  %v794_v30 = vrot.slane %v686_v12, 1  ;;  %v386_v39 = vshll.u32 %v382_v35, 16  ;;  %v911_v40 = vshll.u32 %v907_v36, 16 }
  0x15   : > { %v162_v17 = vrot.slane %v160_v14, 1  ;;  %v692_v19 = vrot.slane %v690_v16, 1  ;;  %v384_v41 = vshrl.u32 %v382_v35, 16  ;;  %v909_v43 = vshrl.u32 %v907_v36, 16 }
  0x16   : > { %v388_v42 = vrot.slane %v386_v39, 1  ;;  %v913_v44 = vrot.slane %v911_v40, 1  ;;  %v443_v49 = vrot.slane %v382_v35, 1  ;;  %v967_v50 = vrot.slane %v907_v36, 1 }
  0x17   : > { %v163_v21 = vor.u32 %v162_v17, %v158_v13  ;;  %v693_v22 = vor.u32 %v692_v19, %v688_v15  ;;  %v563_v55 = vshll.u32 %v1643_v24, 16  ;;  %v1085_v56 = vshll.u32 %v1652_v26, 16 }
  0x18   : > { %v389_v45 = vor.u32 %v388_v42, %v384_v41  ;;  %v914_v46 = vor.u32 %v913_v44, %v909_v43  ;;  %v561_v57 = vshrl.u32 %v1643_v24, 16  ;;  %v1083_v59 = vshrl.u32 %v1652_v26, 16 }
  0x19   : > { %1372 = vmatmul.mubr.msk.bf16.vlgmr.msra.gmra.mrb[0].mxu0 %vm170_vm1, %v163_v21  ;;  %1426 = vmatmul.mubr.msk.bf16.vlgmr.msra.gmra.mrb[0].mxu1 %vm170_vm1, %v693_v22  ;;  %v565_v58 = vrot.slane %v563_v55, 1  ;;  %v1087_v60 = vrot.slane %v1085_v56, 1  ;;  %v620_v1 = vrot.slane %v1643_v24, 1  ;;  %v1141_v3 = vrot.slane %v1652_v26, 1 }
  0x1a   : > { %1376 = vmatpush3.bf16.msra.mxu0 %v1554_v18  ;;  %1430 = vmatpush3.bf16.msra.mxu1 %v1555_v20 }
  0x1b   : > { %1377 = vmatprep.mubr.msk.bf16.mxu0 %vm1579_vm0, %v1578_v2  ;;  %1381 = vmatprep.subr.bf16.mxu0 %v1578_v2  ;;  %v566_v61 = vor.u32 %v565_v58, %v561_v57  ;;  %v1088_v62 = vor.u32 %v1087_v60, %v1083_v59 }
  0x1c   : > { %1431 = vmatprep.mubr.msk.bf16.mxu1 %vm1579_vm0, %v1578_v2  ;;  %1435 = vmatprep.subr.bf16.mxu1 %v1578_v2 }
  0x25   : > { %1378 = vmatmul.mubr.msk.bf16.vlgmr.msra.gmra.mrb[0].mxu0 %vm170_vm1, %v143_v9  ;;  %1432 = vmatmul.mubr.msk.bf16.vlgmr.msra.gmra.mrb[0].mxu1 %vm170_vm1, %v1292_v10 }
  0x26   : > { %1382 = vmatpush3.bf16.msra.mxu0 %v1556_v27  ;;  %1436 = vmatpush3.bf16.msra.mxu1 %v1557_v28 }
  0x27   : > { %1383 = vmatprep.mubr.msk.bf16.mxu0 %vm1579_vm0, %v1578_v2  ;;  %1387 = vmatprep.subr.bf16.mxu0 %v1578_v2 }
  0x28   : > { %1437 = vmatprep.mubr.msk.bf16.mxu1 %vm1579_vm0, %v1578_v2  ;;  %1441 = vmatprep.subr.bf16.mxu1 %v1578_v2 }
  0x31   : > { %1384 = vmatmul.mubr.msk.bf16.vlgmr.msra.gmra.mrb[0].mxu0 %vm170_vm1, %v266_v29  ;;  %1438 = vmatmul.mubr.msk.bf16.vlgmr.msra.gmra.mrb[0].mxu1 %vm170_vm1, %v794_v30 }
  0x32   : > { %1388 = vmatpush3.bf16.msra.mxu0 %v1558_v31  ;;  %1442 = vmatpush3.bf16.msra.mxu1 %v1559_v32 }
  0x33   : > { %1389 = vmatprep.mubr.msk.bf16.mxu0 %vm1579_vm0, %v1578_v2  ;;  %1393 = vmatprep.subr.bf16.mxu0 %v1578_v2 }
  0x34   : > { %1443 = vmatprep.mubr.msk.bf16.mxu1 %vm1579_vm0, %v1578_v2  ;;  %1447 = vmatprep.subr.bf16.mxu1 %v1578_v2 }
  0x3d   : > { %1390 = vmatmul.mubr.msk.bf16.vlgmr.msra.gmra.mrb[0].mxu0 %vm170_vm1, %v1266_v33  ;;  %1444 = vmatmul.mubr.msk.bf16.vlgmr.msra.gmra.mrb[0].mxu1 %vm170_vm1, %v1303_v34 }
  0x3e   : > { %1394 = vmatpush3.bf16.msra.mxu0 %v1560_v37  ;;  %1448 = vmatpush3.bf16.msra.mxu1 %v1561_v38 }
  0x3f   : > { %1395 = vmatprep.mubr.msk.bf16.mxu0 %vm1579_vm0, %v1578_v2  ;;  %1399 = vmatprep.subr.bf16.mxu0 %v1578_v2 }
  0x40   : > { %1449 = vmatprep.mubr.msk.bf16.mxu1 %vm1579_vm0, %v1578_v2  ;;  %1453 = vmatprep.subr.bf16.mxu1 %v1578_v2 }
  0x49   : > { %1396 = vmatmul.mubr.msk.bf16.vlgmr.msra.gmra.mrb[0].mxu0 %vm170_vm1, %v389_v45  ;;  %1450 = vmatmul.mubr.msk.bf16.vlgmr.msra.gmra.mrb[0].mxu1 %vm170_vm1, %v914_v46 }
  0x4a   : > { %1400 = vmatpush3.bf16.msra.mxu0 %v1562_v47  ;;  %1454 = vmatpush3.bf16.msra.mxu1 %v1563_v48 }
  0x4b   : > { %1401 = vmatprep.mubr.msk.bf16.mxu0 %vm1579_vm0, %v1578_v2  ;;  %1405 = vmatprep.subr.bf16.mxu0 %v1578_v2 }
  0x4c   : > { %1455 = vmatprep.mubr.msk.bf16.mxu1 %vm1579_vm0, %v1578_v2  ;;  %1459 = vmatprep.subr.bf16.mxu1 %v1578_v2 }
  0x55   : > { %1402 = vmatmul.mubr.msk.bf16.vlgmr.msra.gmra.mrb[0].mxu0 %vm170_vm1, %v443_v49  ;;  %1456 = vmatmul.mubr.msk.bf16.vlgmr.msra.gmra.mrb[0].mxu1 %vm170_vm1, %v967_v50 }
  0x56   : > { %1406 = vmatpush3.bf16.msra.mxu0 %v1564_v51  ;;  %1460 = vmatpush3.bf16.msra.mxu1 %v1565_v52 }
  0x57   : > { %1407 = vmatprep.mubr.msk.bf16.mxu0 %vm1579_vm0, %v1578_v2  ;;  %1411 = vmatprep.subr.bf16.mxu0 %v1578_v2 }
  0x58   : > { %1461 = vmatprep.mubr.msk.bf16.mxu1 %vm1579_vm0, %v1578_v2  ;;  %1465 = vmatprep.subr.bf16.mxu1 %v1578_v2 }
  0x61   : > { %1408 = vmatmul.mubr.msk.bf16.vlgmr.msra.gmra.mrb[0].mxu0 %vm170_vm1, %v1637_v23  ;;  %1462 = vmatmul.mubr.msk.bf16.vlgmr.msra.gmra.mrb[0].mxu1 %vm170_vm1, %v1646_v25 }
  0x62   : > { %1412 = vmatpush3.bf16.msra.mxu0 %v1566_v53  ;;  %1466 = vmatpush3.bf16.msra.mxu1 %v1567_v54 }
  0x63   : > { %1413 = vmatprep.mubr.msk.bf16.mxu0 %vm1579_vm0, %v1578_v2  ;;  %1417 = vmatprep.subr.bf16.mxu0 %v1578_v2 }
  0x64   : > { %1467 = vmatprep.mubr.msk.bf16.mxu1 %vm1579_vm0, %v1578_v2  ;;  %1471 = vmatprep.subr.bf16.mxu1 %v1578_v2 }
  0x6d   : > { %1414 = vmatmul.mubr.msk.bf16.vlgmr.msra.gmra.mrb[0].mxu0 %vm170_vm1, %v566_v61  ;;  %1468 = vmatmul.mubr.msk.bf16.vlgmr.msra.gmra.mrb[0].mxu1 %vm170_vm1, %v1088_v62 }
  0x6e   : > { %1418 = vmatpush3.bf16.msra.mxu0 %v1568_v63  ;;  %1472 = vmatpush3.bf16.msra.mxu1 %v1569_v0 }
  0x6f   : > { %1419 = vmatprep.mubr.msk.bf16.mxu0 %vm1579_vm0, %v1578_v2  ;;  %1473 = vmatprep.mubr.msk.bf16.mxu1 %vm1579_vm0, %v1578_v2 }
  0x79   : > { %1420 = vmatmul.mubr.msk.bf16.vlgmr.msra.gmra.mrb[0].mxu0 %vm170_vm1, %v620_v1  ;;  %1474 = vmatmul.mubr.msk.bf16.vlgmr.msra.gmra.mrb[0].mxu1 %vm170_vm1, %v1141_v3 }
 0x14c   : > { %v664_v4 = vpop.f32.mrb[0].mxu0  ;;  %v1185_v5 = vpop.f32.mrb[0].mxu1 }
 0x14d   : > { %v671_v6 = vpack.c.bf16 %v664_v4, %v664_v4  ;;  %v1192_v7 = vpack.c.bf16 %v1185_v5, %v1185_v5  ;;  %v1421_v8 = vpop.f32.mrb[1].mxu0  ;;  %v1475_v2 = vpop.f32.mrb[1].mxu1 }
 0x14e   : > { %v667_v9 = vpop.f32.mrb[2].mxu0  ;;  %v1188_v10 = vpop.f32.mrb[2].mxu1 }
 0x14f   : > { %673 = vst.msk [vmem:[%s141_s28] sm:$0x1] %vm672_vm2, %v671_v6  ;;  %1329 = vst.msk [vmem:[%s141_s28 + $0x1] sm:$0x1] %vm672_vm2, %v1192_v7  ;;  %v1422_v11 = vpop.f32.mrb[3].mxu0  ;;  %v1476_v12 = vpop.f32.mrb[3].mxu1 }
 0x150 PF: > { %s12_s9 = sadd.s32 1, %s1576_s9  }
 0x151   : > { %p9_p4 = scmp.ge.s32.totalorder %s12_s9, 4  }
 0x153   :  { %11 = sbr.rel (!%p9_p4) target bundleno = 1 (0x1), region = 70 }

// kernel: _lambda_.23
= control target key start
LH: loop header
LB: loop body
LE: loop exit
PB: predicated region body
PF: predicated region fallthrough
CT: control target
= control target key end

     0   :  { %vm212_vm0 = vcmask 1043456   ;;  %v437_v1 = vmov 0.0   ;;  %vm438_vm1 = vmmov 0   ;;  %vm182_vm2 = vcmask 60416   ;;  %s590_s0 = inlined_call_operand.vmem [shape: bf16[2,4,16], index: 0, kind: input, shape index: {}]   ;;  %s591_s1 = inlined_call_operand.vmem [shape: f32[1,1,16], index: 1, kind: input, shape index: {}]   ;;  %s592_s2 = inlined_call_operand.vmem [shape: f32[1,1,16], index: 2, kind: input, shape index: {}]   ;;  %s593_s3 = inlined_call_operand.vmem [shape: bf16[16,128], index: 3, kind: input, shape index: {}]   ;;  %s594_s4 = inlined_call_operand.vmem [shape: bf16[2,4,8], index: 4, kind: input, shape index: {}]   ;;  %s595_s5 = inlined_call_operand.vmem [shape: f32[1,1,8], index: 5, kind: input, shape index: {}, may-alias: {5,9}]   ;;  %s596_s6 = inlined_call_operand.vmem [shape: f32[1,1,8], index: 6, kind: input, shape index: {}, may-alias: {6,10}]   ;;  %s597_s7 = inlined_call_operand.vmem [shape: bf16[8,128], index: 7, kind: input, shape index: {}]   ;;  %s598_s8 = inlined_call_operand.vmem [shape: bf16[2,4,8], index: 8, kind: input, shape index: {}]   ;;  %s599_s9 = inlined_call_operand.vmem [shape: f32[1,1,8], index: 9, kind: input, shape index: {}, may-alias: {5,9}]   ;;  %s600_s10 = inlined_call_operand.vmem [shape: f32[1,1,8], index: 10, kind: input, shape index: {}, may-alias: {6,10}]   ;;  %s601_s11 = inlined_call_operand.vmem [shape: bf16[8,128], index: 11, kind: input, shape index: {}]   ;;  %s602_s12 = inlined_call_operand.vmem [shape: f32[1,128], index: 12, kind: input, shape index: {}]   ;;  %s603_s13 = inlined_call_operand.hbm [shape: f32[2,128], index: 13, kind: output, shape index: {}]  }
   0x1   :  { %v201_v0 = vld [vmem:[%s597_s7] sm:$0xf]  ;;  %391 = vmatprep.subr.bf16.mxu0 %v437_v1  ;;  %385 = vmatprep.subr.bf16.mxu1 %v437_v1 }
   0x2   :  { %v214_v2 = vsel %vm212_vm0, %v201_v0, 0  ;;  %v158_v3 = vld [vmem:[%s594_s4] sm:$0x3]  ;;  %393 = vmatprep.mubr.msk.bf16.mxu0 %vm438_vm1, %v437_v1  ;;  %v159_v4 = vld [vmem:[%s594_s4 + $0x2] sm:$0x3]  ;;  %387 = vmatprep.mubr.msk.bf16.mxu1 %vm438_vm1, %v437_v1 }
   0x3   :  { %392 = vmatpush3.bf16.msra.mxu0 %v214_v2  ;;  %v160_v5 = vunpack.c.l.bf16 %v158_v3  ;;  %v373_v6 = vld [vmem:[%s595_s5] ss:$0 sm:$0xff]  ;;  %v161_v7 = vunpack.c.l.bf16 %v159_v4  ;;  %v55_v12 = vld [vmem:[%s590_s0 + $0x2] sm:$0x3] }
   0x4   :  { %397 = vmatprep.subr.bf16.mxu0 %v437_v1  ;;  %v374_v8 = vld [vmem:[%s596_s6] ss:$0 sm:$0xff]  ;;  %v57_v15 = vunpack.c.l.bf16 %v55_v12  ;;  %v258_v20 = vld [vmem:[%s598_s8 + $0x2] sm:$0x3] }
   0x5   :  { %v169_v9 = vmul.f32 %v373_v6, %v160_v5  ;;  %v412_v10 = vld [vmem:[%s593_s3] sm:$0xff]   ;;  %v170_v13 = vmul.f32 %v373_v6, %v161_v7 }
   0x6   :  { %v54_v11 = vld [vmem:[%s590_s0] sm:$0x3]  ;;  %386 = vmatpush3.bf16.msra.mxu1 %v412_v10 }
   0x7   :  { %v56_v14 = vunpack.c.l.bf16 %v54_v11  ;;  %v369_v16 = vld [vmem:[%s591_s1] ss:$0 sm:$0xff]  ;;  %v178_v18 = vadd.f32 %v374_v8, %v169_v9  ;;  %v179_v22 = vadd.f32 %v374_v8, %v170_v13 }
   0x8   :  { %v370_v17 = vld [vmem:[%s592_s2] ss:$0 sm:$0xff]  ;;  %v66_v24 = vmul.f32 %v369_v16, %v57_v15 }
   0x9   :  { %v257_v19 = vld [vmem:[%s598_s8] sm:$0x3]  ;;  %v65_v23 = vmul.f32 %v369_v16, %v56_v14 }
   0xa   :  { %v376_v21 = vld [vmem:[%s599_s9] ss:$0 sm:$0xff]  ;;  %v259_v25 = vunpack.c.l.bf16 %v257_v19 }
   0xb   :  { %18 = vsyncpa [#allocation3], 0  ;;  %v180_v26 = vmax.f32 %v178_v18, 0.0  ;;  %v260_v27 = vunpack.c.l.bf16 %v258_v20  ;;  %v181_v28 = vmax.f32 %v179_v22, 0.0  ;;  %v74_v29 = vadd.f32 %v370_v17, %v65_v23  ;;  %v377_v32 = vld [vmem:[%s600_s10] ss:$0 sm:$0xff] }
   0xc   :  { %v75_v30 = vadd.f32 %v370_v17, %v66_v24  ;;  %v268_v31 = vmul.f32 %v376_v21, %v259_v25  ;;  %vm78_vm3 = vcmask 125952   ;;  %vm104_vm4 = vcmask 1041409   ;;  %v299_v25 = vld [vmem:[%s601_s11] sm:$0xf]  ;;  %s439_s28 = smov [#allocation2]  }
   0xd   :  { %v183_v33 = vsel %vm182_vm2, %v180_v26, 0.0  ;;  %v269_v34 = vmul.f32 %v376_v21, %v260_v27  ;;  %v190_v36 = vsel %vm182_vm2, %v181_v28, 0.0  ;;  %v76_v37 = vmax.f32 %v74_v29, 0.0  ;;  %s360_s29 = sshll.u32 %s439_s28, 4  ;;  %s361_s29 = int_to_ptr.vmem [resolvable:$true] %s360_s29 }
   0xe   :  { %v184_v35 = vrot.slane %v183_v33, 4  ;;  %v77_v38 = vmax.f32 %v75_v30, 0.0  ;;  %v191_v39 = vrot.slane %v190_v36, 4  ;;  %v277_v40 = vadd.f32 %v377_v32, %v268_v31  ;;  %s413_s30 = scalar_lea.vmem %s361_s29, 32  ;;  %p418_p1 = scmp.lt.s32.totalorder %s361_s29, %s361_s29 }
   0xf   :  { %v278_v41 = vadd.f32 %v377_v32, %v269_v34  ;;  %v79_v43 = vsel %vm78_vm3, %v76_v37, 0.0  ;;  %vm208_vm5 = vcmask 64512   ;;  %vm113_vm6 = vcmask 130048   ;;  %p414_p0 = scmp.ne.s32.totalorder %s361_s29, %s413_s30  ;;  %p419_p2 = scmp.lt.s32.totalorder %s413_s30, %s413_s30 }
  0x10   :  { %v185_v42 = vadd.f32 %v184_v35, %v183_v33  ;;  %v86_v44 = vsel %vm78_vm3, %v77_v38, 0.0  ;;  %v192_v45 = vadd.f32 %v191_v39, %v190_v36  ;;  %v80_v46 = vrot.slane %v79_v43, 4 }
  0x11   :  { %v87_v47 = vrot.slane %v86_v44, 4  ;;  %v279_v48 = vmax.f32 %v277_v40, 0.0  ;;  %v280_v50 = vmax.f32 %v278_v41, 0.0  ;;  %v310_v35 = vsel %vm212_vm0, %v299_v25, 0  ;;  %p420_p3 = por %p419_p2, %p418_p1 }
  0x12   :  { %v186_v49 = vrot.slane %v185_v42, 2  ;;  %v193_v51 = vrot.slane %v192_v45, 2  ;;  %v81_v52 = vadd.f32 %v80_v46, %v79_v43 }
  0x13   :  { %v88_v53 = vadd.f32 %v87_v47, %v86_v44  ;;  %v281_v54 = vsel %vm182_vm2, %v279_v48, 0.0  ;;  %v288_v57 = vsel %vm182_vm2, %v280_v50, 0.0  ;;  %p421_p4 = pnand %p420_p3, %p414_p0 }
  0x14   :  { %v187_v55 = vadd.f32 %v186_v49, %v185_v42  ;;  %v282_v56 = vrot.slane %v281_v54, 4  ;;  %v194_v58 = vadd.f32 %v193_v51, %v192_v45  ;;  %v82_v59 = vrot.slane %v81_v52, 2  ;;  %v368_v49 = vld [vmem:[%s602_s12] ss:$0 sm:$0xff] }
  0x15   :  { %v89_v60 = vrot.slane %v88_v53, 2  ;;  %v289_v61 = vrot.slane %v288_v57, 4 }
  0x16   :  { %v188_v62 = vrot.slane %v187_v55, 1  ;;  %v283_v63 = vadd.f32 %v282_v56, %v281_v54  ;;  %v195_v0 = vrot.slane %v194_v58, 1  ;;  %v83_v2 = vadd.f32 %v82_v59, %v81_v52 }
  0x17   :  { %v90_v3 = vadd.f32 %v89_v60, %v88_v53  ;;  %v290_v4 = vadd.f32 %v289_v61, %v288_v57 }
  0x18   :  { %v189_v5 = vadd.f32 %v188_v62, %v187_v55  ;;  %v284_v6 = vrot.slane %v283_v63, 2  ;;  %v196_v7 = vadd.f32 %v195_v0, %v194_v58  ;;  %v84_v8 = vrot.slane %v83_v2, 1 }
  0x19   :  { %v91_v9 = vrot.slane %v90_v3, 1  ;;  %v291_v10 = vrot.slane %v290_v4, 2 }
  0x1a   :  { %v197_v11 = vmul.f32 0.25, %v189_v5  ;;  %v285_v12 = vadd.f32 %v284_v6, %v283_v63  ;;  %v198_v13 = vmul.f32 0.25, %v196_v7  ;;  %v85_v14 = vadd.f32 %v84_v8, %v83_v2 }
  0x1b   :  { %v92_v15 = vadd.f32 %v91_v9, %v90_v3  ;;  %v292_v16 = vadd.f32 %v291_v10, %v290_v4 }
  0x1c   :  { %v199_v17 = vpack.c.bf16 %v197_v11, %v197_v11  ;;  %v286_v18 = vrot.slane %v285_v12, 1  ;;  %v200_v19 = vpack.c.bf16 %v198_v13, %v198_v13  ;;  %v94_v20 = vmul.f32 0.25, %v85_v14 }
  0x1d   :  { %v95_v21 = vmul.f32 0.25, %v92_v15  ;;  %v293_v22 = vrot.slane %v292_v16, 1 }
  0x1e   :  { %v204_v23 = vunpack.c.l.b16 %v199_v17  ;;  %v287_v24 = vadd.f32 %v286_v18, %v285_v12  ;;  %v205_v26 = vunpack.c.l.b16 %v200_v19  ;;  %v96_v27 = vpack.c.bf16 %v94_v20, %v94_v20 }
  0x1f   :  { %v97_v28 = vpack.c.bf16 %v95_v21, %v95_v21  ;;  %v294_v29 = vadd.f32 %v293_v22, %v292_v16 }
  0x20   :  { %v295_v30 = vmul.f32 0.25, %v287_v24  ;;  %v206_v31 = vsel %vm104_vm4, %v205_v26, %v204_v23  ;;  %v102_v32 = vunpack.c.l.b16 %v96_v27 }
  0x21   :  { %v103_v33 = vunpack.c.l.b16 %v97_v28  ;;  %v296_v34 = vmul.f32 0.25, %v294_v29  ;;  %v207_v36 = vpack.c.b16 %v206_v31, %v206_v31 }
  0x22   :  { %v297_v37 = vpack.c.bf16 %v295_v30, %v295_v30 }
  0x23   :  { %v105_v38 = vsel %vm104_vm4, %v103_v33, %v102_v32  ;;  %v298_v39 = vpack.c.bf16 %v296_v34, %v296_v34  ;;  %394 = vmatmul.mubr.msk.bf16.vlgmr.msra.gmra.mrb[0].mxu0 %vm208_vm5, %v207_v36 }
  0x24   :  { %v106_v40 = vpack.c.b16 %v105_v38, %v105_v38  ;;  %398 = vmatpush3.bf16.msra.mxu0 %v310_v35  ;;  %399 = vmatprep.mubr.msk.bf16.mxu0 %vm438_vm1, %v437_v1  ;;  %v302_v41 = vunpack.c.l.b16 %v297_v37 }
  0x25   :  { %v303_v42 = vunpack.c.l.b16 %v298_v39 }
  0x26   :  { %388 = vmatmul.mubr.msk.bf16.vlgmr.msra.gmra.mrb[0].mxu1 %vm113_vm6, %v106_v40 }
  0x27   :  { %v304_v43 = vsel %vm104_vm4, %v303_v42, %v302_v41 }
  0x28   :  { %v305_v44 = vpack.c.b16 %v304_v43, %v304_v43 }
  0x2f   :  { %400 = vmatmul.mubr.msk.bf16.vlgmr.msra.gmra.mrb[0].mxu0 %vm208_vm5, %v305_v44 }
  0xf9   :  { %v151_v45 = vpop.f32.mrb[0].mxu1 }
  0xfa   :  { %v389_v46 = vpop.f32.mrb[1].mxu1  ;;  %v157_v50 = vadd.f32 %v368_v49, %v151_v45 }
  0xfb   :  { %v154_v47 = vpop.f32.mrb[2].mxu1 }
  0xfc   :  { %v390_v48 = vpop.f32.mrb[3].mxu1 }
 0x102   :  { %v346_v1 = vpop.f32.mrb[0].mxu0 }
 0x103   :  { %v404_v51 = vadd.f32 %v346_v1, %v157_v50  ;;  %v401_v52 = vpop.f32.mrb[1].mxu0 }
 0x104   :  { %v349_v53 = vpop.f32.mrb[2].mxu0 }
 0x105   :  { %353 = vst [vmem:[#allocation2] sm:$0x3] %v404_v51  ;;  %v402_v54 = vpop.f32.mrb[3].mxu0 }
 0x106   :  { %424 = shalt.err (!%p421_p4)
}
 0x107   :  { %s425_s12 = scalar_lea.hbm %s603_s13, 32 }
 0x108   :  { %p426_p5 = scmp.ne.s32.totalorder %s603_s13, %s425_s12  ;;  %p429_p6 = scmp.lt.u32.totalorder %s425_s12, %s603_s13 }
 0x10a   :  { %p431_p7 = pnand %p429_p6, %p426_p5 }
 0x10c   :  { %434 = shalt.err (!%p431_p7)
}
 0x10d   :  { %363 = dma.vmem_to_hbm [thread:$0]  %s361_s29, 32, %s603_s13, [#allocation3]  }
 0x10e   :  { %435 = dma.done.wait [#allocation3], 32  }
 0x10f   :  { %436 = vsyncadd [#allocation3], 4294967264 }
 0x110   :  { %367 = vsyncpa [#allocation3], 1 }

</bundles_post_ra>
